<compile_context>
chip_gen: v7x
topology: tpu7x:2x2x1
jax: 0.10.0
libtpu: 0.0.40
codegen_flags: <defaults>
</compile_context>

<pallas_src>
import math
from functools import partial

import jax
import jax.numpy as jnp
from jax.experimental import pallas as pl
from jax.experimental.pallas import tpu as pltpu

EPS = 1e-5
LANE = 128
SUBLANE = 8
_GRID_ROW_THRESHOLD = 512   # rows (= 2 * samples) above which a sample-tile grid is used
_SAMPLE_TILE = 256          # samples per grid step when gridded (512 trunk rows)


def _round_up(x, m):
    return ((x + m - 1) // m) * m


# --------------------------------- kernel ---------------------------------- #

def _resnet_fused_kernel(*refs, has_ds, vec_slices):
    """Entire ResNet forward for one sample tile, fully VMEM-resident.

    refs = [x (2, T, 64) f32, vecs (1, V) f32,
            per-block ([ds_w]?, w1, w2) bf16,
            fc1_w bf16, fc2_w bf16,
            feats (T, 512) f32, y (T, 128) f32, ca (T, 128) f32]
    """
    it = iter(refs)
    x_ref = next(it)
    vec_ref = next(it)

    blocks = []
    for ds in has_ds:
        d = {}
        if ds:
            d["ds_w"] = next(it)
        d["w1"] = next(it)
        d["w2"] = next(it)
        blocks.append(d)
    fc1_w, fc2_w = next(it), next(it)
    feats_ref, y_ref, ca_ref = next(it), next(it), next(it)

    def vec(name):
        off, width = vec_slices[name]          # static, 128-lane-aligned offset
        return vec_ref[:, off:off + width]     # (1, width) f32, free static slice

    def mm(a, w_ref):
        # bf16 x bf16 MXU feed with f32 accumulation; BN scale already folded in.
        return jnp.dot(a.astype(jnp.bfloat16), w_ref[...],
                       preferred_element_type=jnp.float32)

    conv1_w = vec("conv1_w")                   # (1, 64), BN1 scale folded in
    bn1_t = vec("bn1_shift")

    def trunk(xp):
        # conv1 (Cin == 1) as a VPU broadcast-multiply + folded BN shift + ReLU.
        h = jnp.maximum(xp * conv1_w + bn1_t, 0.0)
        # layer1..layer4 BasicBlocks (all pointwise convs), fully unrolled.
        for bi, d in enumerate(blocks):
            if "ds_w" in d:
                res = mm(h, d["ds_w"]) + vec(f"ds_t_{bi}")
            else:
                res = h
            u = jnp.maximum(mm(h, d["w1"]) + vec(f"t1_{bi}"), 0.0)
            h = jnp.maximum(mm(u, d["w2"]) + vec(f"t2_{bi}") + res, 0.0)
        return h

    # The two L positions share weights; run them as independent row slabs so no
    # reshape / relayout of the x block is needed, then AvgPool1d(2) is one add.
    h0 = trunk(x_ref[0])
    h1 = trunk(x_ref[1])
    pooled = (h0 + h1) * 0.5                   # (T, 512) == x.view(N, -1)
    feats_ref[...] = pooled

    # fc1 (Linear + folded BN + ReLU) and fc2 (Linear + bias), lane-dense slabs.
    y = jnp.maximum(mm(pooled, fc1_w) + vec("fc1_t"), 0.0)
    y_ref[...] = y
    ca_ref[...] = mm(y, fc2_w) + vec("fc2_t")


# ------------------------------- forward pass ------------------------------- #

def make_forward(meta, *, num_neurons, num_classes):
    has_ds = meta["has_ds"]
    vec_slices = meta["vec_slices"]
    c_trunk = meta["c_trunk"]
    fc1_pad = meta["fc1_pad"]
    fc2_pad = meta["fc2_pad"]
    kernel = partial(_resnet_fused_kernel, has_ds=has_ds, vec_slices=vec_slices)

    @jax.jit
    def forward(params, x):
        n, c, l = x.shape
        assert c == 1 and l == 2, "fc1 in_features = 512 requires NCL input with L == 2"

        # Sample tiling: gridless single tile for tiny batches; sample-tile grid
        # (parallel across TensorCores) once N*L >= ~512 rows.
        if 2 * n >= _GRID_ROW_THRESHOLD:
            tile = _SAMPLE_TILE
        else:
            tile = _round_up(max(n, 1), SUBLANE)
        n_pad = _round_up(n, tile)
        grid_n = n_pad // tile

        # (N,1,L) -> (L, N_pad, 64): position-major, value broadcast across the
        # 64 conv1-output lanes in the wrapper (no masked 1-lane load in-kernel).
        xb = jnp.transpose(x, (2, 0, 1))                       # (L, N, 1)
        xb = jnp.pad(xb, ((0, 0), (0, n_pad - n), (0, 0)))
        xb = jnp.broadcast_to(xb, (l, n_pad, 64))

        flat = [xb, params["vecs"]] + list(params["block_ws"]) \
            + [params["fc1_w"], params["fc2_w"]]

        flops = (2 * (2 * n_pad) * sum(k * m for k, m in meta["mm_dims"])
                 + 2 * n_pad * sum(k * m for k, m in meta["fc_dims"]))
        bytes_accessed = (sum(int(a.size) * a.dtype.itemsize for a in flat)
                          + n_pad * (c_trunk + fc1_pad + fc2_pad) * 4)
        cost = pl.CostEstimate(flops=flops, transcendentals=0,
                               bytes_accessed=bytes_accessed)

        out_shape = (jax.ShapeDtypeStruct((n_pad, c_trunk), jnp.float32),
                     jax.ShapeDtypeStruct((n_pad, fc1_pad), jnp.float32),
                     jax.ShapeDtypeStruct((n_pad, fc2_pad), jnp.float32))

        if grid_n == 1:
            # Single tile: everything VMEM-resident, each weight DMA'd exactly once.
            vmem = pl.BlockSpec(memory_space=pltpu.MemorySpace.VMEM)
            feats, y_pad, ca_pad = pl.pallas_call(
                kernel,
                out_shape=out_shape,
                in_specs=[vmem] * len(flat),
                out_specs=(vmem, vmem, vmem),
                cost_estimate=cost,
            )(*flat)
        else:
            def const(shape):
                # Full-array block with a constant index map: fetched once, resident.
                return pl.BlockSpec(shape, lambda i: tuple(0 for _ in shape))

            in_specs = ([pl.BlockSpec((l, tile, 64), lambda i: (0, i, 0)),
                         const(params["vecs"].shape)]
                        + [const(w.shape) for w in params["block_ws"]]
                        + [const(params["fc1_w"].shape),
                           const(params["fc2_w"].shape)])
            out_specs = (pl.BlockSpec((tile, c_trunk), lambda i: (i, 0)),
                         pl.BlockSpec((tile, fc1_pad), lambda i: (i, 0)),
                         pl.BlockSpec((tile, fc2_pad), lambda i: (i, 0)))
            feats, y_pad, ca_pad = pl.pallas_call(
                kernel,
                out_shape=out_shape,
                grid=(grid_n,),
                in_specs=in_specs,
                out_specs=out_specs,
                compiler_params=pltpu.CompilerParams(
                    dimension_semantics=("parallel",)),
                cost_estimate=cost,
            )(*flat)

        return feats[:n], y_pad[:n, :num_neurons], ca_pad[:n, :num_classes]

    return forward


# ----------------------------- parameter setup ------------------------------ #

def init_params(key, layers=(1, 1, 1, 1), num_classes=10, num_neurons=32):
    """Builds params with inference-mode BN folded into the weights; the folded
    conv1 weight plus every remaining shift is packed into one lane-aligned f32
    vector buffer so the kernel takes a minimal number of input refs."""
    expansion = 1   # BasicBlock
    keys = iter(jax.random.split(key, 256))

    vec_chunks = []                   # (name, (width,) f32)

    def add_vec(name, arr):
        vec_chunks.append((name, jnp.asarray(arr, jnp.float32).reshape(-1)))

    def bn_fold(k, cdim):
        # Inference BatchNorm1d -> per-channel (scale, shift); gamma=1, beta=0 as
        # in the module init, deterministic pseudo running stats.
        k1, k2 = jax.random.split(k)
        gamma = jnp.ones((cdim,), jnp.float32)
        beta = jnp.zeros((cdim,), jnp.float32)
        mean = 0.1 * jax.random.normal(k1, (cdim,), jnp.float32)
        var = 0.5 + jax.random.uniform(k2, (cdim,), jnp.float32)
        scale = gamma / jnp.sqrt(var + EPS)
        shift = beta - mean * scale
        return scale, shift

    # conv1: Conv1d(1, 64, k=1, bias=False); weight ~ N(0, sqrt(2/(k*out))).
    conv1_w = jax.random.normal(next(keys), (1, 64), jnp.float32) * math.sqrt(2.0 / 64)
    s, t = bn_fold(next(keys), 64)
    add_vec("conv1_w", conv1_w * s)            # BN1 scale folded; stays f32 (VPU path)
    add_vec("bn1_shift", t)

    block_ws, has_ds, mm_dims = [], [], []
    inplanes, bi = 64, 0
    for planes, nblocks in zip((64, 128, 256, 512), layers):
        for j in range(nblocks):
            outc = planes * expansion
            ds = (j == 0 and inplanes != outc)       # stride is always 1 here
            has_ds.append(ds)
            if ds:
                dw = (jax.random.normal(next(keys), (inplanes, outc), jnp.float32)
                      * math.sqrt(2.0 / outc))
                dss, dst = bn_fold(next(keys), outc)
                block_ws.append((dw * dss).astype(jnp.bfloat16))
                add_vec(f"ds_t_{bi}", dst)
                mm_dims.append((inplanes, outc))
            w1 = (jax.random.normal(next(keys), (inplanes, planes), jnp.float32)
                  * math.sqrt(2.0 / planes))
            s1, t1 = bn_fold(next(keys), planes)
            block_ws.append((w1 * s1).astype(jnp.bfloat16))
            add_vec(f"t1_{bi}", t1)
            mm_dims.append((inplanes, planes))
            w2 = (jax.random.normal(next(keys), (planes, outc), jnp.float32)
                  * math.sqrt(2.0 / outc))
            s2, t2 = bn_fold(next(keys), outc)
            block_ws.append((w2 * s2).astype(jnp.bfloat16))
            add_vec(f"t2_{bi}", t2)
            mm_dims.append((planes, outc))
            inplanes = outc
            bi += 1
    c_trunk = inplanes                               # 512 * expansion

    # fc1: Linear(512*e*e, num_neurons*e) + BatchNorm1d + ReLU; BN scale folded
    # into the weight, Linear bias folded through BN into the shift.
    in_f = 512 * expansion * expansion
    out_f = num_neurons * expansion
    fc1_pad = _round_up(out_f, LANE)
    b1 = 1.0 / math.sqrt(in_f)
    fw1 = jax.random.uniform(next(keys), (in_f, out_f), jnp.float32, minval=-b1, maxval=b1)
    fb1 = jax.random.uniform(next(keys), (out_f,), jnp.float32, minval=-b1, maxval=b1)
    s, t = bn_fold(next(keys), out_f)
    fc1_w = jnp.pad(fw1 * s, ((0, 0), (0, fc1_pad - out_f))).astype(jnp.bfloat16)
    add_vec("fc1_t", jnp.pad(s * fb1 + t, (0, fc1_pad - out_f)))

    # fc2: Linear(num_neurons*e, num_classes) with bias; no BN (no scale at all).
    fc2_pad = _round_up(num_classes, LANE)
    b2 = 1.0 / math.sqrt(out_f)
    fw2 = jax.random.uniform(next(keys), (out_f, num_classes), jnp.float32,
                             minval=-b2, maxval=b2)
    fb2 = jax.random.uniform(next(keys), (num_classes,), jnp.float32,
                             minval=-b2, maxval=b2)
    fc2_w = jnp.pad(fw2, ((0, fc1_pad - out_f), (0, fc2_pad - num_classes))
                    ).astype(jnp.bfloat16)
    add_vec("fc2_t", jnp.pad(fb2, (0, fc2_pad - num_classes)))

    # Pack every (1, C) vector into one buffer; each chunk starts at a 128-lane
    # aligned offset so the in-kernel static slices never need a lane rotate.
    parts, vec_slices, off = [], {}, 0
    for name, arr in vec_chunks:
        width = int(arr.shape[0])
        wpad = _round_up(width, LANE)
        parts.append(jnp.pad(arr, (0, wpad - width)))
        vec_slices[name] = (off, width)
        off += wpad
    vecs = jnp.concatenate(parts).reshape(1, -1)

    params = {"vecs": vecs, "block_ws": block_ws, "fc1_w": fc1_w, "fc2_w": fc2_w}
    meta = {"has_ds": tuple(has_ds), "vec_slices": vec_slices, "c_trunk": c_trunk,
            "fc1_pad": fc1_pad, "fc2_pad": fc2_pad, "mm_dims": tuple(mm_dims),
            "fc_dims": ((in_f, fc1_pad), (fc1_pad, fc2_pad))}
    return params, meta


# ------------------------------ plain-JAX check ------------------------------ #

def reference_forward(params, meta, x, *, num_neurons, num_classes):
    """Plain-JAX replica of the exact kernel math (same folded bf16 weights and
    the same bf16 MXU feed with f32 accumulation)."""
    vec_slices = meta["vec_slices"]
    vecs = params["vecs"]

    def vec(name):
        off, width = vec_slices[name]
        return vecs[:, off:off + width]

    def mm(a, w):
        return jnp.dot(a.astype(jnp.bfloat16), w, preferred_element_type=jnp.float32)

    blocks, wi = [], 0
    wlist = list(params["block_ws"])
    for ds in meta["has_ds"]:
        d = {}
        if ds:
            d["ds_w"] = wlist[wi]; wi += 1
        d["w1"] = wlist[wi]; wi += 1
        d["w2"] = wlist[wi]; wi += 1
        blocks.append(d)

    def trunk(xp):                                   # xp: (N, 1)
        h = jnp.maximum(xp * vec("conv1_w") + vec("bn1_shift"), 0.0)
        for bi, d in enumerate(blocks):
            if "ds_w" in d:
                res = mm(h, d["ds_w"]) + vec(f"ds_t_{bi}")
            else:
                res = h
            u = jnp.maximum(mm(h, d["w1"]) + vec(f"t1_{bi}"), 0.0)
            h = jnp.maximum(mm(u, d["w2"]) + vec(f"t2_{bi}") + res, 0.0)
        return h

    h0 = trunk(x[:, :, 0])                           # L position 0, (N, 1)
    h1 = trunk(x[:, :, 1])                           # L position 1
    pooled = 0.5 * (h0 + h1)                         # AvgPool1d(2) + view(N, -1)
    y = jnp.maximum(mm(pooled, params["fc1_w"]) + vec("fc1_t"), 0.0)
    ca = mm(y, params["fc2_w"]) + vec("fc2_t")
    return pooled, y[:, :num_neurons], ca[:, :num_classes]


# ----------------------------------- main ------------------------------------ #

if __name__ == "__main__":
    key = jax.random.PRNGKey(0)
    kp, kx_small, kx_large = jax.random.split(key, 3)

    NUM_CLASSES, NUM_NEURONS = 10, 32
    params, meta = init_params(kp, layers=(1, 1, 1, 1),
                               num_classes=NUM_CLASSES, num_neurons=NUM_NEURONS)
    forward = make_forward(meta, num_neurons=NUM_NEURONS, num_classes=NUM_CLASSES)

    def run_and_check(xin):
        feats, y, ca = forward(params, xin)
        jax.block_until_ready((feats, y, ca))
        rfeats, ry, rca = reference_forward(params, meta, xin,
                                            num_neurons=NUM_NEURONS,
                                            num_classes=NUM_CLASSES)
        nloc = xin.shape[0]
        assert feats.shape == (nloc, 512)
        assert y.shape == (nloc, NUM_NEURONS) and ca.shape == (nloc, NUM_CLASSES)
        # Both kernel and reference use the same bf16 MXU feed; the tolerance only
        # has to absorb accumulation-order differences.
        for got, want in ((feats, rfeats), (y, ry), (ca, rca)):
            err = float(jnp.max(jnp.abs(got - want)))
            assert jnp.allclose(got, want, atol=3e-3, rtol=3e-3), err

    # Small batch: single-tile gridless path (a grid would be pure overhead here).
    run_and_check(jax.random.normal(kx_small, (8, 1, 2), jnp.float32))
    # Larger batch: sample-tiled grid path (parallel across v7x TensorCores); also
    # exercises the N -> multiple-of-tile row padding.
    run_and_check(jax.random.normal(kx_large, (500, 1, 2), jnp.float32))

    print("KERNEL_OK")
</pallas_src>

<mosaic_0001>
module attributes {stable_mosaic.version = 11 : i64} {
  func.func @_resnet_fused_kernel(%arg0: memref<2x8x64xf32, #tpu.memory_space<vmem>>, %arg1: memref<1x3456xf32, #tpu.memory_space<vmem>>, %arg2: memref<64x64xbf16, #tpu.memory_space<vmem>>, %arg3: memref<64x64xbf16, #tpu.memory_space<vmem>>, %arg4: memref<64x128xbf16, #tpu.memory_space<vmem>>, %arg5: memref<64x128xbf16, #tpu.memory_space<vmem>>, %arg6: memref<128x128xbf16, #tpu.memory_space<vmem>>, %arg7: memref<128x256xbf16, #tpu.memory_space<vmem>>, %arg8: memref<128x256xbf16, #tpu.memory_space<vmem>>, %arg9: memref<256x256xbf16, #tpu.memory_space<vmem>>, %arg10: memref<256x512xbf16, #tpu.memory_space<vmem>>, %arg11: memref<256x512xbf16, #tpu.memory_space<vmem>>, %arg12: memref<512x512xbf16, #tpu.memory_space<vmem>>, %arg13: memref<512x128xbf16, #tpu.memory_space<vmem>>, %arg14: memref<128x128xbf16, #tpu.memory_space<vmem>>, %arg15: memref<8x512xf32, #tpu.memory_space<vmem>>, %arg16: memref<8x128xf32, #tpu.memory_space<vmem>>, %arg17: memref<8x128xf32, #tpu.memory_space<vmem>>) attributes {dimension_semantics = [], scalar_prefetch = 0 : i64, scratch_operands = 0 : i64, tpu.core_type = #tpu.core_type<tc>} {
    %c0 = arith.constant 0 : index
    %c0_0 = arith.constant 0 : index
    %0 = vector.load %arg1[%c0, %c0_0] : memref<1x3456xf32, #tpu.memory_space<vmem>>, vector<1x64xf32>
    %c0_1 = arith.constant 0 : index
    %c128 = arith.constant 128 : index
    %1 = vector.load %arg1[%c0_1, %c128] : memref<1x3456xf32, #tpu.memory_space<vmem>>, vector<1x64xf32>
    %c0_2 = arith.constant 0 : index
    %c0_3 = arith.constant 0 : index
    %c0_4 = arith.constant 0 : index
    %2 = vector.load %arg0[%c0_2, %c0_3, %c0_4] : memref<2x8x64xf32, #tpu.memory_space<vmem>>, vector<1x8x64xf32>
    %3 = vector.shape_cast %2 : vector<1x8x64xf32> to vector<8x64xf32>
    %4 = vector.broadcast %0 : vector<1x64xf32> to vector<8x64xf32>
    %5 = arith.mulf %3, %4 : vector<8x64xf32>
    %6 = vector.broadcast %1 : vector<1x64xf32> to vector<8x64xf32>
    %7 = arith.addf %5, %6 : vector<8x64xf32>
    %cst = arith.constant 0.000000e+00 : f32
    %8 = vector.broadcast %cst : f32 to vector<8x64xf32>
    %9 = arith.maximumf %7, %8 : vector<8x64xf32>
    %10 = arith.truncf %9 : vector<8x64xf32> to vector<8x64xbf16>
    %c0_5 = arith.constant 0 : index
    %c0_6 = arith.constant 0 : index
    %11 = vector.load %arg2[%c0_5, %c0_6] : memref<64x64xbf16, #tpu.memory_space<vmem>>, vector<64x64xbf16>
    %cst_7 = arith.constant dense<0.000000e+00> : vector<8x64xf32>
    %12 = tpu.matmul %10, %11, %cst_7 {dimension_numbers = #tpu.dot_dimension_numbers<[1], [0], [0], [1], [0, 0, 1, 1], [], []>} : vector<8x64xbf16>, vector<64x64xbf16>, vector<8x64xf32> -> vector<8x64xf32>
    %c0_8 = arith.constant 0 : index
    %c256 = arith.constant 256 : index
    %13 = vector.load %arg1[%c0_8, %c256] : memref<1x3456xf32, #tpu.memory_space<vmem>>, vector<1x64xf32>
    %14 = vector.broadcast %13 : vector<1x64xf32> to vector<8x64xf32>
    %15 = arith.addf %12, %14 : vector<8x64xf32>
    %cst_9 = arith.constant 0.000000e+00 : f32
    %16 = vector.broadcast %cst_9 : f32 to vector<8x64xf32>
    %17 = arith.maximumf %15, %16 : vector<8x64xf32>
    %18 = arith.truncf %17 : vector<8x64xf32> to vector<8x64xbf16>
    %c0_10 = arith.constant 0 : index
    %c0_11 = arith.constant 0 : index
    %19 = vector.load %arg3[%c0_10, %c0_11] : memref<64x64xbf16, #tpu.memory_space<vmem>>, vector<64x64xbf16>
    %cst_12 = arith.constant dense<0.000000e+00> : vector<8x64xf32>
    %20 = tpu.matmul %18, %19, %cst_12 {dimension_numbers = #tpu.dot_dimension_numbers<[1], [0], [0], [1], [0, 0, 1, 1], [], []>} : vector<8x64xbf16>, vector<64x64xbf16>, vector<8x64xf32> -> vector<8x64xf32>
    %c0_13 = arith.constant 0 : index
    %c384 = arith.constant 384 : index
    %21 = vector.load %arg1[%c0_13, %c384] : memref<1x3456xf32, #tpu.memory_space<vmem>>, vector<1x64xf32>
    %22 = vector.broadcast %21 : vector<1x64xf32> to vector<8x64xf32>
    %23 = arith.addf %20, %22 : vector<8x64xf32>
    %24 = arith.addf %23, %9 : vector<8x64xf32>
    %cst_14 = arith.constant 0.000000e+00 : f32
    %25 = vector.broadcast %cst_14 : f32 to vector<8x64xf32>
    %26 = arith.maximumf %24, %25 : vector<8x64xf32>
    %27 = arith.truncf %26 : vector<8x64xf32> to vector<8x64xbf16>
    %c0_15 = arith.constant 0 : index
    %c0_16 = arith.constant 0 : index
    %28 = vector.load %arg4[%c0_15, %c0_16] : memref<64x128xbf16, #tpu.memory_space<vmem>>, vector<64x128xbf16>
    %cst_17 = arith.constant dense<0.000000e+00> : vector<8x128xf32>
    %29 = tpu.matmul %27, %28, %cst_17 {dimension_numbers = #tpu.dot_dimension_numbers<[1], [0], [0], [1], [0, 0, 1, 1], [], []>} : vector<8x64xbf16>, vector<64x128xbf16>, vector<8x128xf32> -> vector<8x128xf32>
    %c0_18 = arith.constant 0 : index
    %c512 = arith.constant 512 : index
    %30 = vector.load %arg1[%c0_18, %c512] : memref<1x3456xf32, #tpu.memory_space<vmem>>, vector<1x128xf32>
    %31 = vector.broadcast %30 : vector<1x128xf32> to vector<8x128xf32>
    %32 = arith.addf %29, %31 : vector<8x128xf32>
    %33 = arith.truncf %26 : vector<8x64xf32> to vector<8x64xbf16>
    %c0_19 = arith.constant 0 : index
    %c0_20 = arith.constant 0 : index
    %34 = vector.load %arg5[%c0_19, %c0_20] : memref<64x128xbf16, #tpu.memory_space<vmem>>, vector<64x128xbf16>
    %cst_21 = arith.constant dense<0.000000e+00> : vector<8x128xf32>
    %35 = tpu.matmul %33, %34, %cst_21 {dimension_numbers = #tpu.dot_dimension_numbers<[1], [0], [0], [1], [0, 0, 1, 1], [], []>} : vector<8x64xbf16>, vector<64x128xbf16>, vector<8x128xf32> -> vector<8x128xf32>
    %c0_22 = arith.constant 0 : index
    %c640 = arith.constant 640 : index
    %36 = vector.load %arg1[%c0_22, %c640] : memref<1x3456xf32, #tpu.memory_space<vmem>>, vector<1x128xf32>
    %37 = vector.broadcast %36 : vector<1x128xf32> to vector<8x128xf32>
    %38 = arith.addf %35, %37 : vector<8x128xf32>
    %cst_23 = arith.constant 0.000000e+00 : f32
    %39 = vector.broadcast %cst_23 : f32 to vector<8x128xf32>
    %40 = arith.maximumf %38, %39 : vector<8x128xf32>
    %41 = arith.truncf %40 : vector<8x128xf32> to vector<8x128xbf16>
    %c0_24 = arith.constant 0 : index
    %c0_25 = arith.constant 0 : index
    %42 = vector.load %arg6[%c0_24, %c0_25] : memref<128x128xbf16, #tpu.memory_space<vmem>>, vector<128x128xbf16>
    %cst_26 = arith.constant dense<0.000000e+00> : vector<8x128xf32>
    %43 = tpu.matmul %41, %42, %cst_26 {dimension_numbers = #tpu.dot_dimension_numbers<[1], [0], [0], [1], [0, 0, 1, 1], [], []>} : vector<8x128xbf16>, vector<128x128xbf16>, vector<8x128xf32> -> vector<8x128xf32>
    %c0_27 = arith.constant 0 : index
    %c768 = arith.constant 768 : index
    %44 = vector.load %arg1[%c0_27, %c768] : memref<1x3456xf32, #tpu.memory_space<vmem>>, vector<1x128xf32>
    %45 = vector.broadcast %44 : vector<1x128xf32> to vector<8x128xf32>
    %46 = arith.addf %43, %45 : vector<8x128xf32>
    %47 = arith.addf %46, %32 : vector<8x128xf32>
    %cst_28 = arith.constant 0.000000e+00 : f32
    %48 = vector.broadcast %cst_28 : f32 to vector<8x128xf32>
    %49 = arith.maximumf %47, %48 : vector<8x128xf32>
    %50 = arith.truncf %49 : vector<8x128xf32> to vector<8x128xbf16>
    %c0_29 = arith.constant 0 : index
    %c0_30 = arith.constant 0 : index
    %51 = vector.load %arg7[%c0_29, %c0_30] : memref<128x256xbf16, #tpu.memory_space<vmem>>, vector<128x256xbf16>
    %cst_31 = arith.constant dense<0.000000e+00> : vector<8x256xf32>
    %52 = tpu.matmul %50, %51, %cst_31 {dimension_numbers = #tpu.dot_dimension_numbers<[1], [0], [0], [1], [0, 0, 1, 1], [], []>} : vector<8x128xbf16>, vector<128x256xbf16>, vector<8x256xf32> -> vector<8x256xf32>
    %c0_32 = arith.constant 0 : index
    %c896 = arith.constant 896 : index
    %53 = vector.load %arg1[%c0_32, %c896] : memref<1x3456xf32, #tpu.memory_space<vmem>>, vector<1x256xf32>
    %54 = vector.broadcast %53 : vector<1x256xf32> to vector<8x256xf32>
    %55 = arith.addf %52, %54 : vector<8x256xf32>
    %56 = arith.truncf %49 : vector<8x128xf32> to vector<8x128xbf16>
    %c0_33 = arith.constant 0 : index
    %c0_34 = arith.constant 0 : index
    %57 = vector.load %arg8[%c0_33, %c0_34] : memref<128x256xbf16, #tpu.memory_space<vmem>>, vector<128x256xbf16>
    %cst_35 = arith.constant dense<0.000000e+00> : vector<8x256xf32>
    %58 = tpu.matmul %56, %57, %cst_35 {dimension_numbers = #tpu.dot_dimension_numbers<[1], [0], [0], [1], [0, 0, 1, 1], [], []>} : vector<8x128xbf16>, vector<128x256xbf16>, vector<8x256xf32> -> vector<8x256xf32>
    %c0_36 = arith.constant 0 : index
    %c1152 = arith.constant 1152 : index
    %59 = vector.load %arg1[%c0_36, %c1152] : memref<1x3456xf32, #tpu.memory_space<vmem>>, vector<1x256xf32>
    %60 = vector.broadcast %59 : vector<1x256xf32> to vector<8x256xf32>
    %61 = arith.addf %58, %60 : vector<8x256xf32>
    %cst_37 = arith.constant 0.000000e+00 : f32
    %62 = vector.broadcast %cst_37 : f32 to vector<8x256xf32>
    %63 = arith.maximumf %61, %62 : vector<8x256xf32>
    %64 = arith.truncf %63 : vector<8x256xf32> to vector<8x256xbf16>
    %c0_38 = arith.constant 0 : index
    %c0_39 = arith.constant 0 : index
    %65 = vector.load %arg9[%c0_38, %c0_39] : memref<256x256xbf16, #tpu.memory_space<vmem>>, vector<256x256xbf16>
    %cst_40 = arith.constant dense<0.000000e+00> : vector<8x256xf32>
    %66 = tpu.matmul %64, %65, %cst_40 {dimension_numbers = #tpu.dot_dimension_numbers<[1], [0], [0], [1], [0, 0, 1, 1], [], []>} : vector<8x256xbf16>, vector<256x256xbf16>, vector<8x256xf32> -> vector<8x256xf32>
    %c0_41 = arith.constant 0 : index
    %c1408 = arith.constant 1408 : index
    %67 = vector.load %arg1[%c0_41, %c1408] : memref<1x3456xf32, #tpu.memory_space<vmem>>, vector<1x256xf32>
    %68 = vector.broadcast %67 : vector<1x256xf32> to vector<8x256xf32>
    %69 = arith.addf %66, %68 : vector<8x256xf32>
    %70 = arith.addf %69, %55 : vector<8x256xf32>
    %cst_42 = arith.constant 0.000000e+00 : f32
    %71 = vector.broadcast %cst_42 : f32 to vector<8x256xf32>
    %72 = arith.maximumf %70, %71 : vector<8x256xf32>
    %73 = arith.truncf %72 : vector<8x256xf32> to vector<8x256xbf16>
    %c0_43 = arith.constant 0 : index
    %c0_44 = arith.constant 0 : index
    %74 = vector.load %arg10[%c0_43, %c0_44] : memref<256x512xbf16, #tpu.memory_space<vmem>>, vector<256x512xbf16>
    %cst_45 = arith.constant dense<0.000000e+00> : vector<8x512xf32>
    %75 = tpu.matmul %73, %74, %cst_45 {dimension_numbers = #tpu.dot_dimension_numbers<[1], [0], [0], [1], [0, 0, 1, 1], [], []>} : vector<8x256xbf16>, vector<256x512xbf16>, vector<8x512xf32> -> vector<8x512xf32>
    %c0_46 = arith.constant 0 : index
    %c1664 = arith.constant 1664 : index
    %76 = vector.load %arg1[%c0_46, %c1664] : memref<1x3456xf32, #tpu.memory_space<vmem>>, vector<1x512xf32>
    %77 = vector.broadcast %76 : vector<1x512xf32> to vector<8x512xf32>
    %78 = arith.addf %75, %77 : vector<8x512xf32>
    %79 = arith.truncf %72 : vector<8x256xf32> to vector<8x256xbf16>
    %c0_47 = arith.constant 0 : index
    %c0_48 = arith.constant 0 : index
    %80 = vector.load %arg11[%c0_47, %c0_48] : memref<256x512xbf16, #tpu.memory_space<vmem>>, vector<256x512xbf16>
    %cst_49 = arith.constant dense<0.000000e+00> : vector<8x512xf32>
    %81 = tpu.matmul %79, %80, %cst_49 {dimension_numbers = #tpu.dot_dimension_numbers<[1], [0], [0], [1], [0, 0, 1, 1], [], []>} : vector<8x256xbf16>, vector<256x512xbf16>, vector<8x512xf32> -> vector<8x512xf32>
    %c0_50 = arith.constant 0 : index
    %c2176 = arith.constant 2176 : index
    %82 = vector.load %arg1[%c0_50, %c2176] : memref<1x3456xf32, #tpu.memory_space<vmem>>, vector<1x512xf32>
    %83 = vector.broadcast %82 : vector<1x512xf32> to vector<8x512xf32>
    %84 = arith.addf %81, %83 : vector<8x512xf32>
    %cst_51 = arith.constant 0.000000e+00 : f32
    %85 = vector.broadcast %cst_51 : f32 to vector<8x512xf32>
    %86 = arith.maximumf %84, %85 : vector<8x512xf32>
    %87 = arith.truncf %86 : vector<8x512xf32> to vector<8x512xbf16>
    %c0_52 = arith.constant 0 : index
    %c0_53 = arith.constant 0 : index
    %88 = vector.load %arg12[%c0_52, %c0_53] : memref<512x512xbf16, #tpu.memory_space<vmem>>, vector<512x512xbf16>
    %cst_54 = arith.constant dense<0.000000e+00> : vector<8x512xf32>
    %89 = tpu.matmul %87, %88, %cst_54 {dimension_numbers = #tpu.dot_dimension_numbers<[1], [0], [0], [1], [0, 0, 1, 1], [], []>} : vector<8x512xbf16>, vector<512x512xbf16>, vector<8x512xf32> -> vector<8x512xf32>
    %c0_55 = arith.constant 0 : index
    %c2688 = arith.constant 2688 : index
    %90 = vector.load %arg1[%c0_55, %c2688] : memref<1x3456xf32, #tpu.memory_space<vmem>>, vector<1x512xf32>
    %91 = vector.broadcast %90 : vector<1x512xf32> to vector<8x512xf32>
    %92 = arith.addf %89, %91 : vector<8x512xf32>
    %93 = arith.addf %92, %78 : vector<8x512xf32>
    %cst_56 = arith.constant 0.000000e+00 : f32
    %94 = vector.broadcast %cst_56 : f32 to vector<8x512xf32>
    %95 = arith.maximumf %93, %94 : vector<8x512xf32>
    %c1 = arith.constant 1 : index
    %c0_57 = arith.constant 0 : index
    %c0_58 = arith.constant 0 : index
    %96 = vector.load %arg0[%c1, %c0_57, %c0_58] : memref<2x8x64xf32, #tpu.memory_space<vmem>>, vector<1x8x64xf32>
    %97 = vector.shape_cast %96 : vector<1x8x64xf32> to vector<8x64xf32>
    %98 = vector.broadcast %0 : vector<1x64xf32> to vector<8x64xf32>
    %99 = arith.mulf %97, %98 : vector<8x64xf32>
    %100 = vector.broadcast %1 : vector<1x64xf32> to vector<8x64xf32>
    %101 = arith.addf %99, %100 : vector<8x64xf32>
    %cst_59 = arith.constant 0.000000e+00 : f32
    %102 = vector.broadcast %cst_59 : f32 to vector<8x64xf32>
    %103 = arith.maximumf %101, %102 : vector<8x64xf32>
    %104 = arith.truncf %103 : vector<8x64xf32> to vector<8x64xbf16>
    %c0_60 = arith.constant 0 : index
    %c0_61 = arith.constant 0 : index
    %105 = vector.load %arg2[%c0_60, %c0_61] : memref<64x64xbf16, #tpu.memory_space<vmem>>, vector<64x64xbf16>
    %cst_62 = arith.constant dense<0.000000e+00> : vector<8x64xf32>
    %106 = tpu.matmul %104, %105, %cst_62 {dimension_numbers = #tpu.dot_dimension_numbers<[1], [0], [0], [1], [0, 0, 1, 1], [], []>} : vector<8x64xbf16>, vector<64x64xbf16>, vector<8x64xf32> -> vector<8x64xf32>
    %c0_63 = arith.constant 0 : index
    %c256_64 = arith.constant 256 : index
    %107 = vector.load %arg1[%c0_63, %c256_64] : memref<1x3456xf32, #tpu.memory_space<vmem>>, vector<1x64xf32>
    %108 = vector.broadcast %107 : vector<1x64xf32> to vector<8x64xf32>
    %109 = arith.addf %106, %108 : vector<8x64xf32>
    %cst_65 = arith.constant 0.000000e+00 : f32
    %110 = vector.broadcast %cst_65 : f32 to vector<8x64xf32>
    %111 = arith.maximumf %109, %110 : vector<8x64xf32>
    %112 = arith.truncf %111 : vector<8x64xf32> to vector<8x64xbf16>
    %c0_66 = arith.constant 0 : index
    %c0_67 = arith.constant 0 : index
    %113 = vector.load %arg3[%c0_66, %c0_67] : memref<64x64xbf16, #tpu.memory_space<vmem>>, vector<64x64xbf16>
    %cst_68 = arith.constant dense<0.000000e+00> : vector<8x64xf32>
    %114 = tpu.matmul %112, %113, %cst_68 {dimension_numbers = #tpu.dot_dimension_numbers<[1], [0], [0], [1], [0, 0, 1, 1], [], []>} : vector<8x64xbf16>, vector<64x64xbf16>, vector<8x64xf32> -> vector<8x64xf32>
    %c0_69 = arith.constant 0 : index
    %c384_70 = arith.constant 384 : index
    %115 = vector.load %arg1[%c0_69, %c384_70] : memref<1x3456xf32, #tpu.memory_space<vmem>>, vector<1x64xf32>
    %116 = vector.broadcast %115 : vector<1x64xf32> to vector<8x64xf32>
    %117 = arith.addf %114, %116 : vector<8x64xf32>
    %118 = arith.addf %117, %103 : vector<8x64xf32>
    %cst_71 = arith.constant 0.000000e+00 : f32
    %119 = vector.broadcast %cst_71 : f32 to vector<8x64xf32>
    %120 = arith.maximumf %118, %119 : vector<8x64xf32>
    %121 = arith.truncf %120 : vector<8x64xf32> to vector<8x64xbf16>
    %c0_72 = arith.constant 0 : index
    %c0_73 = arith.constant 0 : index
    %122 = vector.load %arg4[%c0_72, %c0_73] : memref<64x128xbf16, #tpu.memory_space<vmem>>, vector<64x128xbf16>
    %cst_74 = arith.constant dense<0.000000e+00> : vector<8x128xf32>
    %123 = tpu.matmul %121, %122, %cst_74 {dimension_numbers = #tpu.dot_dimension_numbers<[1], [0], [0], [1], [0, 0, 1, 1], [], []>} : vector<8x64xbf16>, vector<64x128xbf16>, vector<8x128xf32> -> vector<8x128xf32>
    %c0_75 = arith.constant 0 : index
    %c512_76 = arith.constant 512 : index
    %124 = vector.load %arg1[%c0_75, %c512_76] : memref<1x3456xf32, #tpu.memory_space<vmem>>, vector<1x128xf32>
    %125 = vector.broadcast %124 : vector<1x128xf32> to vector<8x128xf32>
    %126 = arith.addf %123, %125 : vector<8x128xf32>
    %127 = arith.truncf %120 : vector<8x64xf32> to vector<8x64xbf16>
    %c0_77 = arith.constant 0 : index
    %c0_78 = arith.constant 0 : index
    %128 = vector.load %arg5[%c0_77, %c0_78] : memref<64x128xbf16, #tpu.memory_space<vmem>>, vector<64x128xbf16>
    %cst_79 = arith.constant dense<0.000000e+00> : vector<8x128xf32>
    %129 = tpu.matmul %127, %128, %cst_79 {dimension_numbers = #tpu.dot_dimension_numbers<[1], [0], [0], [1], [0, 0, 1, 1], [], []>} : vector<8x64xbf16>, vector<64x128xbf16>, vector<8x128xf32> -> vector<8x128xf32>
    %c0_80 = arith.constant 0 : index
    %c640_81 = arith.constant 640 : index
    %130 = vector.load %arg1[%c0_80, %c640_81] : memref<1x3456xf32, #tpu.memory_space<vmem>>, vector<1x128xf32>
    %131 = vector.broadcast %130 : vector<1x128xf32> to vector<8x128xf32>
    %132 = arith.addf %129, %131 : vector<8x128xf32>
    %cst_82 = arith.constant 0.000000e+00 : f32
    %133 = vector.broadcast %cst_82 : f32 to vector<8x128xf32>
    %134 = arith.maximumf %132, %133 : vector<8x128xf32>
    %135 = arith.truncf %134 : vector<8x128xf32> to vector<8x128xbf16>
    %c0_83 = arith.constant 0 : index
    %c0_84 = arith.constant 0 : index
    %136 = vector.load %arg6[%c0_83, %c0_84] : memref<128x128xbf16, #tpu.memory_space<vmem>>, vector<128x128xbf16>
    %cst_85 = arith.constant dense<0.000000e+00> : vector<8x128xf32>
    %137 = tpu.matmul %135, %136, %cst_85 {dimension_numbers = #tpu.dot_dimension_numbers<[1], [0], [0], [1], [0, 0, 1, 1], [], []>} : vector<8x128xbf16>, vector<128x128xbf16>, vector<8x128xf32> -> vector<8x128xf32>
    %c0_86 = arith.constant 0 : index
    %c768_87 = arith.constant 768 : index
    %138 = vector.load %arg1[%c0_86, %c768_87] : memref<1x3456xf32, #tpu.memory_space<vmem>>, vector<1x128xf32>
    %139 = vector.broadcast %138 : vector<1x128xf32> to vector<8x128xf32>
    %140 = arith.addf %137, %139 : vector<8x128xf32>
    %141 = arith.addf %140, %126 : vector<8x128xf32>
    %cst_88 = arith.constant 0.000000e+00 : f32
    %142 = vector.broadcast %cst_88 : f32 to vector<8x128xf32>
    %143 = arith.maximumf %141, %142 : vector<8x128xf32>
    %144 = arith.truncf %143 : vector<8x128xf32> to vector<8x128xbf16>
    %c0_89 = arith.constant 0 : index
    %c0_90 = arith.constant 0 : index
    %145 = vector.load %arg7[%c0_89, %c0_90] : memref<128x256xbf16, #tpu.memory_space<vmem>>, vector<128x256xbf16>
    %cst_91 = arith.constant dense<0.000000e+00> : vector<8x256xf32>
    %146 = tpu.matmul %144, %145, %cst_91 {dimension_numbers = #tpu.dot_dimension_numbers<[1], [0], [0], [1], [0, 0, 1, 1], [], []>} : vector<8x128xbf16>, vector<128x256xbf16>, vector<8x256xf32> -> vector<8x256xf32>
    %c0_92 = arith.constant 0 : index
    %c896_93 = arith.constant 896 : index
    %147 = vector.load %arg1[%c0_92, %c896_93] : memref<1x3456xf32, #tpu.memory_space<vmem>>, vector<1x256xf32>
    %148 = vector.broadcast %147 : vector<1x256xf32> to vector<8x256xf32>
    %149 = arith.addf %146, %148 : vector<8x256xf32>
    %150 = arith.truncf %143 : vector<8x128xf32> to vector<8x128xbf16>
    %c0_94 = arith.constant 0 : index
    %c0_95 = arith.constant 0 : index
    %151 = vector.load %arg8[%c0_94, %c0_95] : memref<128x256xbf16, #tpu.memory_space<vmem>>, vector<128x256xbf16>
    %cst_96 = arith.constant dense<0.000000e+00> : vector<8x256xf32>
    %152 = tpu.matmul %150, %151, %cst_96 {dimension_numbers = #tpu.dot_dimension_numbers<[1], [0], [0], [1], [0, 0, 1, 1], [], []>} : vector<8x128xbf16>, vector<128x256xbf16>, vector<8x256xf32> -> vector<8x256xf32>
    %c0_97 = arith.constant 0 : index
    %c1152_98 = arith.constant 1152 : index
    %153 = vector.load %arg1[%c0_97, %c1152_98] : memref<1x3456xf32, #tpu.memory_space<vmem>>, vector<1x256xf32>
    %154 = vector.broadcast %153 : vector<1x256xf32> to vector<8x256xf32>
    %155 = arith.addf %152, %154 : vector<8x256xf32>
    %cst_99 = arith.constant 0.000000e+00 : f32
    %156 = vector.broadcast %cst_99 : f32 to vector<8x256xf32>
    %157 = arith.maximumf %155, %156 : vector<8x256xf32>
    %158 = arith.truncf %157 : vector<8x256xf32> to vector<8x256xbf16>
    %c0_100 = arith.constant 0 : index
    %c0_101 = arith.constant 0 : index
    %159 = vector.load %arg9[%c0_100, %c0_101] : memref<256x256xbf16, #tpu.memory_space<vmem>>, vector<256x256xbf16>
    %cst_102 = arith.constant dense<0.000000e+00> : vector<8x256xf32>
    %160 = tpu.matmul %158, %159, %cst_102 {dimension_numbers = #tpu.dot_dimension_numbers<[1], [0], [0], [1], [0, 0, 1, 1], [], []>} : vector<8x256xbf16>, vector<256x256xbf16>, vector<8x256xf32> -> vector<8x256xf32>
    %c0_103 = arith.constant 0 : index
    %c1408_104 = arith.constant 1408 : index
    %161 = vector.load %arg1[%c0_103, %c1408_104] : memref<1x3456xf32, #tpu.memory_space<vmem>>, vector<1x256xf32>
    %162 = vector.broadcast %161 : vector<1x256xf32> to vector<8x256xf32>
    %163 = arith.addf %160, %162 : vector<8x256xf32>
    %164 = arith.addf %163, %149 : vector<8x256xf32>
    %cst_105 = arith.constant 0.000000e+00 : f32
    %165 = vector.broadcast %cst_105 : f32 to vector<8x256xf32>
    %166 = arith.maximumf %164, %165 : vector<8x256xf32>
    %167 = arith.truncf %166 : vector<8x256xf32> to vector<8x256xbf16>
    %c0_106 = arith.constant 0 : index
    %c0_107 = arith.constant 0 : index
    %168 = vector.load %arg10[%c0_106, %c0_107] : memref<256x512xbf16, #tpu.memory_space<vmem>>, vector<256x512xbf16>
    %cst_108 = arith.constant dense<0.000000e+00> : vector<8x512xf32>
    %169 = tpu.matmul %167, %168, %cst_108 {dimension_numbers = #tpu.dot_dimension_numbers<[1], [0], [0], [1], [0, 0, 1, 1], [], []>} : vector<8x256xbf16>, vector<256x512xbf16>, vector<8x512xf32> -> vector<8x512xf32>
    %c0_109 = arith.constant 0 : index
    %c1664_110 = arith.constant 1664 : index
    %170 = vector.load %arg1[%c0_109, %c1664_110] : memref<1x3456xf32, #tpu.memory_space<vmem>>, vector<1x512xf32>
    %171 = vector.broadcast %170 : vector<1x512xf32> to vector<8x512xf32>
    %172 = arith.addf %169, %171 : vector<8x512xf32>
    %173 = arith.truncf %166 : vector<8x256xf32> to vector<8x256xbf16>
    %c0_111 = arith.constant 0 : index
    %c0_112 = arith.constant 0 : index
    %174 = vector.load %arg11[%c0_111, %c0_112] : memref<256x512xbf16, #tpu.memory_space<vmem>>, vector<256x512xbf16>
    %cst_113 = arith.constant dense<0.000000e+00> : vector<8x512xf32>
    %175 = tpu.matmul %173, %174, %cst_113 {dimension_numbers = #tpu.dot_dimension_numbers<[1], [0], [0], [1], [0, 0, 1, 1], [], []>} : vector<8x256xbf16>, vector<256x512xbf16>, vector<8x512xf32> -> vector<8x512xf32>
    %c0_114 = arith.constant 0 : index
    %c2176_115 = arith.constant 2176 : index
    %176 = vector.load %arg1[%c0_114, %c2176_115] : memref<1x3456xf32, #tpu.memory_space<vmem>>, vector<1x512xf32>
    %177 = vector.broadcast %176 : vector<1x512xf32> to vector<8x512xf32>
    %178 = arith.addf %175, %177 : vector<8x512xf32>
    %cst_116 = arith.constant 0.000000e+00 : f32
    %179 = vector.broadcast %cst_116 : f32 to vector<8x512xf32>
    %180 = arith.maximumf %178, %179 : vector<8x512xf32>
    %181 = arith.truncf %180 : vector<8x512xf32> to vector<8x512xbf16>
    %c0_117 = arith.constant 0 : index
    %c0_118 = arith.constant 0 : index
    %182 = vector.load %arg12[%c0_117, %c0_118] : memref<512x512xbf16, #tpu.memory_space<vmem>>, vector<512x512xbf16>
    %cst_119 = arith.constant dense<0.000000e+00> : vector<8x512xf32>
    %183 = tpu.matmul %181, %182, %cst_119 {dimension_numbers = #tpu.dot_dimension_numbers<[1], [0], [0], [1], [0, 0, 1, 1], [], []>} : vector<8x512xbf16>, vector<512x512xbf16>, vector<8x512xf32> -> vector<8x512xf32>
    %c0_120 = arith.constant 0 : index
    %c2688_121 = arith.constant 2688 : index
    %184 = vector.load %arg1[%c0_120, %c2688_121] : memref<1x3456xf32, #tpu.memory_space<vmem>>, vector<1x512xf32>
    %185 = vector.broadcast %184 : vector<1x512xf32> to vector<8x512xf32>
    %186 = arith.addf %183, %185 : vector<8x512xf32>
    %187 = arith.addf %186, %172 : vector<8x512xf32>
    %cst_122 = arith.constant 0.000000e+00 : f32
    %188 = vector.broadcast %cst_122 : f32 to vector<8x512xf32>
    %189 = arith.maximumf %187, %188 : vector<8x512xf32>
    %190 = arith.addf %95, %189 : vector<8x512xf32>
    %cst_123 = arith.constant 5.000000e-01 : f32
    %191 = vector.broadcast %cst_123 : f32 to vector<8x512xf32>
    %192 = arith.mulf %190, %191 : vector<8x512xf32>
    %c0_124 = arith.constant 0 : index
    %c0_125 = arith.constant 0 : index
    %193 = vector.load %arg15[%c0_124, %c0_125] : memref<8x512xf32, #tpu.memory_space<vmem>>, vector<8x512xf32>
    tpu.vector_store %arg15[%c0_124, %c0_125], %192 {strides = array<i32>} : memref<8x512xf32, #tpu.memory_space<vmem>>, vector<8x512xf32>,
    %194 = arith.truncf %192 : vector<8x512xf32> to vector<8x512xbf16>
    %c0_126 = arith.constant 0 : index
    %c0_127 = arith.constant 0 : index
    %195 = vector.load %arg13[%c0_126, %c0_127] : memref<512x128xbf16, #tpu.memory_space<vmem>>, vector<512x128xbf16>
    %cst_128 = arith.constant dense<0.000000e+00> : vector<8x128xf32>
    %196 = tpu.matmul %194, %195, %cst_128 {dimension_numbers = #tpu.dot_dimension_numbers<[1], [0], [0], [1], [0, 0, 1, 1], [], []>} : vector<8x512xbf16>, vector<512x128xbf16>, vector<8x128xf32> -> vector<8x128xf32>
    %c0_129 = arith.constant 0 : index
    %c3200 = arith.constant 3200 : index
    %197 = vector.load %arg1[%c0_129, %c3200] : memref<1x3456xf32, #tpu.memory_space<vmem>>, vector<1x128xf32>
    %198 = vector.broadcast %197 : vector<1x128xf32> to vector<8x128xf32>
    %199 = arith.addf %196, %198 : vector<8x128xf32>
    %cst_130 = arith.constant 0.000000e+00 : f32
    %200 = vector.broadcast %cst_130 : f32 to vector<8x128xf32>
    %201 = arith.maximumf %199, %200 : vector<8x128xf32>
    %c0_131 = arith.constant 0 : index
    %c0_132 = arith.constant 0 : index
    %202 = vector.load %arg16[%c0_131, %c0_132] : memref<8x128xf32, #tpu.memory_space<vmem>>, vector<8x128xf32>
    tpu.vector_store %arg16[%c0_131, %c0_132], %201 {strides = array<i32>} : memref<8x128xf32, #tpu.memory_space<vmem>>, vector<8x128xf32>,
    %203 = arith.truncf %201 : vector<8x128xf32> to vector<8x128xbf16>
    %c0_133 = arith.constant 0 : index
    %c0_134 = arith.constant 0 : index
    %204 = vector.load %arg14[%c0_133, %c0_134] : memref<128x128xbf16, #tpu.memory_space<vmem>>, vector<128x128xbf16>
    %cst_135 = arith.constant dense<0.000000e+00> : vector<8x128xf32>
    %205 = tpu.matmul %203, %204, %cst_135 {dimension_numbers = #tpu.dot_dimension_numbers<[1], [0], [0], [1], [0, 0, 1, 1], [], []>} : vector<8x128xbf16>, vector<128x128xbf16>, vector<8x128xf32> -> vector<8x128xf32>
    %c0_136 = arith.constant 0 : index
    %c3328 = arith.constant 3328 : index
    %206 = vector.load %arg1[%c0_136, %c3328] : memref<1x3456xf32, #tpu.memory_space<vmem>>, vector<1x128xf32>
    %207 = vector.broadcast %206 : vector<1x128xf32> to vector<8x128xf32>
    %208 = arith.addf %205, %207 : vector<8x128xf32>
    %c0_137 = arith.constant 0 : index
    %c0_138 = arith.constant 0 : index
    %209 = vector.load %arg17[%c0_137, %c0_138] : memref<8x128xf32, #tpu.memory_space<vmem>>, vector<8x128xf32>
    tpu.vector_store %arg17[%c0_137, %c0_138], %208 {strides = array<i32>} : memref<8x128xf32, #tpu.memory_space<vmem>>, vector<8x128xf32>,
    return
  }
}

</mosaic_0001>

<bundles_post_ra>
// kernel: forward.1
= control target key start
LH: loop header
LB: loop body
LE: loop exit
PB: predicated region body
PF: predicated region fallthrough
CT: control target
= control target key end

     0   :  { %s7109_s0 = inlined_call_operand.vmem [shape: f32[2,8,64], index: 0, kind: input, shape index: {}]   ;;  %s7110_s1 = inlined_call_operand.hbm [shape: f32[1,3456], index: 1, kind: input, shape index: {}]   ;;  %s7111_s2 = inlined_call_operand.hbm [shape: bf16[64,64], index: 2, kind: input, shape index: {}]   ;;  %s7112_s3 = inlined_call_operand.hbm [shape: bf16[64,64], index: 3, kind: input, shape index: {}]   ;;  %s7113_s4 = inlined_call_operand.hbm [shape: bf16[64,128], index: 4, kind: input, shape index: {}]   ;;  %s7114_s5 = inlined_call_operand.hbm [shape: bf16[64,128], index: 5, kind: input, shape index: {}]   ;;  %s7115_s6 = inlined_call_operand.hbm [shape: bf16[128,128], index: 6, kind: input, shape index: {}]   ;;  %s7116_s7 = inlined_call_operand.hbm [shape: bf16[128,256], index: 7, kind: input, shape index: {}]   ;;  %s7117_s8 = inlined_call_operand.hbm [shape: bf16[128,256], index: 8, kind: input, shape index: {}]   ;;  %s7118_s9 = inlined_call_operand.hbm [shape: bf16[256,256], index: 9, kind: input, shape index: {}]   ;;  %s7119_s10 = inlined_call_operand.hbm [shape: bf16[256,512], index: 10, kind: input, shape index: {}]   ;;  %s7120_s11 = inlined_call_operand.hbm [shape: bf16[256,512], index: 11, kind: input, shape index: {}]   ;;  %s7121_s12 = inlined_call_operand.hbm [shape: bf16[512,512], index: 12, kind: input, shape index: {}]   ;;  %s7122_s13 = inlined_call_operand.hbm [shape: bf16[512,128], index: 13, kind: input, shape index: {}]   ;;  %s7123_s14 = inlined_call_operand.vmem [shape: bf16[128,128], index: 14, kind: input, shape index: {}]   ;;  %s7124_s15 = inlined_call_operand.hbm [shape: f32[8,512], index: 15, kind: output, shape index: {0}]   ;;  %s7125_s16 = inlined_call_operand.hbm [shape: f32[8,128], index: 16, kind: output, shape index: {1}]   ;;  %s7126_s17 = inlined_call_operand.hbm [shape: f32[8,128], index: 17, kind: output, shape index: {2}]  }
   0x1   :  { %7130 = sst [smem:[#allocation36_spill]] %s7109_s0 }
   0x2   :  { %7131 = sst [smem:[#allocation37_spill]] %s7110_s1 }
   0x3   :  { %7132 = sst [smem:[#allocation38_spill]] %s7126_s17 }
   0x4   :  { %23 = vsyncpa [#allocation3], 0 }
   0x5   :  { %24 = vsyncpa [#allocation6], 0 }
   0x6   :  { %25 = vsyncpa [#allocation9], 0 }
   0x7   :  { %26 = vsyncpa [#allocation12], 0 }
   0x8   :  { %27 = vsyncpa [#allocation15], 0 }
   0x9   :  { %28 = vsyncpa [#allocation18], 0 }
   0xa   :  { %29 = vsyncpa [#allocation21], 0 }
   0xb   :  { %30 = vsyncpa [#allocation4], 0 }
   0xc   :  { %31 = vsyncpa [#allocation25], 0  ;;  %s6422_s24 = smov [#allocation5]   ;;  %s6052_s28 = scalar_lea.hbm %s7111_s2, 512 }
   0xd   :  { %s49_s25 = sshll.u32 %s6422_s24, 4  ;;  %p6053_p0 = scmp.ne.s32.totalorder %s7111_s2, %s6052_s28  ;;  %s50_s25 = int_to_ptr.vmem [resolvable:$true] %s49_s25 }
   0xe   :  { %p6056_p1 = scmp.lt.u32.totalorder %s6052_s28, %s7111_s2 }
  0x10   :  { %p6058_p2 = pnand %p6056_p1, %p6053_p0 }
  0x12   :  { %6061 = shalt.err (!%p6058_p2)
}
  0x13   :  { %s6062_s19 = scalar_lea.vmem %s50_s25, 512  ;;  %p6067_p4 = scmp.lt.s32.totalorder %s50_s25, %s50_s25 }
  0x14   :  { %p6063_p3 = scmp.ne.s32.totalorder %s50_s25, %s6062_s19  ;;  %p6068_p5 = scmp.lt.s32.totalorder %s6062_s19, %s6062_s19 }
  0x16   :  { %p6069_p6 = por %p6068_p5, %p6067_p4 }
  0x18   :  { %p6070_p7 = pnand %p6069_p6, %p6063_p3 }
  0x1a   :  { %6073 = shalt.err (!%p6070_p7)
}
  0x1b   :  { %s6423_s1 = smov 64   ;;  %s6424_s20 = smov 4  }
  0x1c   :  { %55 = dma.hbm_to_vmem [thread:$0]  %s7111_s2, 512, %s50_s25, [#allocation6], %s6423_s1, %s6423_s1, %s6424_s20  }
  0x1d   :  { %s6425_s23 = smov [#allocation8]   ;;  %s6426_s26 = smov [#allocation11]  }
  0x1e   :  { %s73_s24 = sshll.u32 %s6425_s23, 4  ;;  %s97_s27 = sshll.u32 %s6426_s26, 4  ;;  %s74_s24 = int_to_ptr.vmem [resolvable:$true] %s73_s24  ;;  %s98_s27 = int_to_ptr.vmem [resolvable:$true] %s97_s27 }
  0x1f   :  { %s6074_s0 = scalar_lea.hbm %s7113_s4, 512 }
  0x20   :  { %p6075_p8 = scmp.ne.s32.totalorder %s7113_s4, %s6074_s0  ;;  %p6078_p9 = scmp.lt.u32.totalorder %s6074_s0, %s7113_s4 }
  0x22   :  { %p6080_p10 = pnand %p6078_p9, %p6075_p8 }
  0x24   :  { %6083 = shalt.err (!%p6080_p10)
}
  0x25   :  { %s6084_s2 = scalar_lea.vmem %s74_s24, 512  ;;  %p6089_p12 = scmp.lt.s32.totalorder %s74_s24, %s74_s24 }
  0x26   :  { %p6085_p11 = scmp.ne.s32.totalorder %s74_s24, %s6084_s2  ;;  %p6090_p13 = scmp.lt.s32.totalorder %s6084_s2, %s6084_s2 }
  0x28   :  { %p6091_p0 = por %p6090_p13, %p6089_p12 }
  0x2a   :  { %p6092_p1 = pnand %p6091_p0, %p6085_p11 }
  0x2c   :  { %6095 = shalt.err (!%p6092_p1)
}
  0x2d   :  { %79 = dma.hbm_to_vmem [thread:$0]  %s7113_s4, 512, %s74_s24, [#allocation9], %s6423_s1, %s6423_s1, %s6424_s20  }
  0x2e   :  { %s6096_s23 = scalar_lea.hbm %s7115_s6, 1024 }
  0x2f   :  { %p6097_p2 = scmp.ne.s32.totalorder %s7115_s6, %s6096_s23  ;;  %p6100_p3 = scmp.lt.u32.totalorder %s6096_s23, %s7115_s6 }
  0x31   :  { %p6102_p4 = pnand %p6100_p3, %p6097_p2 }
  0x33   :  { %6105 = shalt.err (!%p6102_p4)
}
  0x34   :  { %s6106_s30 = scalar_lea.vmem %s98_s27, 1024  ;;  %p6111_p6 = scmp.lt.s32.totalorder %s98_s27, %s98_s27 }
  0x35   :  { %p6107_p5 = scmp.ne.s32.totalorder %s98_s27, %s6106_s30  ;;  %p6112_p7 = scmp.lt.s32.totalorder %s6106_s30, %s6106_s30 }
  0x37   :  { %p6113_p8 = por %p6112_p7, %p6111_p6 }
  0x39   :  { %p6114_p9 = pnand %p6113_p8, %p6107_p5 }
  0x3b   :  { %6117 = shalt.err (!%p6114_p9)
}
  0x3c   :  { %103 = dma.hbm_to_vmem [thread:$0]  %s7115_s6, 1024, %s98_s27, [#allocation12], %s6423_s1, %s6423_s1, %s6424_s20  }
  0x3d   :  { %s6427_s18 = smov [#allocation14]   ;;  %s6428_s2 = smov [#allocation17]  }
  0x3e   :  { %s121_s19 = sshll.u32 %s6427_s18, 4  ;;  %s145_s25 = sshll.u32 %s6428_s2, 4  ;;  %s122_s19 = int_to_ptr.vmem [resolvable:$true] %s121_s19  ;;  %s146_s25 = int_to_ptr.vmem [resolvable:$true] %s145_s25 }
  0x3f   :  { %s6118_s17 = scalar_lea.hbm %s7117_s8, 2048 }
  0x40   :  { %p6119_p10 = scmp.ne.s32.totalorder %s7117_s8, %s6118_s17  ;;  %p6122_p11 = scmp.lt.u32.totalorder %s6118_s17, %s7117_s8 }
  0x42   :  { %p6124_p12 = pnand %p6122_p11, %p6119_p10 }
  0x44   :  { %6127 = shalt.err (!%p6124_p12)
}
  0x45   :  { %s6128_s6 = scalar_lea.vmem %s122_s19, 2048  ;;  %p6133_p0 = scmp.lt.s32.totalorder %s122_s19, %s122_s19 }
  0x46   :  { %p6129_p13 = scmp.ne.s32.totalorder %s122_s19, %s6128_s6  ;;  %p6134_p1 = scmp.lt.s32.totalorder %s6128_s6, %s6128_s6 }
  0x48   :  { %p6135_p2 = por %p6134_p1, %p6133_p0 }
  0x4a   :  { %p6136_p3 = pnand %p6135_p2, %p6129_p13 }
  0x4c   :  { %6139 = shalt.err (!%p6136_p3)
}
  0x4d   :  { %s6429_s27 = smov 128   ;;  %s6430_s0 = smov 8  }
  0x4e   :  { %127 = dma.hbm_to_vmem [thread:$0]  %s7117_s8, 2048, %s122_s19, [#allocation15], %s6429_s27, %s6429_s27, %s6430_s0  }
  0x4f   :  { %s6140_s2 = scalar_lea.hbm %s7119_s10, 8192 }
  0x50   :  { %p6141_p4 = scmp.ne.s32.totalorder %s7119_s10, %s6140_s2  ;;  %p6144_p5 = scmp.lt.u32.totalorder %s6140_s2, %s7119_s10 }
  0x52   :  { %p6146_p6 = pnand %p6144_p5, %p6141_p4 }
  0x54   :  { %6149 = shalt.err (!%p6146_p6)
}
  0x55   :  { %s6150_s26 = scalar_lea.vmem %s146_s25, 8192  ;;  %p6155_p8 = scmp.lt.s32.totalorder %s146_s25, %s146_s25 }
  0x56   :  { %p6151_p7 = scmp.ne.s32.totalorder %s146_s25, %s6150_s26  ;;  %p6156_p9 = scmp.lt.s32.totalorder %s6150_s26, %s6150_s26 }
  0x58   :  { %p6157_p10 = por %p6156_p9, %p6155_p8 }
  0x5a   :  { %p6158_p11 = pnand %p6157_p10, %p6151_p7 }
  0x5c   :  { %6161 = shalt.err (!%p6158_p11)
}
  0x5d   :  { %s6431_s8 = smov 256   ;;  %s6432_s19 = smov 16  }
  0x5e   :  { %151 = dma.hbm_to_vmem [thread:$0]  %s7119_s10, 8192, %s146_s25, [#allocation18], %s6431_s8, %s6431_s8, %s6432_s19  }
  0x5f   :  { %s6433_s6 = smov [#allocation20]   ;;  %s6434_s4 = smov [#allocation2]  }
  0x60   :  { %s169_s30 = sshll.u32 %s6433_s6, 4  ;;  %s40_s24 = sshll.u32 %s6434_s4, 4  ;;  %s170_s30 = int_to_ptr.vmem [resolvable:$true] %s169_s30  ;;  %s41_s24 = int_to_ptr.vmem [resolvable:$true] %s40_s24 }
  0x61   :  { %s6162_s21 = scalar_lea.hbm %s7121_s12, 16384 }
  0x62   :  { %p6163_p12 = scmp.ne.s32.totalorder %s7121_s12, %s6162_s21  ;;  %p6166_p13 = scmp.lt.u32.totalorder %s6162_s21, %s7121_s12 }
  0x64   :  { %p6168_p0 = pnand %p6166_p13, %p6163_p12 }
  0x66   :  { %6171 = shalt.err (!%p6168_p0)
}
  0x67   :  { %s6172_s10 = scalar_lea.vmem %s170_s30, 16384  ;;  %p6177_p2 = scmp.lt.s32.totalorder %s170_s30, %s170_s30 }
  0x68   :  { %p6173_p1 = scmp.ne.s32.totalorder %s170_s30, %s6172_s10  ;;  %p6178_p3 = scmp.lt.s32.totalorder %s6172_s10, %s6172_s10 }
  0x6a   :  { %p6179_p4 = por %p6178_p3, %p6177_p2 }
  0x6c   :  { %p6180_p5 = pnand %p6179_p4, %p6173_p1 }
  0x6e   :  { %6183 = shalt.err (!%p6180_p5)
}
  0x6f   :  { %175 = dma.hbm_to_vmem [thread:$0]  %s7121_s12, 16384, %s170_s30, [#allocation21], %s6431_s8, %s6431_s8, %s6432_s19  }
  0x70   :  { %s7133_s4 = sld [smem:[#allocation37_spill]] }
  0x76   :  { %s6184_s18 = scalar_lea.hbm %s7133_s4, 432 }
  0x77   :  { %p6185_p6 = scmp.ne.s32.totalorder %s7133_s4, %s6184_s18  ;;  %p6188_p7 = scmp.lt.u32.totalorder %s6184_s18, %s7133_s4 }
  0x79   :  { %p6190_p8 = pnand %p6188_p7, %p6185_p6 }
  0x7b   :  { %6193 = shalt.err (!%p6190_p8)
}
  0x7c   :  { %s6194_s23 = scalar_lea.vmem %s41_s24, 432  ;;  %s6198_s26 = scalar_lea.vmem %s41_s24, 448 }
  0x7d   :  { %p6195_p9 = scmp.ne.s32.totalorder %s41_s24, %s6194_s23  ;;  %p6199_p10 = scmp.lt.s32.totalorder %s41_s24, %s41_s24 }
  0x7e   :  { %p6200_p11 = scmp.lt.s32.totalorder %s6198_s26, %s6194_s23 }
  0x80   :  { %p6201_p12 = por %p6200_p11, %p6199_p10 }
  0x82   :  { %p6202_p13 = pnand %p6201_p12, %p6195_p9 }
  0x84   :  { %6205 = shalt.err (!%p6202_p13)
}
  0x85   :  { %43 = dma.hbm_to_vmem [thread:$0]  %s7133_s4, 432, %s41_s24, [#allocation3]  }
  0x86   :  { %s6435_s10 = smov [#allocation7]   ;;  %s6436_s28 = smov [#allocation10]  }
  0x87   :  { %s61_s25 = sshll.u32 %s6435_s10, 4  ;;  %s85_s29 = sshll.u32 %s6436_s28, 4  ;;  %s62_s25 = int_to_ptr.vmem [resolvable:$true] %s61_s25  ;;  %s86_s29 = int_to_ptr.vmem [resolvable:$true] %s85_s29 }
  0x88   :  { %s6206_s2 = scalar_lea.hbm %s7112_s3, 512 }
  0x89   :  { %p6207_p0 = scmp.ne.s32.totalorder %s7112_s3, %s6206_s2  ;;  %p6210_p1 = scmp.lt.u32.totalorder %s6206_s2, %s7112_s3 }
  0x8b   :  { %p6212_p2 = pnand %p6210_p1, %p6207_p0 }
  0x8d   :  { %6215 = shalt.err (!%p6212_p2)
}
  0x8e   :  { %s6216_s24 = scalar_lea.vmem %s62_s25, 512  ;;  %p6221_p4 = scmp.lt.s32.totalorder %s62_s25, %s62_s25 }
  0x8f   :  { %p6217_p3 = scmp.ne.s32.totalorder %s62_s25, %s6216_s24  ;;  %p6222_p5 = scmp.lt.s32.totalorder %s6216_s24, %s6216_s24 }
  0x91   :  { %p6223_p6 = por %p6222_p5, %p6221_p4 }
  0x93   :  { %p6224_p7 = pnand %p6223_p6, %p6217_p3 }
  0x95   :  { %6227 = shalt.err (!%p6224_p7)
}
  0x96   :  { %67 = dma.hbm_to_vmem [thread:$0]  %s7112_s3, 512, %s62_s25, [#allocation6], %s6423_s1, %s6423_s1, %s6424_s20  }
  0x97   :  { %s6228_s10 = scalar_lea.hbm %s7114_s5, 512 }
  0x98   :  { %p6229_p8 = scmp.ne.s32.totalorder %s7114_s5, %s6228_s10  ;;  %p6232_p9 = scmp.lt.u32.totalorder %s6228_s10, %s7114_s5 }
  0x9a   :  { %p6234_p10 = pnand %p6232_p9, %p6229_p8 }
  0x9c   :  { %6237 = shalt.err (!%p6234_p10)
}
  0x9d   :  { %s6238_s21 = scalar_lea.vmem %s86_s29, 512  ;;  %p6243_p12 = scmp.lt.s32.totalorder %s86_s29, %s86_s29 }
  0x9e   :  { %p6239_p11 = scmp.ne.s32.totalorder %s86_s29, %s6238_s21  ;;  %p6244_p13 = scmp.lt.s32.totalorder %s6238_s21, %s6238_s21 }
  0xa0   :  { %p6245_p0 = por %p6244_p13, %p6243_p12 }
  0xa2   :  { %p6246_p1 = pnand %p6245_p0, %p6239_p11 }
  0xa4   :  { %6249 = shalt.err (!%p6246_p1)
}
  0xa5   :  { %91 = dma.hbm_to_vmem [thread:$0]  %s7114_s5, 512, %s86_s29, [#allocation9], %s6423_s1, %s6423_s1, %s6424_s20  }
  0xa6   :  { %s6437_s22 = smov [#allocation13]   ;;  %s6438_s23 = smov [#allocation16]  }
  0xa7   :  { %s109_s17 = sshll.u32 %s6437_s22, 4  ;;  %s133_s24 = sshll.u32 %s6438_s23, 4  ;;  %s110_s17 = int_to_ptr.vmem [resolvable:$true] %s109_s17  ;;  %s134_s24 = int_to_ptr.vmem [resolvable:$true] %s133_s24 }
  0xa8   :  { %s6250_s12 = scalar_lea.hbm %s7116_s7, 2048 }
  0xa9   :  { %p6251_p2 = scmp.ne.s32.totalorder %s7116_s7, %s6250_s12  ;;  %p6254_p3 = scmp.lt.u32.totalorder %s6250_s12, %s7116_s7 }
  0xab   :  { %p6256_p4 = pnand %p6254_p3, %p6251_p2 }
  0xad   :  { %6259 = shalt.err (!%p6256_p4)
}
  0xae   :  { %s6260_s5 = scalar_lea.vmem %s110_s17, 2048  ;;  %p6265_p6 = scmp.lt.s32.totalorder %s110_s17, %s110_s17 }
  0xaf   :  { %p6261_p5 = scmp.ne.s32.totalorder %s110_s17, %s6260_s5  ;;  %p6266_p7 = scmp.lt.s32.totalorder %s6260_s5, %s6260_s5 }
  0xb1   :  { %p6267_p8 = por %p6266_p7, %p6265_p6 }
  0xb3   :  { %p6268_p9 = pnand %p6267_p8, %p6261_p5 }
  0xb5   :  { %6271 = shalt.err (!%p6268_p9)
}
  0xb6   :  { %115 = dma.hbm_to_vmem [thread:$0]  %s7116_s7, 2048, %s110_s17, [#allocation12], %s6429_s27, %s6429_s27, %s6430_s0  }
  0xb7   :  { %s6272_s3 = scalar_lea.hbm %s7118_s9, 4096 }
  0xb8   :  { %p6273_p10 = scmp.ne.s32.totalorder %s7118_s9, %s6272_s3  ;;  %p6276_p11 = scmp.lt.u32.totalorder %s6272_s3, %s7118_s9 }
  0xba   :  { %p6278_p12 = pnand %p6276_p11, %p6273_p10 }
  0xbc   :  { %6281 = shalt.err (!%p6278_p12)
}
  0xbd   :  { %s6282_s26 = scalar_lea.vmem %s134_s24, 4096  ;;  %p6287_p0 = scmp.lt.s32.totalorder %s134_s24, %s134_s24 }
  0xbe   :  { %p6283_p13 = scmp.ne.s32.totalorder %s134_s24, %s6282_s26  ;;  %p6288_p1 = scmp.lt.s32.totalorder %s6282_s26, %s6282_s26 }
  0xc0   :  { %p6289_p2 = por %p6288_p1, %p6287_p0 }
  0xc2   :  { %p6290_p3 = pnand %p6289_p2, %p6283_p13 }
  0xc4   :  { %6293 = shalt.err (!%p6290_p3)
}
  0xc5   :  { %139 = dma.hbm_to_vmem [thread:$0]  %s7118_s9, 4096, %s134_s24, [#allocation15], %s6429_s27, %s6429_s27, %s6430_s0  }
  0xc6   :  { %s6439_s12 = smov [#allocation19]   ;;  %s6440_s10 = smov [#allocation22]  }
  0xc7   :  { %s157_s30 = sshll.u32 %s6439_s12, 4  ;;  %s181_s28 = sshll.u32 %s6440_s10, 4  ;;  %s158_s30 = int_to_ptr.vmem [resolvable:$true] %s157_s30  ;;  %s182_s28 = int_to_ptr.vmem [resolvable:$true] %s181_s28 }
  0xc8   :  { %s6294_s29 = scalar_lea.hbm %s7120_s11, 8192 }
  0xc9   :  { %p6295_p4 = scmp.ne.s32.totalorder %s7120_s11, %s6294_s29  ;;  %p6298_p5 = scmp.lt.u32.totalorder %s6294_s29, %s7120_s11 }
  0xcb   :  { %p6300_p6 = pnand %p6298_p5, %p6295_p4 }
  0xcd   :  { %6303 = shalt.err (!%p6300_p6)
}
  0xce   :  { %s6304_s9 = scalar_lea.vmem %s158_s30, 8192  ;;  %p6309_p8 = scmp.lt.s32.totalorder %s158_s30, %s158_s30 }
  0xcf   :  { %p6305_p7 = scmp.ne.s32.totalorder %s158_s30, %s6304_s9  ;;  %p6310_p9 = scmp.lt.s32.totalorder %s6304_s9, %s6304_s9 }
  0xd1   :  { %p6311_p10 = por %p6310_p9, %p6309_p8 }
  0xd3   :  { %p6312_p11 = pnand %p6311_p10, %p6305_p7 }
  0xd5   :  { %6315 = shalt.err (!%p6312_p11)
}
  0xd6   :  { %163 = dma.hbm_to_vmem [thread:$0]  %s7120_s11, 8192, %s158_s30, [#allocation18], %s6431_s8, %s6431_s8, %s6432_s19  }
  0xd7   :  { %s6316_s22 = scalar_lea.hbm %s7122_s13, 4096 }
  0xd8   :  { %p6317_p12 = scmp.ne.s32.totalorder %s7122_s13, %s6316_s22  ;;  %p6320_p13 = scmp.lt.u32.totalorder %s6316_s22, %s7122_s13 }
  0xda   :  { %p6322_p0 = pnand %p6320_p13, %p6317_p12 }
  0xdc   :  { %6325 = shalt.err (!%p6322_p0)
}
  0xdd   :  { %s6326_s17 = scalar_lea.vmem %s182_s28, 4096  ;;  %p6331_p2 = scmp.lt.s32.totalorder %s182_s28, %s182_s28 }
  0xde   :  { %p6327_p1 = scmp.ne.s32.totalorder %s182_s28, %s6326_s17  ;;  %p6332_p3 = scmp.lt.s32.totalorder %s6326_s17, %s6326_s17 }
  0xe0   :  { %p6333_p4 = por %p6332_p3, %p6331_p2 }
  0xe2   :  { %p6334_p5 = pnand %p6333_p4, %p6327_p1 }
  0xe4   :  { %6337 = shalt.err (!%p6334_p5)
}
  0xe5   :  { %187 = dma.hbm_to_vmem [thread:$0]  %s7122_s13, 4096, %s182_s28, [#allocation21], %s6423_s1, %s6423_s1, %s6424_s20  }
  0xe6   :  { %6404 = dma.done.wait [#allocation3], 432  }
  0xe7   :  { %6405 = vsyncadd [#allocation3], 4294966864 }
  0xe8   :  { %6406 = dma.done.wait [#allocation6], 1024  }
  0xe9   :  { %6407 = vsyncadd [#allocation6], 4294966272 }
  0xea   :  { %6408 = dma.done.wait [#allocation9], 1024  }
  0xeb   :  { %6409 = vsyncadd [#allocation9], 4294966272 }
  0xec   :  { %6410 = dma.done.wait [#allocation12], 3072  }
  0xed   :  { %6411 = vsyncadd [#allocation12], 4294964224 }
  0xee   :  { %6412 = dma.done.wait [#allocation15], 6144  }
  0xef   :  { %6413 = vsyncadd [#allocation15], 4294961152 }
  0xf0   :  { %6414 = dma.done.wait [#allocation18], 16384  }
  0xf1   :  { %6415 = vsyncadd [#allocation18], 4294950912 }
  0xf2   :  { %6416 = dma.done.wait [#allocation21], 20480  }
  0xf3   :  { %6417 = vsyncadd [#allocation21], 4294946816  ;;  %v6441_v0 = vmov 0.0   ;;  %vm6442_vm0 = vmmov 0   ;;  %v5189_v1 = vld [vmem:[#allocation5] sm:$0xff]   ;;  %v5190_v2 = vld [vmem:[#allocation5 + $0x8] sm:$0xff]  }
  0xf4   :  { %4932 = vmatprep.subr.bf16.mxu0 %v6441_v0  ;;  %4940 = vmatprep.mubr.msk.bf16.mxu0 %vm6442_vm0, %v6441_v0  ;;  %v5191_v3 = vld [vmem:[#allocation5 + $0x10] sm:$0xff]   ;;  %v4419_v4 = vld [vmem:[#allocation2] ss:$0 sm:$0xff]  ;;  %v4420_v5 = vld [vmem:[#allocation2 + $0x1] ss:$0 sm:$0xff]  ;;  %s7134_s20 = sld [smem:[#allocation36_spill]] }
  0xf5   :  { %4944 = vmatprep.subr.bf16.mxu1 %v6441_v0  ;;  %4952 = vmatprep.mubr.msk.bf16.mxu1 %vm6442_vm0, %v6441_v0  ;;  %v5193_v10 = vld [vmem:[#allocation7] sm:$0xff]   ;;  %v5194_v12 = vld [vmem:[#allocation7 + $0x8] sm:$0xff]   ;;  %v5192_v13 = vld [vmem:[#allocation5 + $0x18] sm:$0xff]   ;;  %vm288_vm1 = vcmask 523264   ;;  %s6444_s23 = smov [#allocation24]   ;;  %s6445_s4 = smov [#allocation23]  }
  0xf6   :  { %4933 = vmatpush3.bf16.msra.mxu0 %v5189_v1  ;;  %4945 = vmatpush3.bf16.msra.mxu1 %v5193_v10  ;;  %v5195_v17 = vld [vmem:[#allocation7 + $0x10] sm:$0xff]   ;;  %v5196_v18 = vld [vmem:[#allocation7 + $0x18] sm:$0xff]   ;;  %v5197_v19 = vld [vmem:[#allocation8] sm:$0xff]   ;;  %s4377_s26 = sshll.u32 %s6445_s4, 4  ;;  %s4378_s26 = int_to_ptr.vmem [resolvable:$true] %s4377_s26 }
  0xf7   :  { %4934 = vmatprep.subr.bf16.mxu0 %v6441_v0  ;;  %4946 = vmatprep.subr.bf16.mxu1 %v6441_v0  ;;  %v5199_v20 = vld [vmem:[#allocation8 + $0x8] sm:$0xff]   ;;  %v4421_v21 = vld [vmem:[#allocation2 + $0x2] ss:$0 sm:$0xff]  ;;  %v5201_v31 = vld [vmem:[#allocation8 + $0x10] sm:$0xff]  }
  0xf8   :  { %v5198_v28 = vld [vmem:[#allocation10] sm:$0xff]   ;;  %v5200_v30 = vld [vmem:[#allocation10 + $0x8] sm:$0xff]   ;;  %v5202_v32 = vld [vmem:[#allocation10 + $0x10] sm:$0xff]  }
  0xf9   :  { %v5203_v33 = vld [vmem:[#allocation8 + $0x18] sm:$0xff]   ;;  %v4427_v35 = vld [vmem:[#allocation2 + $0x3] ss:$0 sm:$0xff]  ;;  %v5206_v45 = vld [vmem:[#allocation11 + $0x8] sm:$0xff]  }
  0xfa   :  { %v232_v6 = vld [vmem:[%s7134_s20] sm:$0xff]  ;;  %v4774_v8 = vld [vmem:[%s7134_s20 + $0x8] sm:$0xff]  ;;  %4935 = vmatpush3.bf16.msra.mxu0 %v5190_v2  ;;  %4947 = vmatpush3.bf16.msra.mxu1 %v5194_v12  ;;  %v5204_v34 = vld [vmem:[#allocation10 + $0x18] sm:$0xff]  }
  0xfb   :  { %v239_v7 = vmul.f32 %v4419_v4, %v232_v6  ;;  %v3197_v9 = vmul.f32 %v4774_v8, %v4419_v4  ;;  %4936 = vmatprep.subr.bf16.mxu0 %v6441_v0  ;;  %4948 = vmatprep.subr.bf16.mxu1 %v6441_v0  ;;  %v5205_v43 = vld [vmem:[#allocation11] sm:$0xff]   ;;  %v5207_v46 = vld [vmem:[#allocation11 + $0x10] sm:$0xff]   ;;  %v5208_v47 = vld [vmem:[#allocation11 + $0x18] sm:$0xff]  }
  0xfc   :  { %v5209_v48 = vld [vmem:[#allocation11 + $0x20] sm:$0xff]   ;;  %v5210_v49 = vld [vmem:[#allocation11 + $0x28] sm:$0xff]   ;;  %v5211_v50 = vld [vmem:[#allocation11 + $0x30] sm:$0xff]  }
  0xfd   :  { %v246_v11 = vadd.f32 %v4420_v5, %v239_v7  ;;  %v6743_v14 = vadd.f32 %v4420_v5, %v3197_v9  ;;  %v5212_v51 = vld [vmem:[#allocation11 + $0x38] sm:$0xff]   ;;  %v5213_v52 = vld [vmem:[#allocation13] ss:$8 sps:$4 sm:$0xff]   ;;  %v5215_v53 = vld [vmem:[#allocation13 + $0x4] ss:$8 sps:$4 sm:$0xff]  }
  0xfe   :  { %4937 = vmatpush3.bf16.msra.mxu0 %v5191_v3  ;;  %4949 = vmatpush3.bf16.msra.mxu1 %v5195_v17  ;;  %v5218_v54 = vld [vmem:[#allocation14 + $0x4] ss:$8 sps:$4 sm:$0xff]   ;;  %v5221_v55 = vld [vmem:[#allocation13 + $0x14] ss:$8 sps:$4 sm:$0xff]   ;;  %v5219_v56 = vld [vmem:[#allocation13 + $0x10] ss:$8 sps:$4 sm:$0xff]  }
  0xff   :  { %v247_v15 = vmax.f32 %v246_v11, 0.0  ;;  %4938 = vmatprep.subr.bf16.mxu0 %v6441_v0  ;;  %4950 = vmatprep.subr.bf16.mxu1 %v6441_v0  ;;  %v5227_v57 = vld [vmem:[#allocation13 + $0x24] ss:$8 sps:$4 sm:$0xff]   ;;  %v5225_v58 = vld [vmem:[#allocation13 + $0x20] ss:$8 sps:$4 sm:$0xff]  }
 0x100   :  { %v5233_v59 = vld [vmem:[#allocation13 + $0x34] ss:$8 sps:$4 sm:$0xff]   ;;  %v5231_v60 = vld [vmem:[#allocation13 + $0x30] ss:$8 sps:$4 sm:$0xff]   ;;  %v5239_v61 = vld [vmem:[#allocation13 + $0x44] ss:$8 sps:$4 sm:$0xff]  }
 0x101   :  { %v248_v16 = vpack.c.bf16 %v247_v15, %v247_v15  ;;  %v5237_v62 = vld [vmem:[#allocation13 + $0x40] ss:$8 sps:$4 sm:$0xff]   ;;  %v5245_v63 = vld [vmem:[#allocation13 + $0x54] ss:$8 sps:$4 sm:$0xff]   ;;  %v5243_v1 = vld [vmem:[#allocation13 + $0x50] ss:$8 sps:$4 sm:$0xff]  }
 0x102   :  { %4939 = vmatpush3.bf16.msra.mxu0 %v5192_v13  ;;  %4951 = vmatpush3.bf16.msra.mxu1 %v5196_v18  ;;  %v5251_v2 = vld [vmem:[#allocation13 + $0x64] ss:$8 sps:$4 sm:$0xff]   ;;  %v5249_v3 = vld [vmem:[#allocation13 + $0x60] ss:$8 sps:$4 sm:$0xff]   ;;  %v5224_v13 = vld [vmem:[#allocation14 + $0x14] ss:$8 sps:$4 sm:$0xff]  }
 0x103   :  { %4956 = vmatprep.subr.bf16.mxu0 %v6441_v0  ;;  %4968 = vmatprep.subr.bf16.mxu1 %v6441_v0  ;;  %v4439_v4 = vld [vmem:[#allocation2 + $0x5] ss:$0 sm:$0xff]  ;;  %v5236_v18 = vld [vmem:[#allocation14 + $0x34] ss:$8 sps:$4 sm:$0xff]  }
 0x104   :  { %v5216_v11 = vld [vmem:[#allocation14] ss:$8 sps:$4 sm:$0xff]  }
 0x105   :  { %4941 = vmatmul.mubr.msk.bf16.vlgmr.msra.gmra.mrb[0].mxu0 %vm288_vm1, %v248_v16  ;;  %v5230_v16 = vld [vmem:[#allocation14 + $0x24] ss:$8 sps:$4 sm:$0xff]   ;;  %v5228_v17 = vld [vmem:[#allocation14 + $0x20] ss:$8 sps:$4 sm:$0xff]  }
 0x106   :  { %4964 = vmatprep.mubr.msk.bf16.mxu0 %vm6442_vm0, %v6441_v0  ;;  %4957 = vmatpush3.bf16.msra.mxu0 %v5197_v19  ;;  %v5234_v19 = vld [vmem:[#allocation14 + $0x30] ss:$8 sps:$4 sm:$0xff]  }
 0x107   :  { %4958 = vmatprep.subr.bf16.mxu0 %v6441_v0 }
 0x10a   :  { %4959 = vmatpush3.bf16.msra.mxu0 %v5199_v20  ;;  %v5242_v20 = vld [vmem:[#allocation14 + $0x44] ss:$8 sps:$4 sm:$0xff]  }
 0x10b   :  { %4960 = vmatprep.subr.bf16.mxu0 %v6441_v0 }
 0x10e   :  { %4961 = vmatpush3.bf16.msra.mxu0 %v5201_v31  ;;  %v5263_v31 = vld [vmem:[#allocation16 + $0x4] ss:$8 sps:$4 sm:$0xff]  }
 0x10f   :  { %4962 = vmatprep.subr.bf16.mxu0 %v6441_v0 }
 0x112   :  { %4963 = vmatpush3.bf16.msra.mxu0 %v5203_v33  ;;  %v4445_v33 = vld [vmem:[#allocation2 + $0x6] ss:$0 sm:$0xff] }
 0x113   :  { %4980 = vmatprep.subr.bf16.mxu0 %v6441_v0 }
 0x1d8   :  { %v326_v22 = vpop.f32.mrb[0].mxu0 }
 0x1d9   :  { %v327_v23 = vadd.f32 %v4421_v21, %v326_v22  ;;  %v4942_v24 = vpop.f32.mrb[1].mxu0  ;;  %v5240_v21 = vld [vmem:[#allocation14 + $0x40] ss:$8 sps:$4 sm:$0xff]   ;;  %v5248_v22 = vld [vmem:[#allocation14 + $0x54] ss:$8 sps:$4 sm:$0xff]  }
 0x1da   :  { %v329_v25 = vpop.f32.mrb[2].mxu0  ;;  %v5254_v24 = vld [vmem:[#allocation14 + $0x64] ss:$8 sps:$4 sm:$0xff]  }
 0x1db   :  { %v332_v26 = vmax.f32 %v327_v23, 0.0  ;;  %v4943_v27 = vpop.f32.mrb[3].mxu0  ;;  %v5246_v23 = vld [vmem:[#allocation14 + $0x50] ss:$8 sps:$4 sm:$0xff]   ;;  %v5252_v25 = vld [vmem:[#allocation14 + $0x60] ss:$8 sps:$4 sm:$0xff]  }
 0x1dc   :  { %v5260_v27 = vld [vmem:[#allocation14 + $0x74] ss:$8 sps:$4 sm:$0xff]  }
 0x1dd   :  { %v333_v29 = vpack.c.bf16 %v332_v26, %v332_v26  ;;  %v5257_v26 = vld [vmem:[#allocation13 + $0x74] ss:$8 sps:$4 sm:$0xff]  }
 0x1df   :  { %4953 = vmatmul.mubr.msk.bf16.vlgmr.msra.gmra.mrb[0].mxu1 %vm288_vm1, %v333_v29  ;;  %v5258_v29 = vld [vmem:[#allocation14 + $0x70] ss:$8 sps:$4 sm:$0xff]  }
 0x1e0   :  { %4969 = vmatpush3.bf16.msra.mxu1 %v5198_v28  ;;  %4976 = vmatprep.mubr.msk.bf16.mxu1 %vm6442_vm0, %v6441_v0  ;;  %v5255_v28 = vld [vmem:[#allocation13 + $0x70] ss:$8 sps:$4 sm:$0xff]  }
 0x1e1   :  { %4970 = vmatprep.subr.bf16.mxu1 %v6441_v0 }
 0x1e4   :  { %4971 = vmatpush3.bf16.msra.mxu1 %v5200_v30  ;;  %v6443_v30 = vmov 0  }
 0x1e5   :  { %4972 = vmatprep.subr.bf16.mxu1 %v6441_v0 }
 0x1e8   :  { %4973 = vmatpush3.bf16.msra.mxu1 %v5202_v32  ;;  %v4433_v32 = vld [vmem:[#allocation2 + $0x4] ss:$0 sm:$0xff] }
 0x1e9   :  { %4974 = vmatprep.subr.bf16.mxu1 %v6441_v0 }
 0x1ec   :  { %4975 = vmatpush3.bf16.msra.mxu1 %v5204_v34  ;;  %v6777_v34 = vadd.f32 %v4445_v33, %v4433_v32  ;;  %v5363_v32 = vld [vmem:[#allocation17 + $0x120] ss:$16 sps:$4 sm:$0xff]   ;;  %v5371_v33 = vld [vmem:[#allocation17 + $0x144] ss:$16 sps:$4 sm:$0xff]  }
 0x1ed   :  { %804 = vmatprep.subr.bf16.mxu1 %v5215_v53  ;;  %v5281_v53 = vld [vmem:[#allocation16 + $0x64] ss:$8 sps:$4 sm:$0xff]  }
 0x2b2   :  { %v410_v36 = vpop.f32.mrb[0].mxu1 }
 0x2b3   :  { %v411_v37 = vadd.f32 %v4427_v35, %v410_v36  ;;  %v4954_v38 = vpop.f32.mrb[1].mxu1 }
 0x2b4   :  { %v413_v39 = vpop.f32.mrb[2].mxu1 }
 0x2b5   :  { %v416_v40 = vadd.f32 %v411_v37, %v247_v15  ;;  %v4955_v41 = vpop.f32.mrb[3].mxu1  ;;  %v5222_v15 = vld [vmem:[#allocation14 + $0x10] ss:$8 sps:$4 sm:$0xff]  }
 0x2b6   :  { %v5261_v41 = vld [vmem:[#allocation16] ss:$8 sps:$4 sm:$0xff]  }
 0x2b7   :  { %v417_v42 = vmax.f32 %v416_v40, 0.0 }
 0x2b9   :  { %v418_v44 = vpack.c.bf16 %v417_v42, %v417_v42 }
 0x2bb   :  { %4965 = vmatmul.mubr.msk.bf16.vlgmr.msra.gmra.mrb[4].mxu0 %vm288_vm1, %v418_v44  ;;  %4977 = vmatmul.mubr.msk.bf16.vlgmr.msra.gmra.mrb[4].mxu1 %vm288_vm1, %v418_v44  ;;  %v5264_v44 = vld [vmem:[#allocation16 + $0x10] ss:$8 sps:$4 sm:$0xff]  }
 0x2bc   :  { %4981 = vmatpush3.bf16.msra.mxu0 %v5205_v43  ;;  %4996 = vmatprep.mubr.msk.bf16.mxu0 %vm6442_vm0, %v6441_v0  ;;  %v5266_v43 = vld [vmem:[#allocation16 + $0x14] ss:$8 sps:$4 sm:$0xff]  }
 0x2bd   :  { %4982 = vmatprep.subr.bf16.mxu0 %v6441_v0  ;;  %805 = vmatpush1.bf16.msra.mxu1 %v5213_v52  ;;  %v5276_v52 = vld [vmem:[#allocation16 + $0x50] ss:$8 sps:$4 sm:$0xff]  }
 0x2be   :  { %806 = vmatprep.subr.bf16.mxu1 %v5221_v55  ;;  %836 = vmatprep.mubr.bf16.mxu1 %v6443_v30  ;;  %v5284_v55 = vld [vmem:[#allocation16 + $0x74] ss:$8 sps:$4 sm:$0xff]  }
 0x2c0   :  { %4983 = vmatpush3.bf16.msra.mxu0 %v5206_v45  ;;  %v5269_v45 = vld [vmem:[#allocation16 + $0x24] ss:$8 sps:$4 sm:$0xff]  }
 0x2c1   :  { %4984 = vmatprep.subr.bf16.mxu0 %v6441_v0  ;;  %807 = vmatpush1.bf16.msra.mxu1 %v5219_v56  ;;  %v5282_v56 = vld [vmem:[#allocation16 + $0x70] ss:$8 sps:$4 sm:$0xff]  }
 0x2c2   :  { %808 = vmatprep.subr.bf16.mxu1 %v5227_v57  ;;  %v5287_v57 = vld [vmem:[#allocation16 + $0x84] ss:$8 sps:$4 sm:$0xff]  }
 0x2c4   :  { %4985 = vmatpush3.bf16.msra.mxu0 %v5207_v46  ;;  %v5267_v46 = vld [vmem:[#allocation16 + $0x20] ss:$8 sps:$4 sm:$0xff]  }
 0x2c5   :  { %4986 = vmatprep.subr.bf16.mxu0 %v6441_v0  ;;  %809 = vmatpush1.bf16.msra.mxu1 %v5225_v58  ;;  %v5285_v58 = vld [vmem:[#allocation16 + $0x80] ss:$8 sps:$4 sm:$0xff]  }
 0x2c6   :  { %810 = vmatprep.subr.bf16.mxu1 %v5233_v59  ;;  %v5290_v59 = vld [vmem:[#allocation16 + $0x94] ss:$8 sps:$4 sm:$0xff]  }
 0x2c8   :  { %4987 = vmatpush3.bf16.msra.mxu0 %v5208_v47  ;;  %v5272_v47 = vld [vmem:[#allocation16 + $0x34] ss:$8 sps:$4 sm:$0xff]  }
 0x2c9   :  { %4988 = vmatprep.subr.bf16.mxu0 %v6441_v0  ;;  %811 = vmatpush1.bf16.msra.mxu1 %v5231_v60  ;;  %v5288_v60 = vld [vmem:[#allocation16 + $0x90] ss:$8 sps:$4 sm:$0xff]  }
 0x2ca   :  { %812 = vmatprep.subr.bf16.mxu1 %v5239_v61  ;;  %v5293_v61 = vld [vmem:[#allocation16 + $0xa4] ss:$8 sps:$4 sm:$0xff]  }
 0x2cc   :  { %4989 = vmatpush3.bf16.msra.mxu0 %v5209_v48  ;;  %v5270_v48 = vld [vmem:[#allocation16 + $0x30] ss:$8 sps:$4 sm:$0xff]  }
 0x2cd   :  { %4990 = vmatprep.subr.bf16.mxu0 %v6441_v0  ;;  %813 = vmatpush1.bf16.msra.mxu1 %v5237_v62  ;;  %v5291_v62 = vld [vmem:[#allocation16 + $0xa0] ss:$8 sps:$4 sm:$0xff]  }
 0x2ce   :  { %814 = vmatprep.subr.bf16.mxu1 %v5245_v63  ;;  %v5296_v63 = vld [vmem:[#allocation16 + $0xb4] ss:$8 sps:$4 sm:$0xff]  }
 0x2d0   :  { %4991 = vmatpush3.bf16.msra.mxu0 %v5210_v49  ;;  %v5275_v49 = vld [vmem:[#allocation16 + $0x44] ss:$8 sps:$4 sm:$0xff]  }
 0x2d1   :  { %4992 = vmatprep.subr.bf16.mxu0 %v6441_v0  ;;  %815 = vmatpush1.bf16.msra.mxu1 %v5243_v1  ;;  %v5294_v1 = vld [vmem:[#allocation16 + $0xb0] ss:$8 sps:$4 sm:$0xff]  }
 0x2d2   :  { %816 = vmatprep.subr.bf16.mxu1 %v5251_v2  ;;  %v5299_v2 = vld [vmem:[#allocation16 + $0xc4] ss:$8 sps:$4 sm:$0xff]  }
 0x2d4   :  { %4993 = vmatpush3.bf16.msra.mxu0 %v5211_v50  ;;  %v5273_v50 = vld [vmem:[#allocation16 + $0x40] ss:$8 sps:$4 sm:$0xff]  }
 0x2d5   :  { %4994 = vmatprep.subr.bf16.mxu0 %v6441_v0  ;;  %817 = vmatpush1.bf16.msra.mxu1 %v5249_v3  ;;  %v5297_v3 = vld [vmem:[#allocation16 + $0xc0] ss:$8 sps:$4 sm:$0xff]  }
 0x2d6   :  { %818 = vmatprep.subr.bf16.mxu1 %v5257_v26  ;;  %v5353_v26 = vld [vmem:[#allocation17 + $0xe4] ss:$16 sps:$4 sm:$0xff]  }
 0x2d8   :  { %4995 = vmatpush3.bf16.msra.mxu0 %v5212_v51  ;;  %v5278_v51 = vld [vmem:[#allocation16 + $0x54] ss:$8 sps:$4 sm:$0xff]  }
 0x2d9   :  { %953 = vmatprep.subr.bf16.mxu0 %v5218_v54  ;;  %819 = vmatpush1.bf16.msra.mxu1 %v5255_v28  ;;  %v5279_v54 = vld [vmem:[#allocation16 + $0x60] ss:$8 sps:$4 sm:$0xff]   ;;  %v5359_v28 = vld [vmem:[#allocation17 + $0x104] ss:$16 sps:$4 sm:$0xff]  }
 0x2da   :  { %1202 = vmatprep.subr.bf16.mxu1 %v5263_v31  ;;  %v5365_v31 = vld [vmem:[#allocation17 + $0x124] ss:$16 sps:$4 sm:$0xff]  }
 0x38e   :  { %v574_v5 = vpop.f32.mrb[4].mxu1 }
 0x38f   :  { %v575_v6 = vadd.f32 %v4439_v4, %v574_v5  ;;  %v4978_v7 = vpop.f32.mrb[5].mxu1  ;;  %v5302_v4 = vld [vmem:[#allocation16 + $0xd4] ss:$8 sps:$4 sm:$0xff]   ;;  %v5300_v5 = vld [vmem:[#allocation16 + $0xd0] ss:$8 sps:$4 sm:$0xff]  }
 0x390   :  { %v577_v8 = vpop.f32.mrb[6].mxu1  ;;  %v5303_v7 = vld [vmem:[#allocation16 + $0xe0] ss:$8 sps:$4 sm:$0xff]  }
 0x391   :  { %v580_v9 = vmax.f32 %v575_v6, 0.0  ;;  %v4979_v10 = vpop.f32.mrb[7].mxu1  ;;  %v5305_v6 = vld [vmem:[#allocation16 + $0xe4] ss:$8 sps:$4 sm:$0xff]   ;;  %v5308_v8 = vld [vmem:[#allocation16 + $0xf4] ss:$8 sps:$4 sm:$0xff]  }
 0x392   :  { %v5309_v10 = vld [vmem:[#allocation17] ss:$16 sps:$4 sm:$0xff]  }
 0x393   :  { %v581_v12 = vpack.c.bf16 %v580_v9, %v580_v9  ;;  %v5306_v9 = vld [vmem:[#allocation16 + $0xf0] ss:$8 sps:$4 sm:$0xff]  }
 0x395   :  { %4997 = vmatmul.mubr.bf16.vlgmr.msra.gmra.mrb[4].mxu0 %v581_v12  ;;  %v5314_v12 = vld [vmem:[#allocation17 + $0xc] ss:$16 sps:$4 sm:$0xff]  }
 0x396   :  { %954 = vmatpush1.bf16.msra.mxu0 %v5216_v11  ;;  %985 = vmatprep.mubr.bf16.mxu0 %v6443_v30  ;;  %v5311_v11 = vld [vmem:[#allocation17 + $0x4] ss:$16 sps:$4 sm:$0xff]  }
 0x397   :  { %955 = vmatprep.subr.bf16.mxu0 %v5224_v13  ;;  %v5317_v13 = vld [vmem:[#allocation17 + $0x24] ss:$16 sps:$4 sm:$0xff]  }
 0x39a   :  { %956 = vmatpush1.bf16.msra.mxu0 %v5222_v15  ;;  %v5315_v15 = vld [vmem:[#allocation17 + $0x20] ss:$16 sps:$4 sm:$0xff]  }
 0x39b   :  { %957 = vmatprep.subr.bf16.mxu0 %v5230_v16  ;;  %v5323_v16 = vld [vmem:[#allocation17 + $0x44] ss:$16 sps:$4 sm:$0xff]  }
 0x39e   :  { %958 = vmatpush1.bf16.msra.mxu0 %v5228_v17  ;;  %v5321_v17 = vld [vmem:[#allocation17 + $0x40] ss:$16 sps:$4 sm:$0xff]  }
 0x39f   :  { %959 = vmatprep.subr.bf16.mxu0 %v5236_v18  ;;  %v5329_v18 = vld [vmem:[#allocation17 + $0x64] ss:$16 sps:$4 sm:$0xff]  }
 0x3a2   :  { %960 = vmatpush1.bf16.msra.mxu0 %v5234_v19  ;;  %v5327_v19 = vld [vmem:[#allocation17 + $0x60] ss:$16 sps:$4 sm:$0xff]  }
 0x3a3   :  { %961 = vmatprep.subr.bf16.mxu0 %v5242_v20  ;;  %v5335_v20 = vld [vmem:[#allocation17 + $0x84] ss:$16 sps:$4 sm:$0xff]  }
 0x3a6   :  { %962 = vmatpush1.bf16.msra.mxu0 %v5240_v21  ;;  %v5333_v21 = vld [vmem:[#allocation17 + $0x80] ss:$16 sps:$4 sm:$0xff]  }
 0x3a7   :  { %963 = vmatprep.subr.bf16.mxu0 %v5248_v22  ;;  %v5341_v22 = vld [vmem:[#allocation17 + $0xa4] ss:$16 sps:$4 sm:$0xff]  }
 0x3aa   :  { %964 = vmatpush1.bf16.msra.mxu0 %v5246_v23  ;;  %v5339_v23 = vld [vmem:[#allocation17 + $0xa0] ss:$16 sps:$4 sm:$0xff]  }
 0x3ab   :  { %965 = vmatprep.subr.bf16.mxu0 %v5254_v24  ;;  %v5347_v24 = vld [vmem:[#allocation17 + $0xc4] ss:$16 sps:$4 sm:$0xff]  }
 0x3ae   :  { %966 = vmatpush1.bf16.msra.mxu0 %v5252_v25  ;;  %v5345_v25 = vld [vmem:[#allocation17 + $0xc0] ss:$16 sps:$4 sm:$0xff]  }
 0x3af   :  { %967 = vmatprep.subr.bf16.mxu0 %v5260_v27  ;;  %v5351_v27 = vld [vmem:[#allocation17 + $0xe0] ss:$16 sps:$4 sm:$0xff]  }
 0x3b2   :  { %968 = vmatpush1.bf16.msra.mxu0 %v5258_v29  ;;  %v5357_v29 = vld [vmem:[#allocation17 + $0x100] ss:$16 sps:$4 sm:$0xff]  }
 0x3b3   :  { %1655 = vmatprep.subr.bf16.mxu0 %v5311_v11  ;;  %v5362_v11 = vld [vmem:[#allocation17 + $0x10c] ss:$16 sps:$4 sm:$0xff]  }
 0x468   :  { %v687_v35 = vpop.f32.mrb[4].mxu0 }
 0x469   :  { %v5089_v36 = vadd.f32 %v6777_v34, %v687_v35  ;;  %v4998_v37 = vpop.f32.mrb[5].mxu0  ;;  %v5369_v35 = vld [vmem:[#allocation17 + $0x140] ss:$16 sps:$4 sm:$0xff]  }
 0x46a   :  { %v690_v38 = vpop.f32.mrb[6].mxu0  ;;  %v5375_v37 = vld [vmem:[#allocation17 + $0x160] ss:$16 sps:$4 sm:$0xff]  }
 0x46b   :  { %v694_v39 = vmax.f32 %v5089_v36, 0.0  ;;  %v4999_v40 = vpop.f32.mrb[7].mxu0  ;;  %v5377_v36 = vld [vmem:[#allocation17 + $0x164] ss:$16 sps:$4 sm:$0xff]  }
 0x46c   :  { %v5383_v38 = vld [vmem:[#allocation17 + $0x184] ss:$16 sps:$4 sm:$0xff]  }
 0x46d   :  { %v695_v42 = vpack.c.bf16 %v694_v39, %v694_v39  ;;  %v5381_v39 = vld [vmem:[#allocation17 + $0x180] ss:$16 sps:$4 sm:$0xff]   ;;  %v5389_v40 = vld [vmem:[#allocation17 + $0x1a4] ss:$16 sps:$4 sm:$0xff]  }
 0x46f   :  { %837 = vmatmul.mubr.bf16.vlgmr.msra.gmra.mrb[8].mxu1 %v695_v42  ;;  %986 = vmatmul.mubr.bf16.vlgmr.msra.gmra.mrb[8].mxu0 %v695_v42  ;;  %v714_v42 = vlaneseq }
 0x470   :  { %1203 = vmatpush1.bf16.msra.mxu1 %v5261_v41  ;;  %1656 = vmatpush1.bf16.msra.mxu0 %v5309_v10  ;;  %v5387_v41 = vld [vmem:[#allocation17 + $0x1a0] ss:$16 sps:$4 sm:$0xff]   ;;  %v5354_v10 = vld [vmem:[#allocation17 + $0xe8] ss:$16 sps:$4 sm:$0xff]  }
 0x471   :  { %1204 = vmatprep.subr.bf16.mxu1 %v5266_v43  ;;  %1657 = vmatprep.subr.bf16.mxu0 %v5317_v13  ;;  %v6780_v43 = vshrl.u32 %v714_v42, 7  ;;  %v5368_v13 = vld [vmem:[#allocation17 + $0x12c] ss:$16 sps:$4 sm:$0xff]  }
 0x474   :  { %1205 = vmatpush1.bf16.msra.mxu1 %v5264_v44  ;;  %1658 = vmatpush1.bf16.msra.mxu0 %v5315_v15  ;;  %v6783_v44 = vsub.s32 0, %v6780_v43  ;;  %v5366_v15 = vld [vmem:[#allocation17 + $0x128] ss:$16 sps:$4 sm:$0xff]  }
 0x475   :  { %1206 = vmatprep.subr.bf16.mxu1 %v5269_v45  ;;  %1659 = vmatprep.subr.bf16.mxu0 %v5323_v16  ;;  %v861_v45 = vld [vmem:[#allocation2 + $0x9] sm:$0x3] }
 0x476   :  { %v5374_v16 = vld [vmem:[#allocation17 + $0x14c] ss:$16 sps:$4 sm:$0xff]  }
 0x478   :  { %1207 = vmatpush1.bf16.msra.mxu1 %v5267_v46  ;;  %1660 = vmatpush1.bf16.msra.mxu0 %v5321_v17  ;;  %v6786_v46 = vsub.s32 1, %v6780_v43  ;;  %v5372_v17 = vld [vmem:[#allocation17 + $0x148] ss:$16 sps:$4 sm:$0xff]  }
 0x479   :  { %1208 = vmatprep.subr.bf16.mxu1 %v5272_v47  ;;  %1661 = vmatprep.subr.bf16.mxu0 %v5329_v18  ;;  %v6789_v47 = vrot.slane %v861_v45, %v6783_v44  ;;  %v5380_v18 = vld [vmem:[#allocation17 + $0x16c] ss:$16 sps:$4 sm:$0xff]  }
 0x47c   :  { %1209 = vmatpush1.bf16.msra.mxu1 %v5270_v48  ;;  %1662 = vmatpush1.bf16.msra.mxu0 %v5327_v19  ;;  %v6792_v48 = vrot.slane %v861_v45, %v6786_v46  ;;  %v5378_v19 = vld [vmem:[#allocation17 + $0x168] ss:$16 sps:$4 sm:$0xff]  }
 0x47d   :  { %1210 = vmatprep.subr.bf16.mxu1 %v5275_v49  ;;  %1663 = vmatprep.subr.bf16.mxu0 %v5335_v20  ;;  %v5386_v20 = vld [vmem:[#allocation17 + $0x18c] ss:$16 sps:$4 sm:$0xff]  }
 0x480   :  { %1211 = vmatpush1.bf16.msra.mxu1 %v5273_v50  ;;  %1664 = vmatpush1.bf16.msra.mxu0 %v5333_v21  ;;  %v5384_v21 = vld [vmem:[#allocation17 + $0x188] ss:$16 sps:$4 sm:$0xff]  }
 0x481   :  { %1212 = vmatprep.subr.bf16.mxu1 %v5278_v51  ;;  %1665 = vmatprep.subr.bf16.mxu0 %v5341_v22  ;;  %v5392_v22 = vld [vmem:[#allocation17 + $0x1ac] ss:$16 sps:$4 sm:$0xff]  }
 0x484   :  { %1213 = vmatpush1.bf16.msra.mxu1 %v5276_v52  ;;  %1666 = vmatpush1.bf16.msra.mxu0 %v5339_v23  ;;  %v5390_v23 = vld [vmem:[#allocation17 + $0x1a8] ss:$16 sps:$4 sm:$0xff]  }
 0x485   :  { %1214 = vmatprep.subr.bf16.mxu1 %v5281_v53  ;;  %1667 = vmatprep.subr.bf16.mxu0 %v5347_v24  ;;  %v5395_v24 = vld [vmem:[#allocation17 + $0x1c4] ss:$16 sps:$4 sm:$0xff]  }
 0x488   :  { %1215 = vmatpush1.bf16.msra.mxu1 %v5279_v54  ;;  %1668 = vmatpush1.bf16.msra.mxu0 %v5345_v25  ;;  %v5398_v25 = vld [vmem:[#allocation17 + $0x1cc] ss:$16 sps:$4 sm:$0xff]  }
 0x489   :  { %1216 = vmatprep.subr.bf16.mxu1 %v5284_v55  ;;  %1669 = vmatprep.subr.bf16.mxu0 %v5353_v26  ;;  %v5393_v26 = vld [vmem:[#allocation17 + $0x1c0] ss:$16 sps:$4 sm:$0xff]  }
 0x48c   :  { %1217 = vmatpush1.bf16.msra.mxu1 %v5282_v56  ;;  %1670 = vmatpush1.bf16.msra.mxu0 %v5351_v27  ;;  %v5396_v27 = vld [vmem:[#allocation17 + $0x1c8] ss:$16 sps:$4 sm:$0xff]  }
 0x48d   :  { %1218 = vmatprep.subr.bf16.mxu1 %v5287_v57  ;;  %1671 = vmatprep.subr.bf16.mxu0 %v5359_v28  ;;  %v5401_v28 = vld [vmem:[#allocation17 + $0x1e4] ss:$16 sps:$4 sm:$0xff]  }
 0x490   :  { %1219 = vmatpush1.bf16.msra.mxu1 %v5285_v58  ;;  %1672 = vmatpush1.bf16.msra.mxu0 %v5357_v29  ;;  %v5312_v58 = vld [vmem:[#allocation17 + $0x8] ss:$16 sps:$4 sm:$0xff]   ;;  %v5404_v29 = vld [vmem:[#allocation17 + $0x1ec] ss:$16 sps:$4 sm:$0xff]  }
 0x491   :  { %1220 = vmatprep.subr.bf16.mxu1 %v5290_v59  ;;  %1673 = vmatprep.subr.bf16.mxu0 %v5365_v31  ;;  %v5399_v31 = vld [vmem:[#allocation17 + $0x1e0] ss:$16 sps:$4 sm:$0xff]  }
 0x494   :  { %1221 = vmatpush1.bf16.msra.mxu1 %v5288_v60  ;;  %1674 = vmatpush1.bf16.msra.mxu0 %v5363_v32  ;;  %v5320_v60 = vld [vmem:[#allocation17 + $0x2c] ss:$16 sps:$4 sm:$0xff]   ;;  %v5402_v32 = vld [vmem:[#allocation17 + $0x1e8] ss:$16 sps:$4 sm:$0xff]  }
 0x495   :  { %1222 = vmatprep.subr.bf16.mxu1 %v5293_v61  ;;  %1675 = vmatprep.subr.bf16.mxu0 %v5371_v33  ;;  %v5318_v61 = vld [vmem:[#allocation17 + $0x28] ss:$16 sps:$4 sm:$0xff]   ;;  %v5407_v33 = vld [vmem:[#allocation19 + $0x4] ss:$16 sps:$4 sm:$0xff]  }
 0x498   :  { %1223 = vmatpush1.bf16.msra.mxu1 %v5291_v62  ;;  %1676 = vmatpush1.bf16.msra.mxu0 %v5369_v35  ;;  %v5326_v62 = vld [vmem:[#allocation17 + $0x4c] ss:$16 sps:$4 sm:$0xff]  }
 0x499   :  { %1224 = vmatprep.subr.bf16.mxu1 %v5296_v63  ;;  %1677 = vmatprep.subr.bf16.mxu0 %v5377_v36  ;;  %v5324_v63 = vld [vmem:[#allocation17 + $0x48] ss:$16 sps:$4 sm:$0xff]   ;;  %v5410_v35 = vld [vmem:[#allocation19 + $0xc] ss:$16 sps:$4 sm:$0xff]  }
 0x49a   :  { %v712_v36 = vld [vmem:[#allocation2 + $0x7] sm:$0x3] }
 0x49c   :  { %1225 = vmatpush1.bf16.msra.mxu1 %v5294_v1  ;;  %1678 = vmatpush1.bf16.msra.mxu0 %v5375_v37  ;;  %v5332_v1 = vld [vmem:[#allocation17 + $0x6c] ss:$16 sps:$4 sm:$0xff]  }
 0x49d   :  { %1226 = vmatprep.subr.bf16.mxu1 %v5299_v2  ;;  %1679 = vmatprep.subr.bf16.mxu0 %v5383_v38  ;;  %v5330_v2 = vld [vmem:[#allocation17 + $0x68] ss:$16 sps:$4 sm:$0xff]   ;;  %v1030_v37 = vld [vmem:[#allocation2 + $0xb] sm:$0x3]  ;;  %v717_v38 = vrot.slane %v712_v36, %v6783_v44 }
 0x4a0   :  { %1227 = vmatpush1.bf16.msra.mxu1 %v5297_v3  ;;  %1680 = vmatpush1.bf16.msra.mxu0 %v5381_v39  ;;  %v5338_v3 = vld [vmem:[#allocation17 + $0x8c] ss:$16 sps:$4 sm:$0xff]   ;;  %v1035_v39 = vrot.slane %v1030_v37, %v6783_v44 }
 0x4a1   :  { %1228 = vmatprep.subr.bf16.mxu1 %v5302_v4  ;;  %1681 = vmatprep.subr.bf16.mxu0 %v5389_v40  ;;  %v5336_v4 = vld [vmem:[#allocation17 + $0x88] ss:$16 sps:$4 sm:$0xff]   ;;  %v721_v40 = vrot.slane %v712_v36, %v6786_v46 }
 0x4a2   :  { %v6800_v42 = vadd.f32 %v1035_v39, %v717_v38  ;;  %v5462_v36 = vld [vmem:[#allocation19 + $0x128] ss:$16 sps:$4 sm:$0xff]   ;;  %v5470_v38 = vld [vmem:[#allocation19 + $0x14c] ss:$16 sps:$4 sm:$0xff]   ;;  %v5465_v39 = vld [vmem:[#allocation19 + $0x140] ss:$16 sps:$4 sm:$0xff]  }
 0x4a4   :  { %1229 = vmatpush1.bf16.msra.mxu1 %v5300_v5  ;;  %1682 = vmatpush1.bf16.msra.mxu0 %v5387_v41  ;;  %v5344_v5 = vld [vmem:[#allocation17 + $0xac] ss:$16 sps:$4 sm:$0xff]   ;;  %v1039_v41 = vrot.slane %v1030_v37, %v6786_v46  ;;  %v5467_v37 = vld [vmem:[#allocation19 + $0x144] ss:$16 sps:$4 sm:$0xff]  }
 0x4a5   :  { %1230 = vmatprep.subr.bf16.mxu1 %v5305_v6  ;;  %v5342_v6 = vld [vmem:[#allocation17 + $0xa8] ss:$16 sps:$4 sm:$0xff]   ;;  %1683 = vmatprep.subr.bf16.mxu0 %v5395_v24  ;;  %v5452_v24 = vld [vmem:[#allocation19 + $0xec] ss:$16 sps:$4 sm:$0xff]  }
 0x4a6   :  { %v6802_v45 = vadd.f32 %v1039_v41, %v721_v40  ;;  %v5468_v40 = vld [vmem:[#allocation19 + $0x148] ss:$16 sps:$4 sm:$0xff]   ;;  %v5473_v41 = vld [vmem:[#allocation19 + $0x164] ss:$16 sps:$4 sm:$0xff]  }
 0x4a8   :  { %1231 = vmatpush1.bf16.msra.mxu1 %v5303_v7  ;;  %v5350_v7 = vld [vmem:[#allocation17 + $0xcc] ss:$16 sps:$4 sm:$0xff]   ;;  %1684 = vmatpush1.bf16.msra.mxu0 %v5393_v26  ;;  %v5450_v26 = vld [vmem:[#allocation19 + $0xe8] ss:$16 sps:$4 sm:$0xff]  }
 0x4a9   :  { %1232 = vmatprep.subr.bf16.mxu1 %v5308_v8  ;;  %v5348_v8 = vld [vmem:[#allocation17 + $0xc8] ss:$16 sps:$4 sm:$0xff]   ;;  %1685 = vmatprep.subr.bf16.mxu0 %v5401_v28  ;;  %v5458_v28 = vld [vmem:[#allocation19 + $0x10c] ss:$16 sps:$4 sm:$0xff]  }
 0x4ac   :  { %1233 = vmatpush1.bf16.msra.mxu1 %v5306_v9  ;;  %v5356_v9 = vld [vmem:[#allocation17 + $0xec] ss:$16 sps:$4 sm:$0xff]   ;;  %1686 = vmatpush1.bf16.msra.mxu0 %v5399_v31  ;;  %v5456_v31 = vld [vmem:[#allocation19 + $0x108] ss:$16 sps:$4 sm:$0xff]  }
 0x4ad   :  { %1696 = vmatprep.subr.bf16.mxu1 %v5314_v12  ;;  %v5360_v12 = vld [vmem:[#allocation17 + $0x108] ss:$16 sps:$4 sm:$0xff]   ;;  %2143 = vmatprep.subr.bf16.mxu0 %v5407_v33  ;;  %v5464_v33 = vld [vmem:[#allocation19 + $0x12c] ss:$16 sps:$4 sm:$0xff]  }
 0x542   :  { %v987_v49 = vpop.f32.mrb[8].mxu0 }
 0x543   :  { %v988_v50 = vadd.f32 %v987_v49, %v6789_v47  ;;  %v989_v51 = vpop.f32.mrb[9].mxu0 }
 0x544   :  { %v990_v52 = vadd.f32 %v989_v51, %v6792_v48  ;;  %v991_v53 = vpop.f32.mrb[10].mxu0 }
 0x545   :  { %v994_v54 = vmax.f32 %v988_v50, 0.0  ;;  %v992_v55 = vpop.f32.mrb[11].mxu0 }
 0x546   :  { %v995_v56 = vmax.f32 %v990_v52, 0.0 }
 0x547   :  { %v996_v59 = vpack.c.bf16 %v994_v54, %v994_v54 }
 0x548   :  { %v997_v57 = vpack.c.bf16 %v995_v56, %v995_v56 }
 0x54a   :  { %1234 = vmatprep.mubr.bf16.mxu1 %v997_v57 }
 0x54b   :  { %1235 = vmatmul.mubr.bf16.vlgmr.msra.gmra.mrb[8].mxu1 %v996_v59  ;;  %v5408_v59 = vld [vmem:[#allocation19 + $0x8] ss:$16 sps:$4 sm:$0xff]  }
 0x54c   :  { %1697 = vmatpush1.bf16.msra.mxu1 %v5312_v58  ;;  %v5405_v58 = vld [vmem:[#allocation19] ss:$16 sps:$4 sm:$0xff]  }
 0x54d   :  { %1698 = vmatprep.subr.bf16.mxu1 %v5320_v60 }
 0x550   :  { %1699 = vmatpush1.bf16.msra.mxu1 %v5318_v61  ;;  %v5413_v61 = vld [vmem:[#allocation19 + $0x24] ss:$16 sps:$4 sm:$0xff]  }
 0x551   :  { %1700 = vmatprep.subr.bf16.mxu1 %v5326_v62  ;;  %v5416_v62 = vld [vmem:[#allocation19 + $0x2c] ss:$16 sps:$4 sm:$0xff]  }
 0x554   :  { %1701 = vmatpush1.bf16.msra.mxu1 %v5324_v63  ;;  %v5411_v63 = vld [vmem:[#allocation19 + $0x20] ss:$16 sps:$4 sm:$0xff]  }
 0x555   :  { %1702 = vmatprep.subr.bf16.mxu1 %v5332_v1  ;;  %v5414_v1 = vld [vmem:[#allocation19 + $0x28] ss:$16 sps:$4 sm:$0xff]  }
 0x558   :  { %1703 = vmatpush1.bf16.msra.mxu1 %v5330_v2  ;;  %v5419_v2 = vld [vmem:[#allocation19 + $0x44] ss:$16 sps:$4 sm:$0xff]  }
 0x559   :  { %1704 = vmatprep.subr.bf16.mxu1 %v5338_v3  ;;  %v5422_v3 = vld [vmem:[#allocation19 + $0x4c] ss:$16 sps:$4 sm:$0xff]  }
 0x55c   :  { %1705 = vmatpush1.bf16.msra.mxu1 %v5336_v4  ;;  %v5417_v4 = vld [vmem:[#allocation19 + $0x40] ss:$16 sps:$4 sm:$0xff]  }
 0x55d   :  { %1706 = vmatprep.subr.bf16.mxu1 %v5344_v5  ;;  %v5420_v5 = vld [vmem:[#allocation19 + $0x48] ss:$16 sps:$4 sm:$0xff]  }
 0x560   :  { %1707 = vmatpush1.bf16.msra.mxu1 %v5342_v6  ;;  %v5425_v6 = vld [vmem:[#allocation19 + $0x64] ss:$16 sps:$4 sm:$0xff]  }
 0x561   :  { %1708 = vmatprep.subr.bf16.mxu1 %v5350_v7  ;;  %v5428_v7 = vld [vmem:[#allocation19 + $0x6c] ss:$16 sps:$4 sm:$0xff]  }
 0x564   :  { %1709 = vmatpush1.bf16.msra.mxu1 %v5348_v8  ;;  %v5423_v8 = vld [vmem:[#allocation19 + $0x60] ss:$16 sps:$4 sm:$0xff]  }
 0x565   :  { %1710 = vmatprep.subr.bf16.mxu1 %v5356_v9  ;;  %v5426_v9 = vld [vmem:[#allocation19 + $0x68] ss:$16 sps:$4 sm:$0xff]  }
 0x568   :  { %1711 = vmatpush1.bf16.msra.mxu1 %v5354_v10  ;;  %v5431_v10 = vld [vmem:[#allocation19 + $0x84] ss:$16 sps:$4 sm:$0xff]  }
 0x569   :  { %1712 = vmatprep.subr.bf16.mxu1 %v5362_v11  ;;  %v5434_v11 = vld [vmem:[#allocation19 + $0x8c] ss:$16 sps:$4 sm:$0xff]  }
 0x56c   :  { %1713 = vmatpush1.bf16.msra.mxu1 %v5360_v12  ;;  %v5429_v12 = vld [vmem:[#allocation19 + $0x80] ss:$16 sps:$4 sm:$0xff]  }
 0x56d   :  { %1714 = vmatprep.subr.bf16.mxu1 %v5368_v13  ;;  %v5432_v13 = vld [vmem:[#allocation19 + $0x88] ss:$16 sps:$4 sm:$0xff]  }
 0x570   :  { %1715 = vmatpush1.bf16.msra.mxu1 %v5366_v15  ;;  %v5437_v15 = vld [vmem:[#allocation19 + $0xa4] ss:$16 sps:$4 sm:$0xff]  }
 0x571   :  { %1716 = vmatprep.subr.bf16.mxu1 %v5374_v16  ;;  %v5440_v16 = vld [vmem:[#allocation19 + $0xac] ss:$16 sps:$4 sm:$0xff]  }
 0x574   :  { %1717 = vmatpush1.bf16.msra.mxu1 %v5372_v17  ;;  %v5435_v17 = vld [vmem:[#allocation19 + $0xa0] ss:$16 sps:$4 sm:$0xff]  }
 0x575   :  { %1718 = vmatprep.subr.bf16.mxu1 %v5380_v18  ;;  %v5438_v18 = vld [vmem:[#allocation19 + $0xa8] ss:$16 sps:$4 sm:$0xff]  }
 0x578   :  { %1719 = vmatpush1.bf16.msra.mxu1 %v5378_v19  ;;  %v5443_v19 = vld [vmem:[#allocation19 + $0xc4] ss:$16 sps:$4 sm:$0xff]  }
 0x579   :  { %1720 = vmatprep.subr.bf16.mxu1 %v5386_v20  ;;  %v5446_v20 = vld [vmem:[#allocation19 + $0xcc] ss:$16 sps:$4 sm:$0xff]  }
 0x57c   :  { %1721 = vmatpush1.bf16.msra.mxu1 %v5384_v21  ;;  %v5441_v21 = vld [vmem:[#allocation19 + $0xc0] ss:$16 sps:$4 sm:$0xff]  }
 0x57d   :  { %1722 = vmatprep.subr.bf16.mxu1 %v5392_v22  ;;  %v5444_v22 = vld [vmem:[#allocation19 + $0xc8] ss:$16 sps:$4 sm:$0xff]  }
 0x580   :  { %1723 = vmatpush1.bf16.msra.mxu1 %v5390_v23  ;;  %v5449_v23 = vld [vmem:[#allocation19 + $0xe4] ss:$16 sps:$4 sm:$0xff]  }
 0x581   :  { %1724 = vmatprep.subr.bf16.mxu1 %v5398_v25  ;;  %v5447_v25 = vld [vmem:[#allocation19 + $0xe0] ss:$16 sps:$4 sm:$0xff]  }
 0x584   :  { %1725 = vmatpush1.bf16.msra.mxu1 %v5396_v27  ;;  %v5455_v27 = vld [vmem:[#allocation19 + $0x104] ss:$16 sps:$4 sm:$0xff]  }
 0x585   :  { %1726 = vmatprep.subr.bf16.mxu1 %v5404_v29  ;;  %v5453_v29 = vld [vmem:[#allocation19 + $0x100] ss:$16 sps:$4 sm:$0xff]  }
 0x588   :  { %1727 = vmatpush1.bf16.msra.mxu1 %v5402_v32  ;;  %v5461_v32 = vld [vmem:[#allocation19 + $0x124] ss:$16 sps:$4 sm:$0xff]  }
 0x589   :  { %2184 = vmatprep.subr.bf16.mxu1 %v5410_v35  ;;  %v5459_v35 = vld [vmem:[#allocation19 + $0x120] ss:$16 sps:$4 sm:$0xff]  }
 0x61e   :  { %v1236_v49 = vpop.f32.mrb[8].mxu1 }
 0x61f   :  { %v5091_v50 = vadd.f32 %v6800_v42, %v1236_v49  ;;  %v1238_v51 = vpop.f32.mrb[9].mxu1  ;;  %v5476_v49 = vld [vmem:[#allocation19 + $0x16c] ss:$16 sps:$4 sm:$0xff]  }
 0x620   :  { %v5093_v52 = vadd.f32 %v6802_v45, %v1238_v51  ;;  %v1240_v53 = vpop.f32.mrb[10].mxu1  ;;  %v5474_v51 = vld [vmem:[#allocation19 + $0x168] ss:$16 sps:$4 sm:$0xff]  }
 0x621   :  { %v1245_v54 = vmax.f32 %v5091_v50, 0.0  ;;  %v1241_v55 = vpop.f32.mrb[11].mxu1  ;;  %v5471_v50 = vld [vmem:[#allocation19 + $0x160] ss:$16 sps:$4 sm:$0xff]   ;;  %v5482_v53 = vld [vmem:[#allocation19 + $0x18c] ss:$16 sps:$4 sm:$0xff]  }
 0x622   :  { %v1246_v56 = vmax.f32 %v5093_v52, 0.0  ;;  %v5479_v52 = vld [vmem:[#allocation19 + $0x184] ss:$16 sps:$4 sm:$0xff]   ;;  %v5480_v55 = vld [vmem:[#allocation19 + $0x188] ss:$16 sps:$4 sm:$0xff]  }
 0x623   :  { %v6806_v60 = vpack.c.bf16 %v1245_v54, %v1245_v54  ;;  %v5477_v54 = vld [vmem:[#allocation19 + $0x180] ss:$16 sps:$4 sm:$0xff]  }
 0x624   :  { %v1248_v57 = vpack.c.bf16 %v1246_v56, %v1246_v56  ;;  %v5485_v56 = vld [vmem:[#allocation19 + $0x1a4] ss:$16 sps:$4 sm:$0xff]  }
 0x626   :  { %1687 = vmatprep.mubr.bf16.mxu0 %v1248_v57  ;;  %1728 = vmatprep.mubr.bf16.mxu1 %v1248_v57 }
 0x627   :  { %1688 = vmatmul.mubr.bf16.vlgmr.msra.gmra.mrb[12].mxu0 %v6806_v60  ;;  %1729 = vmatmul.mubr.bf16.vlgmr.msra.gmra.mrb[12].mxu1 %v6806_v60 }
 0x628   :  { %2144 = vmatpush1.bf16.msra.mxu0 %v5405_v58  ;;  %2185 = vmatpush1.bf16.msra.mxu1 %v5408_v59  ;;  %v5483_v58 = vld [vmem:[#allocation19 + $0x1a0] ss:$16 sps:$4 sm:$0xff]   ;;  %v5486_v59 = vld [vmem:[#allocation19 + $0x1a8] ss:$16 sps:$4 sm:$0xff]  }
 0x629   :  { %2175 = vmatprep.mubr.bf16.mxu0 %v1248_v57  ;;  %2216 = vmatprep.mubr.bf16.mxu1 %v1248_v57  ;;  %v5488_v57 = vld [vmem:[#allocation19 + $0x1ac] ss:$16 sps:$4 sm:$0xff]  }
 0x62a   :  { %2145 = vmatprep.subr.bf16.mxu0 %v5413_v61  ;;  %2186 = vmatprep.subr.bf16.mxu1 %v5416_v62  ;;  %v5491_v61 = vld [vmem:[#allocation19 + $0x1c4] ss:$16 sps:$4 sm:$0xff]   ;;  %v5494_v62 = vld [vmem:[#allocation19 + $0x1cc] ss:$16 sps:$4 sm:$0xff]  }
 0x62c   :  { %2146 = vmatpush1.bf16.msra.mxu0 %v5411_v63  ;;  %2187 = vmatpush1.bf16.msra.mxu1 %v5414_v1  ;;  %v5489_v63 = vld [vmem:[#allocation19 + $0x1c0] ss:$16 sps:$4 sm:$0xff]   ;;  %v5492_v1 = vld [vmem:[#allocation19 + $0x1c8] ss:$16 sps:$4 sm:$0xff]  }
 0x62d   :  { %2147 = vmatprep.subr.bf16.mxu0 %v5419_v2  ;;  %2188 = vmatprep.subr.bf16.mxu1 %v5422_v3  ;;  %v5497_v2 = vld [vmem:[#allocation19 + $0x1e4] ss:$16 sps:$4 sm:$0xff]   ;;  %v5500_v3 = vld [vmem:[#allocation19 + $0x1ec] ss:$16 sps:$4 sm:$0xff]  }
 0x630   :  { %2148 = vmatpush1.bf16.msra.mxu0 %v5417_v4  ;;  %2189 = vmatpush1.bf16.msra.mxu1 %v5420_v5  ;;  %v5495_v4 = vld [vmem:[#allocation19 + $0x1e0] ss:$16 sps:$4 sm:$0xff]   ;;  %v5498_v5 = vld [vmem:[#allocation19 + $0x1e8] ss:$16 sps:$4 sm:$0xff]  }
 0x631   :  { %2149 = vmatprep.subr.bf16.mxu0 %v5425_v6  ;;  %2190 = vmatprep.subr.bf16.mxu1 %v5428_v7  ;;  %v5503_v6 = vld [vmem:[#allocation20 + $0x4] ss:$16 sps:$4 sm:$0xff]   ;;  %v5506_v7 = vld [vmem:[#allocation20 + $0xc] ss:$16 sps:$4 sm:$0xff]  }
 0x634   :  { %2150 = vmatpush1.bf16.msra.mxu0 %v5423_v8  ;;  %2191 = vmatpush1.bf16.msra.mxu1 %v5426_v9  ;;  %v5501_v8 = vld [vmem:[#allocation20] ss:$16 sps:$4 sm:$0xff]   ;;  %v5504_v9 = vld [vmem:[#allocation20 + $0x8] ss:$16 sps:$4 sm:$0xff]  }
 0x635   :  { %2151 = vmatprep.subr.bf16.mxu0 %v5431_v10  ;;  %2192 = vmatprep.subr.bf16.mxu1 %v5434_v11  ;;  %v5509_v10 = vld [vmem:[#allocation20 + $0x24] ss:$16 sps:$4 sm:$0xff]   ;;  %v5512_v11 = vld [vmem:[#allocation20 + $0x2c] ss:$16 sps:$4 sm:$0xff]  }
 0x638   :  { %2152 = vmatpush1.bf16.msra.mxu0 %v5429_v12  ;;  %2193 = vmatpush1.bf16.msra.mxu1 %v5432_v13  ;;  %v5507_v12 = vld [vmem:[#allocation20 + $0x20] ss:$16 sps:$4 sm:$0xff]   ;;  %v5510_v13 = vld [vmem:[#allocation20 + $0x28] ss:$16 sps:$4 sm:$0xff]  }
 0x639   :  { %2153 = vmatprep.subr.bf16.mxu0 %v5437_v15  ;;  %2194 = vmatprep.subr.bf16.mxu1 %v5440_v16  ;;  %v5515_v15 = vld [vmem:[#allocation20 + $0x44] ss:$16 sps:$4 sm:$0xff]   ;;  %v5518_v16 = vld [vmem:[#allocation20 + $0x4c] ss:$16 sps:$4 sm:$0xff]  }
 0x63c   :  { %2154 = vmatpush1.bf16.msra.mxu0 %v5435_v17  ;;  %2195 = vmatpush1.bf16.msra.mxu1 %v5438_v18  ;;  %v5513_v17 = vld [vmem:[#allocation20 + $0x40] ss:$16 sps:$4 sm:$0xff]   ;;  %v5516_v18 = vld [vmem:[#allocation20 + $0x48] ss:$16 sps:$4 sm:$0xff]  }
 0x63d   :  { %2155 = vmatprep.subr.bf16.mxu0 %v5443_v19  ;;  %2196 = vmatprep.subr.bf16.mxu1 %v5446_v20  ;;  %v5521_v19 = vld [vmem:[#allocation20 + $0x64] ss:$16 sps:$4 sm:$0xff]   ;;  %v5524_v20 = vld [vmem:[#allocation20 + $0x6c] ss:$16 sps:$4 sm:$0xff]  }
 0x640   :  { %2156 = vmatpush1.bf16.msra.mxu0 %v5441_v21  ;;  %2197 = vmatpush1.bf16.msra.mxu1 %v5444_v22  ;;  %v5519_v21 = vld [vmem:[#allocation20 + $0x60] ss:$16 sps:$4 sm:$0xff]   ;;  %v5527_v22 = vld [vmem:[#allocation20 + $0x84] ss:$16 sps:$4 sm:$0xff]  }
 0x641   :  { %2157 = vmatprep.subr.bf16.mxu0 %v5449_v23  ;;  %2198 = vmatprep.subr.bf16.mxu1 %v5452_v24  ;;  %v5530_v23 = vld [vmem:[#allocation20 + $0x8c] ss:$16 sps:$4 sm:$0xff]   ;;  %v5525_v24 = vld [vmem:[#allocation20 + $0x80] ss:$16 sps:$4 sm:$0xff]  }
 0x644   :  { %2158 = vmatpush1.bf16.msra.mxu0 %v5447_v25  ;;  %2199 = vmatpush1.bf16.msra.mxu1 %v5450_v26  ;;  %v5528_v25 = vld [vmem:[#allocation20 + $0x88] ss:$16 sps:$4 sm:$0xff]   ;;  %v5533_v26 = vld [vmem:[#allocation20 + $0xa4] ss:$16 sps:$4 sm:$0xff]  }
 0x645   :  { %2159 = vmatprep.subr.bf16.mxu0 %v5455_v27  ;;  %2200 = vmatprep.subr.bf16.mxu1 %v5458_v28  ;;  %v5536_v27 = vld [vmem:[#allocation20 + $0xac] ss:$16 sps:$4 sm:$0xff]   ;;  %v5531_v28 = vld [vmem:[#allocation20 + $0xa0] ss:$16 sps:$4 sm:$0xff]  }
 0x648   :  { %2160 = vmatpush1.bf16.msra.mxu0 %v5453_v29  ;;  %2201 = vmatpush1.bf16.msra.mxu1 %v5456_v31  ;;  %v5534_v29 = vld [vmem:[#allocation20 + $0xa8] ss:$16 sps:$4 sm:$0xff]   ;;  %v5539_v31 = vld [vmem:[#allocation20 + $0xc4] ss:$16 sps:$4 sm:$0xff]  }
 0x649   :  { %2161 = vmatprep.subr.bf16.mxu0 %v5461_v32  ;;  %2202 = vmatprep.subr.bf16.mxu1 %v5464_v33  ;;  %v5542_v32 = vld [vmem:[#allocation20 + $0xcc] ss:$16 sps:$4 sm:$0xff]   ;;  %v5537_v33 = vld [vmem:[#allocation20 + $0xc0] ss:$16 sps:$4 sm:$0xff]  }
 0x64c   :  { %2162 = vmatpush1.bf16.msra.mxu0 %v5459_v35  ;;  %2203 = vmatpush1.bf16.msra.mxu1 %v5462_v36  ;;  %v5540_v35 = vld [vmem:[#allocation20 + $0xc8] ss:$16 sps:$4 sm:$0xff]   ;;  %v5545_v36 = vld [vmem:[#allocation20 + $0xe4] ss:$16 sps:$4 sm:$0xff]  }
 0x64d   :  { %2163 = vmatprep.subr.bf16.mxu0 %v5467_v37  ;;  %2204 = vmatprep.subr.bf16.mxu1 %v5470_v38  ;;  %v5548_v37 = vld [vmem:[#allocation20 + $0xec] ss:$16 sps:$4 sm:$0xff]   ;;  %v5543_v38 = vld [vmem:[#allocation20 + $0xe0] ss:$16 sps:$4 sm:$0xff]  }
 0x650   :  { %2164 = vmatpush1.bf16.msra.mxu0 %v5465_v39  ;;  %2205 = vmatpush1.bf16.msra.mxu1 %v5468_v40  ;;  %v5546_v39 = vld [vmem:[#allocation20 + $0xe8] ss:$16 sps:$4 sm:$0xff]   ;;  %v5551_v40 = vld [vmem:[#allocation20 + $0x104] ss:$16 sps:$4 sm:$0xff]  }
 0x651   :  { %2165 = vmatprep.subr.bf16.mxu0 %v5473_v41  ;;  %2206 = vmatprep.subr.bf16.mxu1 %v5476_v49  ;;  %v5554_v41 = vld [vmem:[#allocation20 + $0x10c] ss:$16 sps:$4 sm:$0xff]   ;;  %v5549_v49 = vld [vmem:[#allocation20 + $0x100] ss:$16 sps:$4 sm:$0xff]  }
 0x654   :  { %2166 = vmatpush1.bf16.msra.mxu0 %v5471_v50  ;;  %2207 = vmatpush1.bf16.msra.mxu1 %v5474_v51  ;;  %v5552_v50 = vld [vmem:[#allocation20 + $0x108] ss:$16 sps:$4 sm:$0xff]   ;;  %v5557_v51 = vld [vmem:[#allocation20 + $0x124] ss:$16 sps:$4 sm:$0xff]  }
 0x655   :  { %2167 = vmatprep.subr.bf16.mxu0 %v5479_v52  ;;  %2208 = vmatprep.subr.bf16.mxu1 %v5482_v53  ;;  %v5560_v52 = vld [vmem:[#allocation20 + $0x12c] ss:$16 sps:$4 sm:$0xff]   ;;  %v5555_v53 = vld [vmem:[#allocation20 + $0x120] ss:$16 sps:$4 sm:$0xff]  }
 0x658   :  { %2168 = vmatpush1.bf16.msra.mxu0 %v5477_v54  ;;  %2209 = vmatpush1.bf16.msra.mxu1 %v5480_v55  ;;  %v5558_v54 = vld [vmem:[#allocation20 + $0x128] ss:$16 sps:$4 sm:$0xff]   ;;  %v5563_v55 = vld [vmem:[#allocation20 + $0x144] ss:$16 sps:$4 sm:$0xff]  }
 0x659   :  { %2169 = vmatprep.subr.bf16.mxu0 %v5485_v56  ;;  %2210 = vmatprep.subr.bf16.mxu1 %v5488_v57  ;;  %v5566_v56 = vld [vmem:[#allocation20 + $0x14c] ss:$16 sps:$4 sm:$0xff]   ;;  %v5561_v57 = vld [vmem:[#allocation20 + $0x140] ss:$16 sps:$4 sm:$0xff]  }
 0x65c   :  { %2170 = vmatpush1.bf16.msra.mxu0 %v5483_v58  ;;  %2211 = vmatpush1.bf16.msra.mxu1 %v5486_v59  ;;  %v5564_v58 = vld [vmem:[#allocation20 + $0x148] ss:$16 sps:$4 sm:$0xff]   ;;  %v5569_v59 = vld [vmem:[#allocation20 + $0x164] ss:$16 sps:$4 sm:$0xff]  }
 0x65d   :  { %2171 = vmatprep.subr.bf16.mxu0 %v5491_v61  ;;  %2212 = vmatprep.subr.bf16.mxu1 %v5494_v62  ;;  %v5572_v61 = vld [vmem:[#allocation20 + $0x16c] ss:$16 sps:$4 sm:$0xff]   ;;  %v5567_v62 = vld [vmem:[#allocation20 + $0x160] ss:$16 sps:$4 sm:$0xff]  }
 0x660   :  { %2172 = vmatpush1.bf16.msra.mxu0 %v5489_v63  ;;  %2213 = vmatpush1.bf16.msra.mxu1 %v5492_v1  ;;  %v5570_v63 = vld [vmem:[#allocation20 + $0x168] ss:$16 sps:$4 sm:$0xff]   ;;  %v5575_v1 = vld [vmem:[#allocation20 + $0x184] ss:$16 sps:$4 sm:$0xff]  }
 0x661   :  { %2173 = vmatprep.subr.bf16.mxu0 %v5497_v2  ;;  %2214 = vmatprep.subr.bf16.mxu1 %v5500_v3  ;;  %v5578_v2 = vld [vmem:[#allocation20 + $0x18c] ss:$16 sps:$4 sm:$0xff]   ;;  %v5573_v3 = vld [vmem:[#allocation20 + $0x180] ss:$16 sps:$4 sm:$0xff]  }
 0x664   :  { %2174 = vmatpush1.bf16.msra.mxu0 %v5495_v4  ;;  %2215 = vmatpush1.bf16.msra.mxu1 %v5498_v5  ;;  %v5576_v4 = vld [vmem:[#allocation20 + $0x188] ss:$16 sps:$4 sm:$0xff]   ;;  %v5581_v5 = vld [vmem:[#allocation20 + $0x1a4] ss:$16 sps:$4 sm:$0xff]  }
 0x665   :  { %3023 = vmatprep.subr.bf16.mxu0 %v5503_v6  ;;  %3105 = vmatprep.subr.bf16.mxu1 %v5506_v7  ;;  %v5584_v6 = vld [vmem:[#allocation20 + $0x1ac] ss:$16 sps:$4 sm:$0xff]   ;;  %v5579_v7 = vld [vmem:[#allocation20 + $0x1a0] ss:$16 sps:$4 sm:$0xff]  }
 0x667   :  { %2176 = vmatmul.mubr.bf16.vlgmr.msra.gmra.mrb[16].mxu0 %v6806_v60  ;;  %2217 = vmatmul.mubr.bf16.vlgmr.msra.gmra.mrb[16].mxu1 %v6806_v60  ;;  %v5522_v60 = vld [vmem:[#allocation20 + $0x68] ss:$16 sps:$4 sm:$0xff]  }
 0x668   :  { %3024 = vmatpush1.bf16.msra.mxu0 %v5501_v8  ;;  %3106 = vmatpush1.bf16.msra.mxu1 %v5504_v9  ;;  %v5582_v8 = vld [vmem:[#allocation20 + $0x1a8] ss:$16 sps:$4 sm:$0xff]   ;;  %v5587_v9 = vld [vmem:[#allocation20 + $0x1c4] ss:$16 sps:$4 sm:$0xff]  }
 0x669   :  { %3025 = vmatprep.subr.bf16.mxu0 %v5509_v10  ;;  %3107 = vmatprep.subr.bf16.mxu1 %v5512_v11  ;;  %v5590_v10 = vld [vmem:[#allocation20 + $0x1cc] ss:$16 sps:$4 sm:$0xff]   ;;  %v5585_v11 = vld [vmem:[#allocation20 + $0x1c0] ss:$16 sps:$4 sm:$0xff]  }
 0x66c   :  { %3026 = vmatpush1.bf16.msra.mxu0 %v5507_v12  ;;  %3108 = vmatpush1.bf16.msra.mxu1 %v5510_v13  ;;  %v5588_v12 = vld [vmem:[#allocation20 + $0x1c8] ss:$16 sps:$4 sm:$0xff]   ;;  %v5593_v13 = vld [vmem:[#allocation20 + $0x1e4] ss:$16 sps:$4 sm:$0xff]  }
 0x66d   :  { %3027 = vmatprep.subr.bf16.mxu0 %v5515_v15  ;;  %3109 = vmatprep.subr.bf16.mxu1 %v5518_v16  ;;  %v5596_v15 = vld [vmem:[#allocation20 + $0x1ec] ss:$16 sps:$4 sm:$0xff]   ;;  %v5591_v16 = vld [vmem:[#allocation20 + $0x1e0] ss:$16 sps:$4 sm:$0xff]  }
 0x670   :  { %3028 = vmatpush1.bf16.msra.mxu0 %v5513_v17  ;;  %3110 = vmatpush1.bf16.msra.mxu1 %v5516_v18  ;;  %v5594_v17 = vld [vmem:[#allocation20 + $0x1e8] ss:$16 sps:$4 sm:$0xff]   ;;  %v5599_v18 = vld [vmem:[#allocation20 + $0x204] ss:$16 sps:$4 sm:$0xff]  }
 0x671   :  { %3029 = vmatprep.subr.bf16.mxu0 %v5521_v19  ;;  %3111 = vmatprep.subr.bf16.mxu1 %v5524_v20  ;;  %v5602_v19 = vld [vmem:[#allocation20 + $0x20c] ss:$16 sps:$4 sm:$0xff]   ;;  %v6812_v20 = vld [vmem:[#allocation2 + $0x11] sm:$0xf] }
 0x674   :  { %3030 = vmatpush1.bf16.msra.mxu0 %v5519_v21  ;;  %3112 = vmatpush1.bf16.msra.mxu1 %v5522_v60  ;;  %v6815_v21 = vsub.s32 3, %v6780_v43  ;;  %v6819_v60 = vrot.slane %v6812_v20, %v6783_v44 }
 0x675   :  { %3031 = vmatprep.subr.bf16.mxu0 %v5527_v22  ;;  %3113 = vmatprep.subr.bf16.mxu1 %v5530_v23  ;;  %v6823_v22 = vrot.slane %v6812_v20, %v6786_v46 }
 0x676   :  { %v6827_v23 = vrot.slane %v6812_v20, %v6815_v21 }
 0x678   :  { %3032 = vmatpush1.bf16.msra.mxu0 %v5525_v24  ;;  %3114 = vmatpush1.bf16.msra.mxu1 %v5528_v25 }
 0x679   :  { %3033 = vmatprep.subr.bf16.mxu0 %v5533_v26  ;;  %3115 = vmatprep.subr.bf16.mxu1 %v5536_v27 }
 0x67c   :  { %3034 = vmatpush1.bf16.msra.mxu0 %v5531_v28  ;;  %3116 = vmatpush1.bf16.msra.mxu1 %v5534_v29 }
 0x67d   :  { %3035 = vmatprep.subr.bf16.mxu0 %v5539_v31  ;;  %3117 = vmatprep.subr.bf16.mxu1 %v5542_v32 }
 0x680   :  { %3036 = vmatpush1.bf16.msra.mxu0 %v5537_v33  ;;  %3118 = vmatpush1.bf16.msra.mxu1 %v5540_v35 }
 0x681   :  { %3037 = vmatprep.subr.bf16.mxu0 %v5545_v36  ;;  %3119 = vmatprep.subr.bf16.mxu1 %v5548_v37 }
 0x684   :  { %3038 = vmatpush1.bf16.msra.mxu0 %v5543_v38  ;;  %3120 = vmatpush1.bf16.msra.mxu1 %v5546_v39 }
 0x685   :  { %3039 = vmatprep.subr.bf16.mxu0 %v5551_v40  ;;  %3121 = vmatprep.subr.bf16.mxu1 %v5554_v41  ;;  %v5597_v41 = vld [vmem:[#allocation20 + $0x200] ss:$16 sps:$4 sm:$0xff]  }
 0x688   :  { %3040 = vmatpush1.bf16.msra.mxu0 %v5549_v49  ;;  %3122 = vmatpush1.bf16.msra.mxu1 %v5552_v50  ;;  %v5600_v49 = vld [vmem:[#allocation20 + $0x208] ss:$16 sps:$4 sm:$0xff]  }
 0x689   :  { %3041 = vmatprep.subr.bf16.mxu0 %v5557_v51  ;;  %3123 = vmatprep.subr.bf16.mxu1 %v5560_v52  ;;  %v5605_v51 = vld [vmem:[#allocation20 + $0x224] ss:$16 sps:$4 sm:$0xff]   ;;  %v5608_v52 = vld [vmem:[#allocation20 + $0x22c] ss:$16 sps:$4 sm:$0xff]  }
 0x68c   :  { %3042 = vmatpush1.bf16.msra.mxu0 %v5555_v53  ;;  %3124 = vmatpush1.bf16.msra.mxu1 %v5558_v54  ;;  %v5603_v54 = vld [vmem:[#allocation20 + $0x220] ss:$16 sps:$4 sm:$0xff]  }
 0x68d   :  { %3043 = vmatprep.subr.bf16.mxu0 %v5563_v55  ;;  %3125 = vmatprep.subr.bf16.mxu1 %v5566_v56  ;;  %v5606_v55 = vld [vmem:[#allocation20 + $0x228] ss:$16 sps:$4 sm:$0xff]   ;;  %v5611_v56 = vld [vmem:[#allocation20 + $0x244] ss:$16 sps:$4 sm:$0xff]  }
 0x690   :  { %3044 = vmatpush1.bf16.msra.mxu0 %v5561_v57  ;;  %3126 = vmatpush1.bf16.msra.mxu1 %v5564_v58  ;;  %v5614_v57 = vld [vmem:[#allocation20 + $0x24c] ss:$16 sps:$4 sm:$0xff]   ;;  %v5609_v58 = vld [vmem:[#allocation20 + $0x240] ss:$16 sps:$4 sm:$0xff]  }
 0x691   :  { %3045 = vmatprep.subr.bf16.mxu0 %v5569_v59  ;;  %3127 = vmatprep.subr.bf16.mxu1 %v5572_v61  ;;  %v5612_v59 = vld [vmem:[#allocation20 + $0x248] ss:$16 sps:$4 sm:$0xff]   ;;  %v5617_v61 = vld [vmem:[#allocation20 + $0x264] ss:$16 sps:$4 sm:$0xff]  }
 0x694   :  { %3046 = vmatpush1.bf16.msra.mxu0 %v5567_v62  ;;  %3128 = vmatpush1.bf16.msra.mxu1 %v5570_v63  ;;  %v5620_v62 = vld [vmem:[#allocation20 + $0x26c] ss:$16 sps:$4 sm:$0xff]   ;;  %v5615_v63 = vld [vmem:[#allocation20 + $0x260] ss:$16 sps:$4 sm:$0xff]  }
 0x695   :  { %3047 = vmatprep.subr.bf16.mxu0 %v5575_v1  ;;  %3129 = vmatprep.subr.bf16.mxu1 %v5578_v2  ;;  %v5618_v1 = vld [vmem:[#allocation20 + $0x268] ss:$16 sps:$4 sm:$0xff]   ;;  %v5623_v2 = vld [vmem:[#allocation20 + $0x284] ss:$16 sps:$4 sm:$0xff]  }
 0x698   :  { %3048 = vmatpush1.bf16.msra.mxu0 %v5573_v3  ;;  %3130 = vmatpush1.bf16.msra.mxu1 %v5576_v4  ;;  %v5626_v3 = vld [vmem:[#allocation20 + $0x28c] ss:$16 sps:$4 sm:$0xff]   ;;  %v5621_v4 = vld [vmem:[#allocation20 + $0x280] ss:$16 sps:$4 sm:$0xff]  }
 0x699   :  { %3049 = vmatprep.subr.bf16.mxu0 %v5581_v5  ;;  %3131 = vmatprep.subr.bf16.mxu1 %v5584_v6  ;;  %v5624_v5 = vld [vmem:[#allocation20 + $0x288] ss:$16 sps:$4 sm:$0xff]   ;;  %v5629_v6 = vld [vmem:[#allocation20 + $0x2a4] ss:$16 sps:$4 sm:$0xff]  }
 0x69c   :  { %3050 = vmatpush1.bf16.msra.mxu0 %v5579_v7  ;;  %3132 = vmatpush1.bf16.msra.mxu1 %v5582_v8  ;;  %v5632_v7 = vld [vmem:[#allocation20 + $0x2ac] ss:$16 sps:$4 sm:$0xff]   ;;  %v5627_v8 = vld [vmem:[#allocation20 + $0x2a0] ss:$16 sps:$4 sm:$0xff]  }
 0x69d   :  { %3051 = vmatprep.subr.bf16.mxu0 %v5587_v9  ;;  %3133 = vmatprep.subr.bf16.mxu1 %v5590_v10  ;;  %v5630_v9 = vld [vmem:[#allocation20 + $0x2a8] ss:$16 sps:$4 sm:$0xff]   ;;  %v5635_v10 = vld [vmem:[#allocation20 + $0x2c4] ss:$16 sps:$4 sm:$0xff]  }
 0x6a0   :  { %3052 = vmatpush1.bf16.msra.mxu0 %v5585_v11  ;;  %3134 = vmatpush1.bf16.msra.mxu1 %v5588_v12  ;;  %v5638_v11 = vld [vmem:[#allocation20 + $0x2cc] ss:$16 sps:$4 sm:$0xff]   ;;  %v5633_v12 = vld [vmem:[#allocation20 + $0x2c0] ss:$16 sps:$4 sm:$0xff]  }
 0x6a1   :  { %3053 = vmatprep.subr.bf16.mxu0 %v5593_v13  ;;  %3135 = vmatprep.subr.bf16.mxu1 %v5596_v15  ;;  %v5636_v13 = vld [vmem:[#allocation20 + $0x2c8] ss:$16 sps:$4 sm:$0xff]   ;;  %v5641_v15 = vld [vmem:[#allocation20 + $0x2e4] ss:$16 sps:$4 sm:$0xff]  }
 0x6a4   :  { %3054 = vmatpush1.bf16.msra.mxu0 %v5591_v16  ;;  %3136 = vmatpush1.bf16.msra.mxu1 %v5594_v17  ;;  %v5644_v16 = vld [vmem:[#allocation20 + $0x2ec] ss:$16 sps:$4 sm:$0xff]   ;;  %v5639_v17 = vld [vmem:[#allocation20 + $0x2e0] ss:$16 sps:$4 sm:$0xff]  }
 0x6a5   :  { %3064 = vmatprep.subr.bf16.mxu0 %v5599_v18  ;;  %3146 = vmatprep.subr.bf16.mxu1 %v5602_v19  ;;  %v5642_v18 = vld [vmem:[#allocation20 + $0x2e8] ss:$16 sps:$4 sm:$0xff]   ;;  %v5647_v19 = vld [vmem:[#allocation20 + $0x304] ss:$16 sps:$4 sm:$0xff]  }
 0x73a   :  { %v2177_v24 = vpop.f32.mrb[16].mxu0  ;;  %v6829_v25 = vpop.f32.mrb[16].mxu1 }
 0x73b   :  { %v2178_v26 = vadd.f32 %v2177_v24, %v6819_v60  ;;  %v2179_v27 = vpop.f32.mrb[17].mxu0  ;;  %v2220_v28 = vpop.f32.mrb[17].mxu1  ;;  %v5650_v24 = vld [vmem:[#allocation20 + $0x30c] ss:$16 sps:$4 sm:$0xff]  }
 0x73c   :  { %v2180_v29 = vadd.f32 %v2179_v27, %v6823_v22  ;;  %v2221_v31 = vadd.f32 %v2220_v28, %v6827_v23  ;;  %v2181_v32 = vpop.f32.mrb[18].mxu0  ;;  %v2222_v33 = vpop.f32.mrb[18].mxu1  ;;  %v5648_v27 = vld [vmem:[#allocation20 + $0x308] ss:$16 sps:$4 sm:$0xff]   ;;  %v6834_v28 = vld [vmem:[#allocation20 + $0x324] ss:$16 sps:$4 sm:$0xff]  }
 0x73d   :  { %v2225_v35 = vmax.f32 %v2178_v26, 0.0  ;;  %v2182_v36 = vpop.f32.mrb[19].mxu0  ;;  %v2223_v37 = vpop.f32.mrb[19].mxu1  ;;  %v5645_v26 = vld [vmem:[#allocation20 + $0x300] ss:$16 sps:$4 sm:$0xff]  }
 0x73e   :  { %v2226_v38 = vmax.f32 %v2180_v29, 0.0  ;;  %v2228_v39 = vmax.f32 %v2221_v31, 0.0  ;;  %v6836_v29 = vld [vmem:[#allocation20 + $0x32c] ss:$16 sps:$4 sm:$0xff]   ;;  %v6838_v31 = vld [vmem:[#allocation20 + $0x320] ss:$16 sps:$4 sm:$0xff]  }
 0x73f   :  { %v2229_v50 = vpack.c.bf16 %v2225_v35, %v2225_v35  ;;  %v6840_v32 = vld [vmem:[#allocation20 + $0x328] ss:$16 sps:$4 sm:$0xff]   ;;  %v6844_v33 = vld [vmem:[#allocation20 + $0x344] ss:$16 sps:$4 sm:$0xff]   ;;  %v6846_v35 = vld [vmem:[#allocation20 + $0x34c] ss:$16 sps:$4 sm:$0xff]  }
 0x740   :  { %v2230_v40 = vpack.c.bf16 %v2226_v38, %v2226_v38  ;;  %v2232_v53 = vpack.c.bf16 %v2228_v39, %v2228_v39  ;;  %v6850_v36 = vld [vmem:[#allocation20 + $0x340] ss:$16 sps:$4 sm:$0xff]   ;;  %v6852_v37 = vld [vmem:[#allocation20 + $0x348] ss:$16 sps:$4 sm:$0xff]   ;;  %v6856_v38 = vld [vmem:[#allocation20 + $0x364] ss:$16 sps:$4 sm:$0xff]  }
 0x741   :  { %v6858_v39 = vld [vmem:[#allocation20 + $0x36c] ss:$16 sps:$4 sm:$0xff]  }
 0x742   :  { %3055 = vmatprep.mubr.bf16.mxu0 %v2230_v40  ;;  %3137 = vmatprep.mubr.bf16.mxu1 %v2230_v40  ;;  %v6862_v40 = vld [vmem:[#allocation20 + $0x360] ss:$16 sps:$4 sm:$0xff]  }
 0x743   :  { %3056 = vmatmul.mubr.bf16.vlgmr.msra.gmra.mrb[12].mxu0 %v2229_v50  ;;  %3138 = vmatmul.mubr.bf16.vlgmr.msra.gmra.mrb[12].mxu1 %v2229_v50  ;;  %v6870_v50 = vld [vmem:[#allocation20 + $0x38c] ss:$16 sps:$4 sm:$0xff]  }
 0x744   :  { %3065 = vmatpush1.bf16.msra.mxu0 %v5597_v41  ;;  %3147 = vmatpush1.bf16.msra.mxu1 %v5600_v49  ;;  %v6864_v41 = vld [vmem:[#allocation20 + $0x368] ss:$16 sps:$4 sm:$0xff]   ;;  %v6868_v49 = vld [vmem:[#allocation20 + $0x384] ss:$16 sps:$4 sm:$0xff]  }
 0x745   :  { %3096 = vmatprep.mubr.bf16.mxu0 %v2232_v53  ;;  %3178 = vmatprep.mubr.bf16.mxu1 %v2232_v53  ;;  %v6879_v53 = vsub.s32 2, %v6780_v43 }
 0x746   :  { %3066 = vmatprep.subr.bf16.mxu0 %v5605_v51  ;;  %3148 = vmatprep.subr.bf16.mxu1 %v5608_v52  ;;  %v6874_v51 = vld [vmem:[#allocation20 + $0x380] ss:$16 sps:$4 sm:$0xff]   ;;  %v6876_v52 = vld [vmem:[#allocation20 + $0x388] ss:$16 sps:$4 sm:$0xff]  }
 0x747   :  { %v6895_v43 = vrot.slane %v6812_v20, %v6879_v53 }
 0x748   :  { %3067 = vmatpush1.bf16.msra.mxu0 %v5603_v54  ;;  %3149 = vmatpush1.bf16.msra.mxu1 %v5606_v55  ;;  %v6883_v54 = vld [vmem:[#allocation20 + $0x3a4] ss:$16 sps:$4 sm:$0xff]   ;;  %v6885_v55 = vld [vmem:[#allocation20 + $0x3ac] ss:$16 sps:$4 sm:$0xff]  }
 0x749   :  { %3068 = vmatprep.subr.bf16.mxu0 %v5611_v56  ;;  %3150 = vmatprep.subr.bf16.mxu1 %v5614_v57  ;;  %v6889_v56 = vld [vmem:[#allocation20 + $0x3a0] ss:$16 sps:$4 sm:$0xff]   ;;  %v6891_v57 = vld [vmem:[#allocation20 + $0x3a8] ss:$16 sps:$4 sm:$0xff]   ;;  %v2219_v20 = vadd.f32 %v6829_v25, %v6895_v43 }
 0x74c   :  { %3069 = vmatpush1.bf16.msra.mxu0 %v5609_v58  ;;  %3151 = vmatpush1.bf16.msra.mxu1 %v5612_v59  ;;  %v6899_v58 = vld [vmem:[#allocation20 + $0x3c4] ss:$16 sps:$4 sm:$0xff]   ;;  %v6901_v59 = vld [vmem:[#allocation20 + $0x3cc] ss:$16 sps:$4 sm:$0xff]  }
 0x74d   :  { %3070 = vmatprep.subr.bf16.mxu0 %v5617_v61  ;;  %3152 = vmatprep.subr.bf16.mxu1 %v5620_v62  ;;  %v6905_v61 = vld [vmem:[#allocation20 + $0x3c0] ss:$16 sps:$4 sm:$0xff]   ;;  %v6907_v62 = vld [vmem:[#allocation20 + $0x3c8] ss:$16 sps:$4 sm:$0xff]  }
 0x750   :  { %3071 = vmatpush1.bf16.msra.mxu0 %v5615_v63  ;;  %3153 = vmatpush1.bf16.msra.mxu1 %v5618_v1  ;;  %v6913_v63 = vld [vmem:[#allocation20 + $0x3e4] ss:$16 sps:$4 sm:$0xff]   ;;  %v6915_v1 = vld [vmem:[#allocation20 + $0x3ec] ss:$16 sps:$4 sm:$0xff]  }
 0x751   :  { %3072 = vmatprep.subr.bf16.mxu0 %v5623_v2  ;;  %3154 = vmatprep.subr.bf16.mxu1 %v5626_v3  ;;  %v6919_v2 = vld [vmem:[#allocation20 + $0x3e0] ss:$16 sps:$4 sm:$0xff]   ;;  %v6921_v3 = vld [vmem:[#allocation20 + $0x3e8] ss:$16 sps:$4 sm:$0xff]  }
 0x754   :  { %3073 = vmatpush1.bf16.msra.mxu0 %v5621_v4  ;;  %3155 = vmatpush1.bf16.msra.mxu1 %v5624_v5  ;;  %v2227_v4 = vmax.f32 %v2219_v20, 0.0  ;;  %v5733_v5 = vld [vmem:[#allocation5] sm:$0xff]  }
 0x755   :  { %3074 = vmatprep.subr.bf16.mxu0 %v5629_v6  ;;  %3156 = vmatprep.subr.bf16.mxu1 %v5632_v7  ;;  %v5734_v6 = vld [vmem:[#allocation10] sm:$0xff]   ;;  %v5735_v7 = vld [vmem:[#allocation5 + $0x8] sm:$0xff]  }
 0x756   :  { %v2231_v25 = vpack.c.bf16 %v2227_v4, %v2227_v4 }
 0x758   :  { %3075 = vmatpush1.bf16.msra.mxu0 %v5627_v8  ;;  %3157 = vmatpush1.bf16.msra.mxu1 %v5630_v9  ;;  %v5736_v8 = vld [vmem:[#allocation10 + $0x8] sm:$0xff]   ;;  %v6938_v9 = vmax.f32 %v6743_v14, 0.0  ;;  %v5742_v14 = vld [vmem:[#allocation7] sm:$0xff]  }
 0x759   :  { %3076 = vmatprep.subr.bf16.mxu0 %v5635_v10  ;;  %3158 = vmatprep.subr.bf16.mxu1 %v5638_v11  ;;  %v5737_v10 = vld [vmem:[#allocation5 + $0x10] sm:$0xff]  }
 0x75a   :  { %v5738_v11 = vld [vmem:[#allocation10 + $0x10] sm:$0xff]  }
 0x75c   :  { %3077 = vmatpush1.bf16.msra.mxu0 %v5633_v12  ;;  %3159 = vmatpush1.bf16.msra.mxu1 %v5636_v13  ;;  %v3200_v12 = vpack.c.bf16 %v6938_v9, %v6938_v9  ;;  %v5739_v13 = vld [vmem:[#allocation5 + $0x18] sm:$0xff]  }
 0x75d   :  { %3078 = vmatprep.subr.bf16.mxu0 %v5641_v15  ;;  %3160 = vmatprep.subr.bf16.mxu1 %v5644_v16  ;;  %v5740_v15 = vld [vmem:[#allocation10 + $0x18] sm:$0xff]   ;;  %v5741_v16 = vld [vmem:[#allocation13 + $0x4] ss:$8 sps:$4 sm:$0xff]  }
 0x760   :  { %3079 = vmatpush1.bf16.msra.mxu0 %v5639_v17  ;;  %3161 = vmatpush1.bf16.msra.mxu1 %v5642_v18  ;;  %v5743_v17 = vld [vmem:[#allocation7 + $0x8] sm:$0xff]   ;;  %v5744_v18 = vld [vmem:[#allocation7 + $0x10] sm:$0xff]  }
 0x761   :  { %3080 = vmatprep.subr.bf16.mxu0 %v5647_v19  ;;  %3162 = vmatprep.subr.bf16.mxu1 %v5650_v24  ;;  %v5745_v19 = vld [vmem:[#allocation7 + $0x18] sm:$0xff]  }
 0x764   :  { %3081 = vmatpush1.bf16.msra.mxu0 %v5645_v26  ;;  %3163 = vmatpush1.bf16.msra.mxu1 %v5648_v27 }
 0x765   :  { %3082 = vmatprep.subr.bf16.mxu0 %v6834_v28  ;;  %3164 = vmatprep.subr.bf16.mxu1 %v6836_v29 }
 0x768   :  { %3083 = vmatpush1.bf16.msra.mxu0 %v6838_v31  ;;  %3165 = vmatpush1.bf16.msra.mxu1 %v6840_v32 }
 0x769   :  { %3084 = vmatprep.subr.bf16.mxu0 %v6844_v33  ;;  %3166 = vmatprep.subr.bf16.mxu1 %v6846_v35 }
 0x76c   :  { %3085 = vmatpush1.bf16.msra.mxu0 %v6850_v36  ;;  %3167 = vmatpush1.bf16.msra.mxu1 %v6852_v37 }
 0x76d   :  { %3086 = vmatprep.subr.bf16.mxu0 %v6856_v38  ;;  %3168 = vmatprep.subr.bf16.mxu1 %v6858_v39 }
 0x770   :  { %3087 = vmatpush1.bf16.msra.mxu0 %v6862_v40  ;;  %3169 = vmatpush1.bf16.msra.mxu1 %v6864_v41 }
 0x771   :  { %3088 = vmatprep.subr.bf16.mxu0 %v6868_v49  ;;  %3170 = vmatprep.subr.bf16.mxu1 %v6870_v50 }
 0x774   :  { %3089 = vmatpush1.bf16.msra.mxu0 %v6874_v51  ;;  %3171 = vmatpush1.bf16.msra.mxu1 %v6876_v52 }
 0x775   :  { %3090 = vmatprep.subr.bf16.mxu0 %v6883_v54  ;;  %3172 = vmatprep.subr.bf16.mxu1 %v6885_v55 }
 0x778   :  { %3091 = vmatpush1.bf16.msra.mxu0 %v6889_v56  ;;  %3173 = vmatpush1.bf16.msra.mxu1 %v6891_v57 }
 0x779   :  { %3092 = vmatprep.subr.bf16.mxu0 %v6899_v58  ;;  %3174 = vmatprep.subr.bf16.mxu1 %v6901_v59 }
 0x77c   :  { %3093 = vmatpush1.bf16.msra.mxu0 %v6905_v61  ;;  %3175 = vmatpush1.bf16.msra.mxu1 %v6907_v62 }
 0x77d   :  { %3094 = vmatprep.subr.bf16.mxu0 %v6913_v63  ;;  %3176 = vmatprep.subr.bf16.mxu1 %v6915_v1 }
 0x780   :  { %3095 = vmatpush1.bf16.msra.mxu0 %v6919_v2  ;;  %3177 = vmatpush1.bf16.msra.mxu1 %v6921_v3 }
 0x781   :  { %5000 = vmatprep.subr.bf16.mxu0 %v6441_v0  ;;  %5036 = vmatprep.subr.bf16.mxu1 %v6441_v0 }
 0x783   :  { %3097 = vmatmul.mubr.bf16.vlgmr.msra.gmra.mrb[12].mxu0 %v2231_v25  ;;  %3179 = vmatmul.mubr.bf16.vlgmr.msra.gmra.mrb[12].mxu1 %v2231_v25 }
 0x784   :  { %5001 = vmatpush3.bf16.msra.mxu0 %v5733_v5  ;;  %5008 = vmatprep.mubr.msk.bf16.mxu0 %vm6442_vm0, %v6441_v0 }
 0x785   :  { %5002 = vmatprep.subr.bf16.mxu0 %v6441_v0  ;;  %5037 = vmatpush3.bf16.msra.mxu1 %v5734_v6 }
 0x786   :  { %5038 = vmatprep.subr.bf16.mxu1 %v6441_v0  ;;  %5044 = vmatprep.mubr.msk.bf16.mxu1 %vm6442_vm0, %v6441_v0 }
 0x788   :  { %5003 = vmatpush3.bf16.msra.mxu0 %v5735_v7 }
 0x789   :  { %5004 = vmatprep.subr.bf16.mxu0 %v6441_v0  ;;  %5039 = vmatpush3.bf16.msra.mxu1 %v5736_v8  ;;  %v5746_v8 = vld [vmem:[#allocation2 + $0x2] ss:$0 sm:$0xff] }
 0x78a   :  { %5040 = vmatprep.subr.bf16.mxu1 %v6441_v0 }
 0x78c   :  { %5005 = vmatpush3.bf16.msra.mxu0 %v5737_v10 }
 0x78d   :  { %5006 = vmatprep.subr.bf16.mxu0 %v6441_v0  ;;  %5041 = vmatpush3.bf16.msra.mxu1 %v5738_v11 }
 0x78e   :  { %5042 = vmatprep.subr.bf16.mxu1 %v6441_v0 }
 0x790   :  { %5007 = vmatpush3.bf16.msra.mxu0 %v5739_v13 }
 0x791   :  { %5012 = vmatprep.subr.bf16.mxu0 %v6441_v0  ;;  %5043 = vmatpush3.bf16.msra.mxu1 %v5740_v15 }
 0x792   :  { %3420 = vmatprep.subr.bf16.mxu1 %v5741_v16 }
 0x793   :  { %5009 = vmatmul.mubr.msk.bf16.vlgmr.msra.gmra.mrb[20].mxu0 %vm288_vm1, %v3200_v12 }
 0x794   :  { %5013 = vmatpush3.bf16.msra.mxu0 %v5742_v14  ;;  %5020 = vmatprep.mubr.msk.bf16.mxu0 %vm6442_vm0, %v6441_v0  ;;  %v5747_v14 = vld [vmem:[#allocation8] sm:$0xff]  }
 0x795   :  { %5014 = vmatprep.subr.bf16.mxu0 %v6441_v0 }
 0x798   :  { %5015 = vmatpush3.bf16.msra.mxu0 %v5743_v17  ;;  %v5748_v17 = vld [vmem:[#allocation8 + $0x8] sm:$0xff]  }
 0x799   :  { %5016 = vmatprep.subr.bf16.mxu0 %v6441_v0 }
 0x79c   :  { %5017 = vmatpush3.bf16.msra.mxu0 %v5744_v18  ;;  %v5749_v18 = vld [vmem:[#allocation8 + $0x10] sm:$0xff]  }
 0x79d   :  { %5018 = vmatprep.subr.bf16.mxu0 %v6441_v0 }
 0x7a0   :  { %5019 = vmatpush3.bf16.msra.mxu0 %v5745_v19  ;;  %v5750_v19 = vld [vmem:[#allocation8 + $0x18] sm:$0xff]  }
 0x7a1   :  { %5024 = vmatprep.subr.bf16.mxu0 %v6441_v0 }
 0x856   :  { %v6952_v24 = vpop.f32.mrb[12].mxu0  ;;  %v6954_v26 = vpop.f32.mrb[12].mxu1 }
 0x857   :  { %v6956_v27 = vpop.f32.mrb[13].mxu0  ;;  %v6958_v20 = vpop.f32.mrb[13].mxu1 }
 0x858   :  { %v3102_v4 = vpop.f32.mrb[14].mxu0  ;;  %v3184_v25 = vpop.f32.mrb[14].mxu1 }
 0x859   :  { %v3103_v5 = vpop.f32.mrb[15].mxu0  ;;  %v3185_v6 = vpop.f32.mrb[15].mxu1  ;;  %v5751_v25 = vld [vmem:[#allocation2 + $0x3] ss:$0 sm:$0xff] }
 0x866   :  { %v3238_v7 = vpop.f32.mrb[20].mxu0 }
 0x867   :  { %v3239_v10 = vadd.f32 %v5746_v8, %v3238_v7  ;;  %v5010_v11 = vpop.f32.mrb[21].mxu0 }
 0x868   :  { %v3241_v12 = vpop.f32.mrb[22].mxu0 }
 0x869   :  { %v3244_v13 = vmax.f32 %v3239_v10, 0.0  ;;  %v5011_v15 = vpop.f32.mrb[23].mxu0 }
 0x86a   :  { %v5753_v15 = vld [vmem:[#allocation13] ss:$8 sps:$4 sm:$0xff]  }
 0x86b   :  { %v3245_v16 = vpack.c.bf16 %v3244_v13, %v3244_v13  ;;  %v5752_v13 = vld [vmem:[#allocation11] sm:$0xff]  }
 0x86d   :  { %5021 = vmatmul.mubr.msk.bf16.vlgmr.msra.gmra.mrb[24].mxu0 %vm288_vm1, %v3245_v16  ;;  %v5754_v16 = vld [vmem:[#allocation13 + $0x14] ss:$8 sps:$4 sm:$0xff]  }
 0x86e   :  { %5025 = vmatpush3.bf16.msra.mxu0 %v5747_v14  ;;  %5032 = vmatprep.mubr.msk.bf16.mxu0 %vm6442_vm0, %v6441_v0  ;;  %v5756_v14 = vld [vmem:[#allocation13 + $0x10] ss:$8 sps:$4 sm:$0xff]  }
 0x86f   :  { %5026 = vmatprep.subr.bf16.mxu0 %v6441_v0 }
 0x872   :  { %5027 = vmatpush3.bf16.msra.mxu0 %v5748_v17  ;;  %v5757_v17 = vld [vmem:[#allocation13 + $0x24] ss:$8 sps:$4 sm:$0xff]  }
 0x873   :  { %5028 = vmatprep.subr.bf16.mxu0 %v6441_v0 }
 0x876   :  { %5029 = vmatpush3.bf16.msra.mxu0 %v5749_v18  ;;  %v5758_v18 = vld [vmem:[#allocation11 + $0x10] sm:$0xff]  }
 0x877   :  { %5030 = vmatprep.subr.bf16.mxu0 %v6441_v0 }
 0x87a   :  { %5031 = vmatpush3.bf16.msra.mxu0 %v5750_v19  ;;  %v5759_v19 = vld [vmem:[#allocation13 + $0x20] ss:$8 sps:$4 sm:$0xff]  }
 0x87b   :  { %5048 = vmatprep.subr.bf16.mxu0 %v6441_v0 }
 0x940   :  { %v3283_v4 = vpop.f32.mrb[24].mxu0 }
 0x941   :  { %v3284_v5 = vadd.f32 %v5751_v25, %v3283_v4  ;;  %v5022_v6 = vpop.f32.mrb[25].mxu0  ;;  %v5760_v4 = vld [vmem:[#allocation13 + $0x34] ss:$8 sps:$4 sm:$0xff]  }
 0x942   :  { %v3286_v7 = vpop.f32.mrb[26].mxu0  ;;  %v5761_v25 = vld [vmem:[#allocation11 + $0x18] sm:$0xff]   ;;  %v5763_v6 = vld [vmem:[#allocation13 + $0x44] ss:$8 sps:$4 sm:$0xff]  }
 0x943   :  { %v3289_v8 = vadd.f32 %v3284_v5, %v6938_v9  ;;  %v5023_v10 = vpop.f32.mrb[27].mxu0  ;;  %v5755_v9 = vld [vmem:[#allocation11 + $0x8] sm:$0xff]   ;;  %v5762_v5 = vld [vmem:[#allocation13 + $0x30] ss:$8 sps:$4 sm:$0xff]   ;;  %v5764_v7 = vld [vmem:[#allocation11 + $0x20] sm:$0xff]  }
 0x944   :  { %v5766_v10 = vld [vmem:[#allocation13 + $0x54] ss:$8 sps:$4 sm:$0xff]  }
 0x945   :  { %v3290_v11 = vmax.f32 %v3289_v8, 0.0  ;;  %v5765_v8 = vld [vmem:[#allocation13 + $0x40] ss:$8 sps:$4 sm:$0xff]  }
 0x947   :  { %v3291_v12 = vpack.c.bf16 %v3290_v11, %v3290_v11  ;;  %v5767_v11 = vld [vmem:[#allocation11 + $0x28] sm:$0xff]  }
 0x949   :  { %5033 = vmatmul.mubr.msk.bf16.vlgmr.msra.gmra.mrb[28].mxu0 %vm288_vm1, %v3291_v12  ;;  %5045 = vmatmul.mubr.msk.bf16.vlgmr.msra.gmra.mrb[20].mxu1 %vm288_vm1, %v3291_v12  ;;  %v5768_v12 = vld [vmem:[#allocation13 + $0x50] ss:$8 sps:$4 sm:$0xff]  }
 0x94a   :  { %5049 = vmatpush3.bf16.msra.mxu0 %v5752_v13  ;;  %5064 = vmatprep.mubr.msk.bf16.mxu0 %vm6442_vm0, %v6441_v0  ;;  %v5769_v13 = vld [vmem:[#allocation13 + $0x64] ss:$8 sps:$4 sm:$0xff]  }
 0x94b   :  { %5050 = vmatprep.subr.bf16.mxu0 %v6441_v0  ;;  %3421 = vmatpush1.bf16.msra.mxu1 %v5753_v15  ;;  %v5770_v15 = vld [vmem:[#allocation11 + $0x30] sm:$0xff]  }
 0x94c   :  { %3422 = vmatprep.subr.bf16.mxu1 %v5754_v16  ;;  %3452 = vmatprep.mubr.bf16.mxu1 %v6443_v30  ;;  %v5771_v16 = vld [vmem:[#allocation13 + $0x60] ss:$8 sps:$4 sm:$0xff]  }
 0x94e   :  { %5051 = vmatpush3.bf16.msra.mxu0 %v5755_v9  ;;  %v5772_v9 = vld [vmem:[#allocation13 + $0x74] ss:$8 sps:$4 sm:$0xff]  }
 0x94f   :  { %5052 = vmatprep.subr.bf16.mxu0 %v6441_v0  ;;  %3423 = vmatpush1.bf16.msra.mxu1 %v5756_v14  ;;  %v5773_v14 = vld [vmem:[#allocation11 + $0x38] sm:$0xff]  }
 0x950   :  { %3424 = vmatprep.subr.bf16.mxu1 %v5757_v17  ;;  %v5774_v17 = vld [vmem:[#allocation14 + $0x4] ss:$8 sps:$4 sm:$0xff]  }
 0x952   :  { %5053 = vmatpush3.bf16.msra.mxu0 %v5758_v18  ;;  %v5775_v18 = vld [vmem:[#allocation13 + $0x70] ss:$8 sps:$4 sm:$0xff]  }
 0x953   :  { %5054 = vmatprep.subr.bf16.mxu0 %v6441_v0  ;;  %3425 = vmatpush1.bf16.msra.mxu1 %v5759_v19  ;;  %v5776_v19 = vld [vmem:[#allocation16 + $0x4] ss:$8 sps:$4 sm:$0xff]  }
 0x954   :  { %3426 = vmatprep.subr.bf16.mxu1 %v5760_v4 }
 0x956   :  { %5055 = vmatpush3.bf16.msra.mxu0 %v5761_v25  ;;  %v5777_v25 = vld [vmem:[#allocation2 + $0x5] ss:$0 sm:$0xff] }
 0x957   :  { %5056 = vmatprep.subr.bf16.mxu0 %v6441_v0  ;;  %3427 = vmatpush1.bf16.msra.mxu1 %v5762_v5 }
 0x958   :  { %3428 = vmatprep.subr.bf16.mxu1 %v5763_v6 }
 0x95a   :  { %5057 = vmatpush3.bf16.msra.mxu0 %v5764_v7 }
 0x95b   :  { %5058 = vmatprep.subr.bf16.mxu0 %v6441_v0  ;;  %3429 = vmatpush1.bf16.msra.mxu1 %v5765_v8 }
 0x95c   :  { %3430 = vmatprep.subr.bf16.mxu1 %v5766_v10 }
 0x95e   :  { %5059 = vmatpush3.bf16.msra.mxu0 %v5767_v11 }
 0x95f   :  { %5060 = vmatprep.subr.bf16.mxu0 %v6441_v0  ;;  %3431 = vmatpush1.bf16.msra.mxu1 %v5768_v12  ;;  %v5778_v12 = vld [vmem:[#allocation14] ss:$8 sps:$4 sm:$0xff]  }
 0x960   :  { %3432 = vmatprep.subr.bf16.mxu1 %v5769_v13  ;;  %v5779_v13 = vld [vmem:[#allocation14 + $0x14] ss:$8 sps:$4 sm:$0xff]  }
 0x962   :  { %5061 = vmatpush3.bf16.msra.mxu0 %v5770_v15  ;;  %v5780_v15 = vld [vmem:[#allocation14 + $0x10] ss:$8 sps:$4 sm:$0xff]  }
 0x963   :  { %5062 = vmatprep.subr.bf16.mxu0 %v6441_v0  ;;  %3433 = vmatpush1.bf16.msra.mxu1 %v5771_v16  ;;  %v5781_v16 = vld [vmem:[#allocation14 + $0x24] ss:$8 sps:$4 sm:$0xff]  }
 0x964   :  { %3434 = vmatprep.subr.bf16.mxu1 %v5772_v9  ;;  %v5782_v9 = vld [vmem:[#allocation14 + $0x20] ss:$8 sps:$4 sm:$0xff]  }
 0x966   :  { %5063 = vmatpush3.bf16.msra.mxu0 %v5773_v14  ;;  %v5783_v14 = vld [vmem:[#allocation14 + $0x34] ss:$8 sps:$4 sm:$0xff]  }
 0x967   :  { %3461 = vmatprep.subr.bf16.mxu0 %v5774_v17  ;;  %3435 = vmatpush1.bf16.msra.mxu1 %v5775_v18  ;;  %v5784_v17 = vld [vmem:[#allocation14 + $0x30] ss:$8 sps:$4 sm:$0xff]   ;;  %v5785_v18 = vld [vmem:[#allocation14 + $0x44] ss:$8 sps:$4 sm:$0xff]  }
 0x968   :  { %3506 = vmatprep.subr.bf16.mxu1 %v5776_v19  ;;  %v5786_v19 = vld [vmem:[#allocation14 + $0x40] ss:$8 sps:$4 sm:$0xff]  }
 0xa1c   :  { %v3369_v4 = vpop.f32.mrb[20].mxu1 }
 0xa1d   :  { %v3370_v5 = vadd.f32 %v5777_v25, %v3369_v4  ;;  %v5046_v6 = vpop.f32.mrb[21].mxu1  ;;  %v5787_v4 = vld [vmem:[#allocation14 + $0x54] ss:$8 sps:$4 sm:$0xff]   ;;  %v5788_v25 = vld [vmem:[#allocation14 + $0x50] ss:$8 sps:$4 sm:$0xff]  }
 0xa1e   :  { %v3372_v7 = vpop.f32.mrb[22].mxu1  ;;  %v5791_v6 = vld [vmem:[#allocation14 + $0x74] ss:$8 sps:$4 sm:$0xff]  }
 0xa1f   :  { %v3375_v8 = vmax.f32 %v3370_v5, 0.0  ;;  %v5047_v10 = vpop.f32.mrb[23].mxu1  ;;  %v5790_v5 = vld [vmem:[#allocation14 + $0x60] ss:$8 sps:$4 sm:$0xff]   ;;  %v5792_v7 = vld [vmem:[#allocation14 + $0x70] ss:$8 sps:$4 sm:$0xff]  }
 0xa21   :  { %v3376_v11 = vpack.c.bf16 %v3375_v8, %v3375_v8  ;;  %v5793_v8 = vld [vmem:[#allocation17 + $0x4] ss:$16 sps:$4 sm:$0xff]  }
 0xa23   :  { %5065 = vmatmul.mubr.bf16.vlgmr.msra.gmra.mrb[28].mxu0 %v3376_v11 }
 0xa24   :  { %3462 = vmatpush1.bf16.msra.mxu0 %v5778_v12  ;;  %3493 = vmatprep.mubr.bf16.mxu0 %v6443_v30  ;;  %v5789_v30 = vld [vmem:[#allocation14 + $0x64] ss:$8 sps:$4 sm:$0xff]  }
 0xa25   :  { %3463 = vmatprep.subr.bf16.mxu0 %v5779_v13 }
 0xa28   :  { %3464 = vmatpush1.bf16.msra.mxu0 %v5780_v15 }
 0xa29   :  { %3465 = vmatprep.subr.bf16.mxu0 %v5781_v16 }
 0xa2c   :  { %3466 = vmatpush1.bf16.msra.mxu0 %v5782_v9 }
 0xa2d   :  { %3467 = vmatprep.subr.bf16.mxu0 %v5783_v14  ;;  %v5794_v14 = vld [vmem:[#allocation16] ss:$8 sps:$4 sm:$0xff]  }
 0xa30   :  { %3468 = vmatpush1.bf16.msra.mxu0 %v5784_v17  ;;  %v5795_v17 = vld [vmem:[#allocation17] ss:$16 sps:$4 sm:$0xff]  }
 0xa31   :  { %3469 = vmatprep.subr.bf16.mxu0 %v5785_v18  ;;  %v5796_v18 = vld [vmem:[#allocation16 + $0x14] ss:$8 sps:$4 sm:$0xff]  }
 0xa34   :  { %3470 = vmatpush1.bf16.msra.mxu0 %v5786_v19  ;;  %v5797_v19 = vld [vmem:[#allocation17 + $0x24] ss:$16 sps:$4 sm:$0xff]  }
 0xa35   :  { %3471 = vmatprep.subr.bf16.mxu0 %v5787_v4  ;;  %v5798_v4 = vld [vmem:[#allocation16 + $0x10] ss:$8 sps:$4 sm:$0xff]  }
 0xa38   :  { %3472 = vmatpush1.bf16.msra.mxu0 %v5788_v25  ;;  %v5799_v25 = vld [vmem:[#allocation17 + $0x20] ss:$16 sps:$4 sm:$0xff]  }
 0xa39   :  { %3473 = vmatprep.subr.bf16.mxu0 %v5789_v30  ;;  %v5801_v30 = vld [vmem:[#allocation17 + $0x44] ss:$16 sps:$4 sm:$0xff]  }
 0xa3c   :  { %3474 = vmatpush1.bf16.msra.mxu0 %v5790_v5  ;;  %v5802_v5 = vld [vmem:[#allocation16 + $0x20] ss:$8 sps:$4 sm:$0xff]  }
 0xa3d   :  { %3475 = vmatprep.subr.bf16.mxu0 %v5791_v6  ;;  %v5803_v6 = vld [vmem:[#allocation17 + $0x40] ss:$16 sps:$4 sm:$0xff]  }
 0xa40   :  { %3476 = vmatpush1.bf16.msra.mxu0 %v5792_v7  ;;  %v5804_v7 = vld [vmem:[#allocation16 + $0x34] ss:$8 sps:$4 sm:$0xff]  }
 0xa41   :  { %3553 = vmatprep.subr.bf16.mxu0 %v5793_v8  ;;  %v5805_v8 = vld [vmem:[#allocation17 + $0x64] ss:$16 sps:$4 sm:$0xff]  }
 0xaf6   :  { %v3411_v10 = vpop.f32.mrb[28].mxu0 }
 0xaf7   :  { %v5103_v11 = vadd.f32 %v6777_v34, %v3411_v10  ;;  %v5066_v12 = vpop.f32.mrb[29].mxu0  ;;  %v5800_v34 = vld [vmem:[#allocation16 + $0x24] ss:$8 sps:$4 sm:$0xff]   ;;  %v5806_v10 = vld [vmem:[#allocation16 + $0x30] ss:$8 sps:$4 sm:$0xff]  }
 0xaf8   :  { %v3414_v13 = vpop.f32.mrb[30].mxu0  ;;  %v5808_v12 = vld [vmem:[#allocation16 + $0x44] ss:$8 sps:$4 sm:$0xff]  }
 0xaf9   :  { %v3418_v15 = vmax.f32 %v5103_v11, 0.0  ;;  %v5067_v16 = vpop.f32.mrb[31].mxu0  ;;  %v5807_v11 = vld [vmem:[#allocation17 + $0x60] ss:$16 sps:$4 sm:$0xff]   ;;  %v5809_v13 = vld [vmem:[#allocation17 + $0x84] ss:$16 sps:$4 sm:$0xff]  }
 0xafa   :  { %v5811_v16 = vld [vmem:[#allocation17 + $0x80] ss:$16 sps:$4 sm:$0xff]  }
 0xafb   :  { %v3419_v9 = vpack.c.bf16 %v3418_v15, %v3418_v15  ;;  %v5810_v15 = vld [vmem:[#allocation16 + $0x40] ss:$8 sps:$4 sm:$0xff]  }
 0xafd   :  { %3453 = vmatmul.mubr.bf16.vlgmr.msra.gmra.mrb[24].mxu1 %v3419_v9  ;;  %3494 = vmatmul.mubr.bf16.vlgmr.msra.gmra.mrb[32].mxu0 %v3419_v9  ;;  %v5812_v9 = vld [vmem:[#allocation16 + $0x54] ss:$8 sps:$4 sm:$0xff]  }
 0xafe   :  { %3507 = vmatpush1.bf16.msra.mxu1 %v5794_v14  ;;  %3554 = vmatpush1.bf16.msra.mxu0 %v5795_v17  ;;  %v5813_v14 = vld [vmem:[#allocation17 + $0xa4] ss:$16 sps:$4 sm:$0xff]   ;;  %v5814_v17 = vld [vmem:[#allocation16 + $0x50] ss:$8 sps:$4 sm:$0xff]  }
 0xaff   :  { %3508 = vmatprep.subr.bf16.mxu1 %v5796_v18  ;;  %3555 = vmatprep.subr.bf16.mxu0 %v5797_v19  ;;  %v5815_v18 = vld [vmem:[#allocation17 + $0xa0] ss:$16 sps:$4 sm:$0xff]   ;;  %v5816_v19 = vld [vmem:[#allocation16 + $0x64] ss:$8 sps:$4 sm:$0xff]  }
 0xb02   :  { %3509 = vmatpush1.bf16.msra.mxu1 %v5798_v4  ;;  %3556 = vmatpush1.bf16.msra.mxu0 %v5799_v25  ;;  %v5817_v4 = vld [vmem:[#allocation17 + $0xc4] ss:$16 sps:$4 sm:$0xff]   ;;  %v5818_v25 = vld [vmem:[#allocation16 + $0x60] ss:$8 sps:$4 sm:$0xff]  }
 0xb03   :  { %3510 = vmatprep.subr.bf16.mxu1 %v5800_v34  ;;  %3557 = vmatprep.subr.bf16.mxu0 %v5801_v30  ;;  %v5819_v34 = vld [vmem:[#allocation17 + $0xc0] ss:$16 sps:$4 sm:$0xff]   ;;  %v5820_v30 = vld [vmem:[#allocation16 + $0x74] ss:$8 sps:$4 sm:$0xff]  }
 0xb06   :  { %3511 = vmatpush1.bf16.msra.mxu1 %v5802_v5  ;;  %3558 = vmatpush1.bf16.msra.mxu0 %v5803_v6  ;;  %v5821_v5 = vld [vmem:[#allocation17 + $0xe4] ss:$16 sps:$4 sm:$0xff]   ;;  %v5822_v6 = vld [vmem:[#allocation16 + $0x70] ss:$8 sps:$4 sm:$0xff]  }
 0xb07   :  { %3512 = vmatprep.subr.bf16.mxu1 %v5804_v7  ;;  %3559 = vmatprep.subr.bf16.mxu0 %v5805_v8  ;;  %v5823_v7 = vld [vmem:[#allocation17 + $0xe0] ss:$16 sps:$4 sm:$0xff]   ;;  %v5824_v8 = vld [vmem:[#allocation16 + $0x84] ss:$8 sps:$4 sm:$0xff]  }
 0xb0a   :  { %3513 = vmatpush1.bf16.msra.mxu1 %v5806_v10  ;;  %3560 = vmatpush1.bf16.msra.mxu0 %v5807_v11  ;;  %v5825_v10 = vld [vmem:[#allocation17 + $0x104] ss:$16 sps:$4 sm:$0xff]   ;;  %v5826_v11 = vld [vmem:[#allocation16 + $0x80] ss:$8 sps:$4 sm:$0xff]  }
 0xb0b   :  { %3514 = vmatprep.subr.bf16.mxu1 %v5808_v12  ;;  %3561 = vmatprep.subr.bf16.mxu0 %v5809_v13  ;;  %v5827_v12 = vld [vmem:[#allocation17 + $0x100] ss:$16 sps:$4 sm:$0xff]   ;;  %v5828_v13 = vld [vmem:[#allocation16 + $0x94] ss:$8 sps:$4 sm:$0xff]  }
 0xb0e   :  { %3515 = vmatpush1.bf16.msra.mxu1 %v5810_v15  ;;  %3562 = vmatpush1.bf16.msra.mxu0 %v5811_v16  ;;  %v5829_v15 = vld [vmem:[#allocation17 + $0x124] ss:$16 sps:$4 sm:$0xff]   ;;  %v5830_v16 = vld [vmem:[#allocation16 + $0x90] ss:$8 sps:$4 sm:$0xff]  }
 0xb0f   :  { %3516 = vmatprep.subr.bf16.mxu1 %v5812_v9  ;;  %3563 = vmatprep.subr.bf16.mxu0 %v5813_v14  ;;  %v5831_v9 = vld [vmem:[#allocation17 + $0x120] ss:$16 sps:$4 sm:$0xff]   ;;  %v5832_v14 = vld [vmem:[#allocation16 + $0xa4] ss:$8 sps:$4 sm:$0xff]  }
 0xb12   :  { %3517 = vmatpush1.bf16.msra.mxu1 %v5814_v17  ;;  %3564 = vmatpush1.bf16.msra.mxu0 %v5815_v18  ;;  %v5833_v17 = vld [vmem:[#allocation17 + $0x144] ss:$16 sps:$4 sm:$0xff]   ;;  %v5834_v18 = vld [vmem:[#allocation16 + $0xa0] ss:$8 sps:$4 sm:$0xff]  }
 0xb13   :  { %3518 = vmatprep.subr.bf16.mxu1 %v5816_v19  ;;  %3565 = vmatprep.subr.bf16.mxu0 %v5817_v4  ;;  %v5835_v19 = vld [vmem:[#allocation17 + $0x140] ss:$16 sps:$4 sm:$0xff]   ;;  %v5836_v4 = vld [vmem:[#allocation16 + $0xb4] ss:$8 sps:$4 sm:$0xff]  }
 0xb16   :  { %3519 = vmatpush1.bf16.msra.mxu1 %v5818_v25  ;;  %3566 = vmatpush1.bf16.msra.mxu0 %v5819_v34  ;;  %v5837_v25 = vld [vmem:[#allocation17 + $0x164] ss:$16 sps:$4 sm:$0xff]   ;;  %v5838_v34 = vld [vmem:[#allocation16 + $0xb0] ss:$8 sps:$4 sm:$0xff]  }
 0xb17   :  { %3520 = vmatprep.subr.bf16.mxu1 %v5820_v30  ;;  %3567 = vmatprep.subr.bf16.mxu0 %v5821_v5  ;;  %v5839_v30 = vld [vmem:[#allocation17 + $0x160] ss:$16 sps:$4 sm:$0xff]   ;;  %v5840_v5 = vld [vmem:[#allocation16 + $0xc4] ss:$8 sps:$4 sm:$0xff]  }
 0xb1a   :  { %3521 = vmatpush1.bf16.msra.mxu1 %v5822_v6  ;;  %3568 = vmatpush1.bf16.msra.mxu0 %v5823_v7  ;;  %v5841_v6 = vld [vmem:[#allocation17 + $0x184] ss:$16 sps:$4 sm:$0xff]   ;;  %v5842_v7 = vld [vmem:[#allocation16 + $0xc0] ss:$8 sps:$4 sm:$0xff]  }
 0xb1b   :  { %3522 = vmatprep.subr.bf16.mxu1 %v5824_v8  ;;  %3569 = vmatprep.subr.bf16.mxu0 %v5825_v10  ;;  %v5843_v8 = vld [vmem:[#allocation17 + $0x180] ss:$16 sps:$4 sm:$0xff]   ;;  %v5844_v10 = vld [vmem:[#allocation16 + $0xd4] ss:$8 sps:$4 sm:$0xff]  }
 0xb1e   :  { %3523 = vmatpush1.bf16.msra.mxu1 %v5826_v11  ;;  %3570 = vmatpush1.bf16.msra.mxu0 %v5827_v12  ;;  %v5845_v11 = vld [vmem:[#allocation17 + $0x1a4] ss:$16 sps:$4 sm:$0xff]   ;;  %v5846_v12 = vld [vmem:[#allocation16 + $0xd0] ss:$8 sps:$4 sm:$0xff]  }
 0xb1f   :  { %3524 = vmatprep.subr.bf16.mxu1 %v5828_v13  ;;  %3571 = vmatprep.subr.bf16.mxu0 %v5829_v15  ;;  %v5847_v13 = vld [vmem:[#allocation17 + $0x1a0] ss:$16 sps:$4 sm:$0xff]   ;;  %v5848_v15 = vld [vmem:[#allocation16 + $0xe4] ss:$8 sps:$4 sm:$0xff]  }
 0xb22   :  { %3525 = vmatpush1.bf16.msra.mxu1 %v5830_v16  ;;  %3572 = vmatpush1.bf16.msra.mxu0 %v5831_v9  ;;  %v5849_v16 = vld [vmem:[#allocation17 + $0x1c4] ss:$16 sps:$4 sm:$0xff]   ;;  %v5850_v9 = vld [vmem:[#allocation16 + $0xe0] ss:$8 sps:$4 sm:$0xff]  }
 0xb23   :  { %3526 = vmatprep.subr.bf16.mxu1 %v5832_v14  ;;  %3573 = vmatprep.subr.bf16.mxu0 %v5833_v17  ;;  %v5851_v14 = vld [vmem:[#allocation17 + $0x1c0] ss:$16 sps:$4 sm:$0xff]   ;;  %v5852_v17 = vld [vmem:[#allocation16 + $0xf4] ss:$8 sps:$4 sm:$0xff]  }
 0xb26   :  { %3527 = vmatpush1.bf16.msra.mxu1 %v5834_v18  ;;  %3574 = vmatpush1.bf16.msra.mxu0 %v5835_v19  ;;  %v5853_v18 = vld [vmem:[#allocation17 + $0x1e4] ss:$16 sps:$4 sm:$0xff]   ;;  %v5854_v19 = vld [vmem:[#allocation16 + $0xf0] ss:$8 sps:$4 sm:$0xff]  }
 0xb27   :  { %3528 = vmatprep.subr.bf16.mxu1 %v5836_v4  ;;  %3575 = vmatprep.subr.bf16.mxu0 %v5837_v25  ;;  %v5855_v4 = vld [vmem:[#allocation17 + $0x1e0] ss:$16 sps:$4 sm:$0xff]   ;;  %v5856_v25 = vld [vmem:[#allocation17 + $0xc] ss:$16 sps:$4 sm:$0xff]  }
 0xb2a   :  { %3529 = vmatpush1.bf16.msra.mxu1 %v5838_v34  ;;  %3576 = vmatpush1.bf16.msra.mxu0 %v5839_v30  ;;  %v5857_v34 = vld [vmem:[#allocation19 + $0x4] ss:$16 sps:$4 sm:$0xff]  }
 0xb2b   :  { %3530 = vmatprep.subr.bf16.mxu1 %v5840_v5  ;;  %3577 = vmatprep.subr.bf16.mxu0 %v5841_v6 }
 0xb2e   :  { %3531 = vmatpush1.bf16.msra.mxu1 %v5842_v7  ;;  %3578 = vmatpush1.bf16.msra.mxu0 %v5843_v8 }
 0xb2f   :  { %3532 = vmatprep.subr.bf16.mxu1 %v5844_v10  ;;  %3579 = vmatprep.subr.bf16.mxu0 %v5845_v11 }
 0xb32   :  { %3533 = vmatpush1.bf16.msra.mxu1 %v5846_v12  ;;  %3580 = vmatpush1.bf16.msra.mxu0 %v5847_v13 }
 0xb33   :  { %3534 = vmatprep.subr.bf16.mxu1 %v5848_v15  ;;  %3581 = vmatprep.subr.bf16.mxu0 %v5849_v16  ;;  %v5858_v16 = vld [vmem:[#allocation17 + $0x8] ss:$16 sps:$4 sm:$0xff]  }
 0xb36   :  { %3535 = vmatpush1.bf16.msra.mxu1 %v5850_v9  ;;  %3582 = vmatpush1.bf16.msra.mxu0 %v5851_v14  ;;  %v5859_v9 = vld [vmem:[#allocation17 + $0x2c] ss:$16 sps:$4 sm:$0xff]   ;;  %v5860_v14 = vld [vmem:[#allocation17 + $0x28] ss:$16 sps:$4 sm:$0xff]  }
 0xb37   :  { %3536 = vmatprep.subr.bf16.mxu1 %v5852_v17  ;;  %3583 = vmatprep.subr.bf16.mxu0 %v5853_v18  ;;  %v5861_v17 = vld [vmem:[#allocation17 + $0x4c] ss:$16 sps:$4 sm:$0xff]  }
 0xb38   :  { %v5863_v18 = vld [vmem:[#allocation17 + $0x6c] ss:$16 sps:$4 sm:$0xff]  }
 0xb3a   :  { %3537 = vmatpush1.bf16.msra.mxu1 %v5854_v19  ;;  %3584 = vmatpush1.bf16.msra.mxu0 %v5855_v4  ;;  %v5865_v19 = vld [vmem:[#allocation17 + $0x8c] ss:$16 sps:$4 sm:$0xff]   ;;  %v5866_v4 = vld [vmem:[#allocation17 + $0x88] ss:$16 sps:$4 sm:$0xff]  }
 0xb3b   :  { %3594 = vmatprep.subr.bf16.mxu1 %v5856_v25  ;;  %3635 = vmatprep.subr.bf16.mxu0 %v5857_v34  ;;  %v5867_v25 = vld [vmem:[#allocation17 + $0xac] ss:$16 sps:$4 sm:$0xff]   ;;  %v5868_v34 = vld [vmem:[#allocation17 + $0xa8] ss:$16 sps:$4 sm:$0xff]  }
 0xbd0   :  { %v3495_v30 = vpop.f32.mrb[32].mxu0 }
 0xbd1   :  { %v3496_v5 = vadd.f32 %v3495_v30, %v6789_v47  ;;  %v3497_v6 = vpop.f32.mrb[33].mxu0  ;;  %v5862_v47 = vld [vmem:[#allocation17 + $0x48] ss:$16 sps:$4 sm:$0xff]   ;;  %v5869_v30 = vld [vmem:[#allocation17 + $0xcc] ss:$16 sps:$4 sm:$0xff]  }
 0xbd2   :  { %v3498_v7 = vadd.f32 %v3497_v6, %v6792_v48  ;;  %v3499_v8 = vpop.f32.mrb[34].mxu0  ;;  %v5864_v48 = vld [vmem:[#allocation17 + $0x68] ss:$16 sps:$4 sm:$0xff]   ;;  %v5871_v6 = vld [vmem:[#allocation17 + $0xec] ss:$16 sps:$4 sm:$0xff]  }
 0xbd3   :  { %v3502_v10 = vmax.f32 %v3496_v5, 0.0  ;;  %v3500_v11 = vpop.f32.mrb[35].mxu0  ;;  %v5870_v5 = vld [vmem:[#allocation17 + $0xc8] ss:$16 sps:$4 sm:$0xff]   ;;  %v5873_v8 = vld [vmem:[#allocation17 + $0x10c] ss:$16 sps:$4 sm:$0xff]  }
 0xbd4   :  { %v3503_v12 = vmax.f32 %v3498_v7, 0.0  ;;  %v5872_v7 = vld [vmem:[#allocation17 + $0xe8] ss:$16 sps:$4 sm:$0xff]   ;;  %v5875_v11 = vld [vmem:[#allocation17 + $0x12c] ss:$16 sps:$4 sm:$0xff]  }
 0xbd5   :  { %v3504_v15 = vpack.c.bf16 %v3502_v10, %v3502_v10  ;;  %v5874_v10 = vld [vmem:[#allocation17 + $0x108] ss:$16 sps:$4 sm:$0xff]  }
 0xbd6   :  { %v3505_v13 = vpack.c.bf16 %v3503_v12, %v3503_v12  ;;  %v5876_v12 = vld [vmem:[#allocation17 + $0x128] ss:$16 sps:$4 sm:$0xff]  }
 0xbd8   :  { %3538 = vmatprep.mubr.bf16.mxu1 %v3505_v13  ;;  %v5877_v13 = vld [vmem:[#allocation17 + $0x14c] ss:$16 sps:$4 sm:$0xff]  }
 0xbd9   :  { %3539 = vmatmul.mubr.bf16.vlgmr.msra.gmra.mrb[24].mxu1 %v3504_v15  ;;  %v5878_v15 = vld [vmem:[#allocation17 + $0x148] ss:$16 sps:$4 sm:$0xff]  }
 0xbda   :  { %3595 = vmatpush1.bf16.msra.mxu1 %v5858_v16  ;;  %v5879_v16 = vld [vmem:[#allocation17 + $0x16c] ss:$16 sps:$4 sm:$0xff]  }
 0xbdb   :  { %3596 = vmatprep.subr.bf16.mxu1 %v5859_v9  ;;  %v5880_v9 = vld [vmem:[#allocation17 + $0x168] ss:$16 sps:$4 sm:$0xff]  }
 0xbde   :  { %3597 = vmatpush1.bf16.msra.mxu1 %v5860_v14  ;;  %v5881_v14 = vld [vmem:[#allocation17 + $0x18c] ss:$16 sps:$4 sm:$0xff]  }
 0xbdf   :  { %3598 = vmatprep.subr.bf16.mxu1 %v5861_v17  ;;  %v5882_v17 = vld [vmem:[#allocation17 + $0x188] ss:$16 sps:$4 sm:$0xff]  }
 0xbe2   :  { %3599 = vmatpush1.bf16.msra.mxu1 %v5862_v47  ;;  %v5883_v47 = vld [vmem:[#allocation17 + $0x1ac] ss:$16 sps:$4 sm:$0xff]  }
 0xbe3   :  { %3600 = vmatprep.subr.bf16.mxu1 %v5863_v18  ;;  %v5884_v18 = vld [vmem:[#allocation17 + $0x1a8] ss:$16 sps:$4 sm:$0xff]  }
 0xbe6   :  { %3601 = vmatpush1.bf16.msra.mxu1 %v5864_v48  ;;  %v5885_v48 = vld [vmem:[#allocation17 + $0x1cc] ss:$16 sps:$4 sm:$0xff]  }
 0xbe7   :  { %3602 = vmatprep.subr.bf16.mxu1 %v5865_v19  ;;  %v5886_v19 = vld [vmem:[#allocation17 + $0x1c8] ss:$16 sps:$4 sm:$0xff]  }
 0xbea   :  { %3603 = vmatpush1.bf16.msra.mxu1 %v5866_v4  ;;  %v5887_v4 = vld [vmem:[#allocation17 + $0x1ec] ss:$16 sps:$4 sm:$0xff]  }
 0xbeb   :  { %3604 = vmatprep.subr.bf16.mxu1 %v5867_v25  ;;  %v5888_v25 = vld [vmem:[#allocation17 + $0x1e8] ss:$16 sps:$4 sm:$0xff]  }
 0xbee   :  { %3605 = vmatpush1.bf16.msra.mxu1 %v5868_v34  ;;  %v5889_v34 = vld [vmem:[#allocation19 + $0xc] ss:$16 sps:$4 sm:$0xff]  }
 0xbef   :  { %3606 = vmatprep.subr.bf16.mxu1 %v5869_v30 }
 0xbf2   :  { %3607 = vmatpush1.bf16.msra.mxu1 %v5870_v5 }
 0xbf3   :  { %3608 = vmatprep.subr.bf16.mxu1 %v5871_v6 }
 0xbf6   :  { %3609 = vmatpush1.bf16.msra.mxu1 %v5872_v7 }
 0xbf7   :  { %3610 = vmatprep.subr.bf16.mxu1 %v5873_v8 }
 0xbfa   :  { %3611 = vmatpush1.bf16.msra.mxu1 %v5874_v10 }
 0xbfb   :  { %3612 = vmatprep.subr.bf16.mxu1 %v5875_v11 }
 0xbfe   :  { %3613 = vmatpush1.bf16.msra.mxu1 %v5876_v12 }
 0xbff   :  { %3614 = vmatprep.subr.bf16.mxu1 %v5877_v13 }
 0xc02   :  { %3615 = vmatpush1.bf16.msra.mxu1 %v5878_v15 }
 0xc03   :  { %3616 = vmatprep.subr.bf16.mxu1 %v5879_v16  ;;  %v5890_v16 = vld [vmem:[#allocation19] ss:$16 sps:$4 sm:$0xff]  }
 0xc06   :  { %3617 = vmatpush1.bf16.msra.mxu1 %v5880_v9  ;;  %v5891_v9 = vld [vmem:[#allocation19 + $0x8] ss:$16 sps:$4 sm:$0xff]  }
 0xc07   :  { %3618 = vmatprep.subr.bf16.mxu1 %v5881_v14  ;;  %v5894_v14 = vld [vmem:[#allocation19 + $0x20] ss:$16 sps:$4 sm:$0xff]  }
 0xc0a   :  { %3619 = vmatpush1.bf16.msra.mxu1 %v5882_v17  ;;  %v5895_v17 = vld [vmem:[#allocation19 + $0x28] ss:$16 sps:$4 sm:$0xff]  }
 0xc0b   :  { %3620 = vmatprep.subr.bf16.mxu1 %v5883_v47  ;;  %v5896_v47 = vld [vmem:[#allocation19 + $0x44] ss:$16 sps:$4 sm:$0xff]  }
 0xc0e   :  { %3621 = vmatpush1.bf16.msra.mxu1 %v5884_v18  ;;  %v5897_v18 = vld [vmem:[#allocation19 + $0x4c] ss:$16 sps:$4 sm:$0xff]  }
 0xc0f   :  { %3622 = vmatprep.subr.bf16.mxu1 %v5885_v48  ;;  %v5898_v48 = vld [vmem:[#allocation19 + $0x40] ss:$16 sps:$4 sm:$0xff]  }
 0xc12   :  { %3623 = vmatpush1.bf16.msra.mxu1 %v5886_v19  ;;  %v5899_v19 = vld [vmem:[#allocation19 + $0x48] ss:$16 sps:$4 sm:$0xff]  }
 0xc13   :  { %3624 = vmatprep.subr.bf16.mxu1 %v5887_v4  ;;  %v5900_v4 = vld [vmem:[#allocation19 + $0x64] ss:$16 sps:$4 sm:$0xff]  }
 0xc16   :  { %3625 = vmatpush1.bf16.msra.mxu1 %v5888_v25  ;;  %v5901_v25 = vld [vmem:[#allocation19 + $0x6c] ss:$16 sps:$4 sm:$0xff]  }
 0xc17   :  { %3676 = vmatprep.subr.bf16.mxu1 %v5889_v34  ;;  %v5902_v34 = vld [vmem:[#allocation19 + $0x60] ss:$16 sps:$4 sm:$0xff]  }
 0xcac   :  { %v3540_v30 = vpop.f32.mrb[24].mxu1 }
 0xcad   :  { %v5105_v5 = vadd.f32 %v6800_v42, %v3540_v30  ;;  %v3542_v6 = vpop.f32.mrb[25].mxu1  ;;  %v5892_v42 = vld [vmem:[#allocation19 + $0x24] ss:$16 sps:$4 sm:$0xff]   ;;  %v5903_v30 = vld [vmem:[#allocation19 + $0x68] ss:$16 sps:$4 sm:$0xff]  }
 0xcae   :  { %v5107_v7 = vadd.f32 %v6802_v45, %v3542_v6  ;;  %v3544_v8 = vpop.f32.mrb[26].mxu1  ;;  %v5893_v45 = vld [vmem:[#allocation19 + $0x2c] ss:$16 sps:$4 sm:$0xff]  }
 0xcaf   :  { %v3549_v10 = vmax.f32 %v5105_v5, 0.0  ;;  %v3545_v11 = vpop.f32.mrb[27].mxu1  ;;  %v5904_v5 = vld [vmem:[#allocation19 + $0x84] ss:$16 sps:$4 sm:$0xff]   ;;  %v5905_v6 = vld [vmem:[#allocation19 + $0x8c] ss:$16 sps:$4 sm:$0xff]  }
 0xcb0   :  { %v3550_v12 = vmax.f32 %v5107_v7, 0.0  ;;  %v5906_v7 = vld [vmem:[#allocation19 + $0x80] ss:$16 sps:$4 sm:$0xff]   ;;  %v5907_v8 = vld [vmem:[#allocation19 + $0x88] ss:$16 sps:$4 sm:$0xff]  }
 0xcb1   :  { %v6986_v15 = vpack.c.bf16 %v3549_v10, %v3549_v10  ;;  %v5908_v10 = vld [vmem:[#allocation19 + $0xa4] ss:$16 sps:$4 sm:$0xff]   ;;  %v5909_v11 = vld [vmem:[#allocation19 + $0xac] ss:$16 sps:$4 sm:$0xff]  }
 0xcb2   :  { %v3552_v13 = vpack.c.bf16 %v3550_v12, %v3550_v12  ;;  %v5910_v12 = vld [vmem:[#allocation19 + $0xa0] ss:$16 sps:$4 sm:$0xff]  }
 0xcb4   :  { %3585 = vmatprep.mubr.bf16.mxu0 %v3552_v13  ;;  %3626 = vmatprep.mubr.bf16.mxu1 %v3552_v13 }
 0xcb5   :  { %3586 = vmatmul.mubr.bf16.vlgmr.msra.gmra.mrb[36].mxu0 %v6986_v15  ;;  %3627 = vmatmul.mubr.bf16.vlgmr.msra.gmra.mrb[28].mxu1 %v6986_v15 }
 0xcb6   :  { %3636 = vmatpush1.bf16.msra.mxu0 %v5890_v16  ;;  %3677 = vmatpush1.bf16.msra.mxu1 %v5891_v9  ;;  %v5912_v16 = vld [vmem:[#allocation19 + $0xc4] ss:$16 sps:$4 sm:$0xff]   ;;  %v5913_v9 = vld [vmem:[#allocation19 + $0xcc] ss:$16 sps:$4 sm:$0xff]  }
 0xcb7   :  { %3667 = vmatprep.mubr.bf16.mxu0 %v3552_v13  ;;  %3708 = vmatprep.mubr.bf16.mxu1 %v3552_v13  ;;  %v5911_v13 = vld [vmem:[#allocation19 + $0xa8] ss:$16 sps:$4 sm:$0xff]  }
 0xcb8   :  { %3637 = vmatprep.subr.bf16.mxu0 %v5892_v42  ;;  %3678 = vmatprep.subr.bf16.mxu1 %v5893_v45  ;;  %v5914_v42 = vld [vmem:[#allocation19 + $0xc0] ss:$16 sps:$4 sm:$0xff]   ;;  %v5915_v45 = vld [vmem:[#allocation19 + $0xc8] ss:$16 sps:$4 sm:$0xff]  }
 0xcba   :  { %3638 = vmatpush1.bf16.msra.mxu0 %v5894_v14  ;;  %3679 = vmatpush1.bf16.msra.mxu1 %v5895_v17  ;;  %v5916_v14 = vld [vmem:[#allocation19 + $0xe4] ss:$16 sps:$4 sm:$0xff]   ;;  %v5917_v17 = vld [vmem:[#allocation19 + $0xec] ss:$16 sps:$4 sm:$0xff]  }
 0xcbb   :  { %3639 = vmatprep.subr.bf16.mxu0 %v5896_v47  ;;  %3680 = vmatprep.subr.bf16.mxu1 %v5897_v18  ;;  %v5918_v47 = vld [vmem:[#allocation19 + $0xe0] ss:$16 sps:$4 sm:$0xff]   ;;  %v5919_v18 = vld [vmem:[#allocation19 + $0xe8] ss:$16 sps:$4 sm:$0xff]  }
 0xcbe   :  { %3640 = vmatpush1.bf16.msra.mxu0 %v5898_v48  ;;  %3681 = vmatpush1.bf16.msra.mxu1 %v5899_v19  ;;  %v5920_v48 = vld [vmem:[#allocation19 + $0x104] ss:$16 sps:$4 sm:$0xff]   ;;  %v5921_v19 = vld [vmem:[#allocation19 + $0x10c] ss:$16 sps:$4 sm:$0xff]  }
 0xcbf   :  { %3641 = vmatprep.subr.bf16.mxu0 %v5900_v4  ;;  %3682 = vmatprep.subr.bf16.mxu1 %v5901_v25  ;;  %v5922_v4 = vld [vmem:[#allocation19 + $0x100] ss:$16 sps:$4 sm:$0xff]   ;;  %v5923_v25 = vld [vmem:[#allocation19 + $0x108] ss:$16 sps:$4 sm:$0xff]  }
 0xcc2   :  { %3642 = vmatpush1.bf16.msra.mxu0 %v5902_v34  ;;  %3683 = vmatpush1.bf16.msra.mxu1 %v5903_v30  ;;  %v5924_v34 = vld [vmem:[#allocation19 + $0x124] ss:$16 sps:$4 sm:$0xff]   ;;  %v5925_v30 = vld [vmem:[#allocation19 + $0x12c] ss:$16 sps:$4 sm:$0xff]  }
 0xcc3   :  { %3643 = vmatprep.subr.bf16.mxu0 %v5904_v5  ;;  %3684 = vmatprep.subr.bf16.mxu1 %v5905_v6  ;;  %v5926_v5 = vld [vmem:[#allocation19 + $0x120] ss:$16 sps:$4 sm:$0xff]   ;;  %v5927_v6 = vld [vmem:[#allocation19 + $0x128] ss:$16 sps:$4 sm:$0xff]  }
 0xcc6   :  { %3644 = vmatpush1.bf16.msra.mxu0 %v5906_v7  ;;  %3685 = vmatpush1.bf16.msra.mxu1 %v5907_v8  ;;  %v5928_v7 = vld [vmem:[#allocation19 + $0x144] ss:$16 sps:$4 sm:$0xff]   ;;  %v5929_v8 = vld [vmem:[#allocation19 + $0x14c] ss:$16 sps:$4 sm:$0xff]  }
 0xcc7   :  { %3645 = vmatprep.subr.bf16.mxu0 %v5908_v10  ;;  %3686 = vmatprep.subr.bf16.mxu1 %v5909_v11  ;;  %v5930_v10 = vld [vmem:[#allocation19 + $0x140] ss:$16 sps:$4 sm:$0xff]   ;;  %v5931_v11 = vld [vmem:[#allocation19 + $0x148] ss:$16 sps:$4 sm:$0xff]  }
 0xcca   :  { %3646 = vmatpush1.bf16.msra.mxu0 %v5910_v12  ;;  %3687 = vmatpush1.bf16.msra.mxu1 %v5911_v13  ;;  %v5932_v12 = vld [vmem:[#allocation19 + $0x164] ss:$16 sps:$4 sm:$0xff]   ;;  %v5933_v13 = vld [vmem:[#allocation19 + $0x16c] ss:$16 sps:$4 sm:$0xff]  }
 0xccb   :  { %3647 = vmatprep.subr.bf16.mxu0 %v5912_v16  ;;  %3688 = vmatprep.subr.bf16.mxu1 %v5913_v9  ;;  %v5934_v16 = vld [vmem:[#allocation19 + $0x160] ss:$16 sps:$4 sm:$0xff]   ;;  %v5935_v9 = vld [vmem:[#allocation19 + $0x168] ss:$16 sps:$4 sm:$0xff]  }
 0xcce   :  { %3648 = vmatpush1.bf16.msra.mxu0 %v5914_v42  ;;  %3689 = vmatpush1.bf16.msra.mxu1 %v5915_v45  ;;  %v5936_v42 = vld [vmem:[#allocation19 + $0x184] ss:$16 sps:$4 sm:$0xff]   ;;  %v5937_v45 = vld [vmem:[#allocation19 + $0x18c] ss:$16 sps:$4 sm:$0xff]  }
 0xccf   :  { %3649 = vmatprep.subr.bf16.mxu0 %v5916_v14  ;;  %3690 = vmatprep.subr.bf16.mxu1 %v5917_v17  ;;  %v5938_v14 = vld [vmem:[#allocation19 + $0x180] ss:$16 sps:$4 sm:$0xff]   ;;  %v5939_v17 = vld [vmem:[#allocation19 + $0x188] ss:$16 sps:$4 sm:$0xff]  }
 0xcd2   :  { %3650 = vmatpush1.bf16.msra.mxu0 %v5918_v47  ;;  %3691 = vmatpush1.bf16.msra.mxu1 %v5919_v18  ;;  %v5940_v47 = vld [vmem:[#allocation19 + $0x1a4] ss:$16 sps:$4 sm:$0xff]   ;;  %v5941_v18 = vld [vmem:[#allocation19 + $0x1ac] ss:$16 sps:$4 sm:$0xff]  }
 0xcd3   :  { %3651 = vmatprep.subr.bf16.mxu0 %v5920_v48  ;;  %3692 = vmatprep.subr.bf16.mxu1 %v5921_v19  ;;  %v5942_v48 = vld [vmem:[#allocation19 + $0x1a0] ss:$16 sps:$4 sm:$0xff]   ;;  %v5943_v19 = vld [vmem:[#allocation19 + $0x1a8] ss:$16 sps:$4 sm:$0xff]  }
 0xcd6   :  { %3652 = vmatpush1.bf16.msra.mxu0 %v5922_v4  ;;  %3693 = vmatpush1.bf16.msra.mxu1 %v5923_v25  ;;  %v5944_v4 = vld [vmem:[#allocation19 + $0x1c4] ss:$16 sps:$4 sm:$0xff]   ;;  %v5945_v25 = vld [vmem:[#allocation19 + $0x1cc] ss:$16 sps:$4 sm:$0xff]  }
 0xcd7   :  { %3653 = vmatprep.subr.bf16.mxu0 %v5924_v34  ;;  %3694 = vmatprep.subr.bf16.mxu1 %v5925_v30  ;;  %v5946_v34 = vld [vmem:[#allocation19 + $0x1c0] ss:$16 sps:$4 sm:$0xff]   ;;  %v5947_v30 = vld [vmem:[#allocation19 + $0x1c8] ss:$16 sps:$4 sm:$0xff]  }
 0xcda   :  { %3654 = vmatpush1.bf16.msra.mxu0 %v5926_v5  ;;  %3695 = vmatpush1.bf16.msra.mxu1 %v5927_v6  ;;  %v5948_v5 = vld [vmem:[#allocation19 + $0x1e4] ss:$16 sps:$4 sm:$0xff]   ;;  %v5949_v6 = vld [vmem:[#allocation19 + $0x1ec] ss:$16 sps:$4 sm:$0xff]  }
 0xcdb   :  { %3655 = vmatprep.subr.bf16.mxu0 %v5928_v7  ;;  %3696 = vmatprep.subr.bf16.mxu1 %v5929_v8  ;;  %v5950_v7 = vld [vmem:[#allocation19 + $0x1e0] ss:$16 sps:$4 sm:$0xff]   ;;  %v5951_v8 = vld [vmem:[#allocation19 + $0x1e8] ss:$16 sps:$4 sm:$0xff]  }
 0xcde   :  { %3656 = vmatpush1.bf16.msra.mxu0 %v5930_v10  ;;  %3697 = vmatpush1.bf16.msra.mxu1 %v5931_v11  ;;  %v5952_v10 = vld [vmem:[#allocation20 + $0x4] ss:$16 sps:$4 sm:$0xff]   ;;  %v5953_v11 = vld [vmem:[#allocation20 + $0xc] ss:$16 sps:$4 sm:$0xff]  }
 0xcdf   :  { %3657 = vmatprep.subr.bf16.mxu0 %v5932_v12  ;;  %3698 = vmatprep.subr.bf16.mxu1 %v5933_v13  ;;  %v5954_v12 = vld [vmem:[#allocation20] ss:$16 sps:$4 sm:$0xff]   ;;  %v5955_v13 = vld [vmem:[#allocation20 + $0x8] ss:$16 sps:$4 sm:$0xff]  }
 0xce2   :  { %3658 = vmatpush1.bf16.msra.mxu0 %v5934_v16  ;;  %3699 = vmatpush1.bf16.msra.mxu1 %v5935_v9  ;;  %v5956_v16 = vld [vmem:[#allocation20 + $0x24] ss:$16 sps:$4 sm:$0xff]   ;;  %v5957_v9 = vld [vmem:[#allocation20 + $0x2c] ss:$16 sps:$4 sm:$0xff]  }
 0xce3   :  { %3659 = vmatprep.subr.bf16.mxu0 %v5936_v42  ;;  %3700 = vmatprep.subr.bf16.mxu1 %v5937_v45  ;;  %v5958_v42 = vld [vmem:[#allocation20 + $0x20] ss:$16 sps:$4 sm:$0xff]   ;;  %v5959_v45 = vld [vmem:[#allocation20 + $0x28] ss:$16 sps:$4 sm:$0xff]  }
 0xce6   :  { %3660 = vmatpush1.bf16.msra.mxu0 %v5938_v14  ;;  %3701 = vmatpush1.bf16.msra.mxu1 %v5939_v17  ;;  %v5960_v14 = vld [vmem:[#allocation20 + $0x44] ss:$16 sps:$4 sm:$0xff]   ;;  %v5961_v17 = vld [vmem:[#allocation20 + $0x4c] ss:$16 sps:$4 sm:$0xff]  }
 0xce7   :  { %3661 = vmatprep.subr.bf16.mxu0 %v5940_v47  ;;  %3702 = vmatprep.subr.bf16.mxu1 %v5941_v18  ;;  %v5962_v47 = vld [vmem:[#allocation20 + $0x40] ss:$16 sps:$4 sm:$0xff]   ;;  %v5963_v18 = vld [vmem:[#allocation20 + $0x48] ss:$16 sps:$4 sm:$0xff]  }
 0xcea   :  { %3662 = vmatpush1.bf16.msra.mxu0 %v5942_v48  ;;  %3703 = vmatpush1.bf16.msra.mxu1 %v5943_v19  ;;  %v5965_v48 = vld [vmem:[#allocation20 + $0x6c] ss:$16 sps:$4 sm:$0xff]   ;;  %v5966_v19 = vld [vmem:[#allocation20 + $0x60] ss:$16 sps:$4 sm:$0xff]  }
 0xceb   :  { %3663 = vmatprep.subr.bf16.mxu0 %v5944_v4  ;;  %3704 = vmatprep.subr.bf16.mxu1 %v5945_v25  ;;  %v5967_v4 = vld [vmem:[#allocation20 + $0x68] ss:$16 sps:$4 sm:$0xff]   ;;  %v5968_v25 = vld [vmem:[#allocation20 + $0x84] ss:$16 sps:$4 sm:$0xff]  }
 0xcee   :  { %3664 = vmatpush1.bf16.msra.mxu0 %v5946_v34  ;;  %3705 = vmatpush1.bf16.msra.mxu1 %v5947_v30  ;;  %v5969_v34 = vld [vmem:[#allocation20 + $0x8c] ss:$16 sps:$4 sm:$0xff]   ;;  %v5970_v30 = vld [vmem:[#allocation20 + $0x80] ss:$16 sps:$4 sm:$0xff]  }
 0xcef   :  { %3665 = vmatprep.subr.bf16.mxu0 %v5948_v5  ;;  %3706 = vmatprep.subr.bf16.mxu1 %v5949_v6  ;;  %v5971_v5 = vld [vmem:[#allocation20 + $0x88] ss:$16 sps:$4 sm:$0xff]   ;;  %v5972_v6 = vld [vmem:[#allocation20 + $0xa4] ss:$16 sps:$4 sm:$0xff]  }
 0xcf2   :  { %3666 = vmatpush1.bf16.msra.mxu0 %v5950_v7  ;;  %3707 = vmatpush1.bf16.msra.mxu1 %v5951_v8  ;;  %v5973_v7 = vld [vmem:[#allocation20 + $0xac] ss:$16 sps:$4 sm:$0xff]   ;;  %v5974_v8 = vld [vmem:[#allocation20 + $0xa0] ss:$16 sps:$4 sm:$0xff]  }
 0xcf3   :  { %3725 = vmatprep.subr.bf16.mxu0 %v5952_v10  ;;  %3807 = vmatprep.subr.bf16.mxu1 %v5953_v11  ;;  %v5975_v10 = vld [vmem:[#allocation20 + $0xa8] ss:$16 sps:$4 sm:$0xff]   ;;  %v5976_v11 = vld [vmem:[#allocation20 + $0xc4] ss:$16 sps:$4 sm:$0xff]  }
 0xcf5   :  { %3668 = vmatmul.mubr.bf16.vlgmr.msra.gmra.mrb[40].mxu0 %v6986_v15  ;;  %3709 = vmatmul.mubr.bf16.vlgmr.msra.gmra.mrb[32].mxu1 %v6986_v15  ;;  %v5964_v15 = vld [vmem:[#allocation20 + $0x64] ss:$16 sps:$4 sm:$0xff]  }
 0xcf6   :  { %3726 = vmatpush1.bf16.msra.mxu0 %v5954_v12  ;;  %3808 = vmatpush1.bf16.msra.mxu1 %v5955_v13  ;;  %v5977_v12 = vld [vmem:[#allocation20 + $0xcc] ss:$16 sps:$4 sm:$0xff]   ;;  %v5978_v13 = vld [vmem:[#allocation20 + $0xc0] ss:$16 sps:$4 sm:$0xff]  }
 0xcf7   :  { %3727 = vmatprep.subr.bf16.mxu0 %v5956_v16  ;;  %3809 = vmatprep.subr.bf16.mxu1 %v5957_v9  ;;  %v5979_v16 = vld [vmem:[#allocation20 + $0xc8] ss:$16 sps:$4 sm:$0xff]   ;;  %v5980_v9 = vld [vmem:[#allocation20 + $0xe4] ss:$16 sps:$4 sm:$0xff]  }
 0xcfa   :  { %3728 = vmatpush1.bf16.msra.mxu0 %v5958_v42  ;;  %3810 = vmatpush1.bf16.msra.mxu1 %v5959_v45  ;;  %v5981_v42 = vld [vmem:[#allocation20 + $0xec] ss:$16 sps:$4 sm:$0xff]   ;;  %v5982_v45 = vld [vmem:[#allocation20 + $0xe0] ss:$16 sps:$4 sm:$0xff]  }
 0xcfb   :  { %3729 = vmatprep.subr.bf16.mxu0 %v5960_v14  ;;  %3811 = vmatprep.subr.bf16.mxu1 %v5961_v17  ;;  %v5983_v14 = vld [vmem:[#allocation20 + $0xe8] ss:$16 sps:$4 sm:$0xff]   ;;  %v5984_v17 = vld [vmem:[#allocation20 + $0x104] ss:$16 sps:$4 sm:$0xff]  }
 0xcfe   :  { %3730 = vmatpush1.bf16.msra.mxu0 %v5962_v47  ;;  %3812 = vmatpush1.bf16.msra.mxu1 %v5963_v18  ;;  %v5985_v47 = vld [vmem:[#allocation20 + $0x10c] ss:$16 sps:$4 sm:$0xff]   ;;  %v5986_v18 = vld [vmem:[#allocation20 + $0x100] ss:$16 sps:$4 sm:$0xff]  }
 0xcff   :  { %3731 = vmatprep.subr.bf16.mxu0 %v5964_v15  ;;  %3813 = vmatprep.subr.bf16.mxu1 %v5965_v48  ;;  %v5987_v15 = vld [vmem:[#allocation20 + $0x108] ss:$16 sps:$4 sm:$0xff]   ;;  %v5988_v48 = vld [vmem:[#allocation20 + $0x124] ss:$16 sps:$4 sm:$0xff]  }
 0xd02   :  { %3732 = vmatpush1.bf16.msra.mxu0 %v5966_v19  ;;  %3814 = vmatpush1.bf16.msra.mxu1 %v5967_v4  ;;  %v5989_v19 = vld [vmem:[#allocation20 + $0x12c] ss:$16 sps:$4 sm:$0xff]   ;;  %v5990_v4 = vld [vmem:[#allocation20 + $0x120] ss:$16 sps:$4 sm:$0xff]  }
 0xd03   :  { %3733 = vmatprep.subr.bf16.mxu0 %v5968_v25  ;;  %3815 = vmatprep.subr.bf16.mxu1 %v5969_v34  ;;  %v5991_v25 = vld [vmem:[#allocation20 + $0x128] ss:$16 sps:$4 sm:$0xff]   ;;  %v5992_v34 = vld [vmem:[#allocation20 + $0x144] ss:$16 sps:$4 sm:$0xff]  }
 0xd06   :  { %3734 = vmatpush1.bf16.msra.mxu0 %v5970_v30  ;;  %3816 = vmatpush1.bf16.msra.mxu1 %v5971_v5  ;;  %v5993_v30 = vld [vmem:[#allocation20 + $0x14c] ss:$16 sps:$4 sm:$0xff]   ;;  %v5994_v5 = vld [vmem:[#allocation20 + $0x140] ss:$16 sps:$4 sm:$0xff]  }
 0xd07   :  { %3735 = vmatprep.subr.bf16.mxu0 %v5972_v6  ;;  %3817 = vmatprep.subr.bf16.mxu1 %v5973_v7  ;;  %v5995_v6 = vld [vmem:[#allocation20 + $0x148] ss:$16 sps:$4 sm:$0xff]   ;;  %v5996_v7 = vld [vmem:[#allocation20 + $0x164] ss:$16 sps:$4 sm:$0xff]  }
 0xd0a   :  { %3736 = vmatpush1.bf16.msra.mxu0 %v5974_v8  ;;  %3818 = vmatpush1.bf16.msra.mxu1 %v5975_v10  ;;  %v5997_v8 = vld [vmem:[#allocation20 + $0x16c] ss:$16 sps:$4 sm:$0xff]   ;;  %v5998_v10 = vld [vmem:[#allocation20 + $0x160] ss:$16 sps:$4 sm:$0xff]  }
 0xd0b   :  { %3737 = vmatprep.subr.bf16.mxu0 %v5976_v11  ;;  %3819 = vmatprep.subr.bf16.mxu1 %v5977_v12  ;;  %v5999_v11 = vld [vmem:[#allocation20 + $0x168] ss:$16 sps:$4 sm:$0xff]   ;;  %v6000_v12 = vld [vmem:[#allocation20 + $0x184] ss:$16 sps:$4 sm:$0xff]  }
 0xd0e   :  { %3738 = vmatpush1.bf16.msra.mxu0 %v5978_v13  ;;  %3820 = vmatpush1.bf16.msra.mxu1 %v5979_v16  ;;  %v6001_v13 = vld [vmem:[#allocation20 + $0x18c] ss:$16 sps:$4 sm:$0xff]   ;;  %v6002_v16 = vld [vmem:[#allocation20 + $0x180] ss:$16 sps:$4 sm:$0xff]  }
 0xd0f   :  { %3739 = vmatprep.subr.bf16.mxu0 %v5980_v9  ;;  %3821 = vmatprep.subr.bf16.mxu1 %v5981_v42  ;;  %v6003_v9 = vld [vmem:[#allocation20 + $0x188] ss:$16 sps:$4 sm:$0xff]   ;;  %v6004_v42 = vld [vmem:[#allocation20 + $0x1a4] ss:$16 sps:$4 sm:$0xff]  }
 0xd12   :  { %3740 = vmatpush1.bf16.msra.mxu0 %v5982_v45  ;;  %3822 = vmatpush1.bf16.msra.mxu1 %v5983_v14  ;;  %v6005_v45 = vld [vmem:[#allocation20 + $0x1ac] ss:$16 sps:$4 sm:$0xff]   ;;  %v6006_v14 = vld [vmem:[#allocation20 + $0x1a0] ss:$16 sps:$4 sm:$0xff]  }
 0xd13   :  { %3741 = vmatprep.subr.bf16.mxu0 %v5984_v17  ;;  %3823 = vmatprep.subr.bf16.mxu1 %v5985_v47  ;;  %v6007_v17 = vld [vmem:[#allocation20 + $0x1a8] ss:$16 sps:$4 sm:$0xff]   ;;  %v6008_v47 = vld [vmem:[#allocation20 + $0x1c4] ss:$16 sps:$4 sm:$0xff]  }
 0xd16   :  { %3742 = vmatpush1.bf16.msra.mxu0 %v5986_v18  ;;  %3824 = vmatpush1.bf16.msra.mxu1 %v5987_v15  ;;  %v6009_v18 = vld [vmem:[#allocation20 + $0x1cc] ss:$16 sps:$4 sm:$0xff]   ;;  %v6010_v15 = vld [vmem:[#allocation20 + $0x1c0] ss:$16 sps:$4 sm:$0xff]  }
 0xd17   :  { %3743 = vmatprep.subr.bf16.mxu0 %v5988_v48  ;;  %3825 = vmatprep.subr.bf16.mxu1 %v5989_v19  ;;  %v6011_v48 = vld [vmem:[#allocation20 + $0x1c8] ss:$16 sps:$4 sm:$0xff]   ;;  %v6012_v19 = vld [vmem:[#allocation20 + $0x1e4] ss:$16 sps:$4 sm:$0xff]  }
 0xd1a   :  { %3744 = vmatpush1.bf16.msra.mxu0 %v5990_v4  ;;  %3826 = vmatpush1.bf16.msra.mxu1 %v5991_v25  ;;  %v6013_v4 = vld [vmem:[#allocation20 + $0x1ec] ss:$16 sps:$4 sm:$0xff]   ;;  %v6014_v25 = vld [vmem:[#allocation20 + $0x1e0] ss:$16 sps:$4 sm:$0xff]  }
 0xd1b   :  { %3745 = vmatprep.subr.bf16.mxu0 %v5992_v34  ;;  %3827 = vmatprep.subr.bf16.mxu1 %v5993_v30  ;;  %v6015_v34 = vld [vmem:[#allocation20 + $0x1e8] ss:$16 sps:$4 sm:$0xff]   ;;  %v6016_v30 = vld [vmem:[#allocation20 + $0x204] ss:$16 sps:$4 sm:$0xff]  }
 0xd1e   :  { %3746 = vmatpush1.bf16.msra.mxu0 %v5994_v5  ;;  %3828 = vmatpush1.bf16.msra.mxu1 %v5995_v6  ;;  %v6017_v5 = vld [vmem:[#allocation20 + $0x20c] ss:$16 sps:$4 sm:$0xff]  }
 0xd1f   :  { %3747 = vmatprep.subr.bf16.mxu0 %v5996_v7  ;;  %3829 = vmatprep.subr.bf16.mxu1 %v5997_v8 }
 0xd22   :  { %3748 = vmatpush1.bf16.msra.mxu0 %v5998_v10  ;;  %3830 = vmatpush1.bf16.msra.mxu1 %v5999_v11 }
 0xd23   :  { %3749 = vmatprep.subr.bf16.mxu0 %v6000_v12  ;;  %3831 = vmatprep.subr.bf16.mxu1 %v6001_v13 }
 0xd26   :  { %3750 = vmatpush1.bf16.msra.mxu0 %v6002_v16  ;;  %3832 = vmatpush1.bf16.msra.mxu1 %v6003_v9 }
 0xd27   :  { %3751 = vmatprep.subr.bf16.mxu0 %v6004_v42  ;;  %3833 = vmatprep.subr.bf16.mxu1 %v6005_v45 }
 0xd2a   :  { %3752 = vmatpush1.bf16.msra.mxu0 %v6006_v14  ;;  %3834 = vmatpush1.bf16.msra.mxu1 %v6007_v17 }
 0xd2b   :  { %3753 = vmatprep.subr.bf16.mxu0 %v6008_v47  ;;  %3835 = vmatprep.subr.bf16.mxu1 %v6009_v18 }
 0xd2e   :  { %3754 = vmatpush1.bf16.msra.mxu0 %v6010_v15  ;;  %3836 = vmatpush1.bf16.msra.mxu1 %v6011_v48 }
 0xd2f   :  { %3755 = vmatprep.subr.bf16.mxu0 %v6012_v19  ;;  %3837 = vmatprep.subr.bf16.mxu1 %v6013_v4  ;;  %v6019_v19 = vld [vmem:[#allocation20 + $0x208] ss:$16 sps:$4 sm:$0xff]   ;;  %v6022_v4 = vld [vmem:[#allocation20 + $0x220] ss:$16 sps:$4 sm:$0xff]  }
 0xd32   :  { %3756 = vmatpush1.bf16.msra.mxu0 %v6014_v25  ;;  %3838 = vmatpush1.bf16.msra.mxu1 %v6015_v34  ;;  %v6023_v25 = vld [vmem:[#allocation20 + $0x228] ss:$16 sps:$4 sm:$0xff]   ;;  %v6024_v34 = vld [vmem:[#allocation20 + $0x244] ss:$16 sps:$4 sm:$0xff]  }
 0xd33   :  { %3766 = vmatprep.subr.bf16.mxu0 %v6016_v30  ;;  %3848 = vmatprep.subr.bf16.mxu1 %v6017_v5  ;;  %v6025_v30 = vld [vmem:[#allocation20 + $0x24c] ss:$16 sps:$4 sm:$0xff]   ;;  %v6026_v5 = vld [vmem:[#allocation20 + $0x240] ss:$16 sps:$4 sm:$0xff]  }
 0xdc8   :  { %v3669_v6 = vpop.f32.mrb[40].mxu0  ;;  %v6992_v7 = vpop.f32.mrb[32].mxu1 }
 0xdc9   :  { %v3670_v8 = vadd.f32 %v3669_v6, %v6819_v60  ;;  %v3671_v10 = vpop.f32.mrb[41].mxu0  ;;  %v3712_v11 = vpop.f32.mrb[33].mxu1  ;;  %v6018_v60 = vld [vmem:[#allocation20 + $0x200] ss:$16 sps:$4 sm:$0xff]   ;;  %v6027_v6 = vld [vmem:[#allocation20 + $0x248] ss:$16 sps:$4 sm:$0xff]  }
 0xdca   :  { %v3672_v12 = vadd.f32 %v3671_v10, %v6823_v22  ;;  %v3713_v13 = vadd.f32 %v3712_v11, %v6827_v23  ;;  %v3673_v16 = vpop.f32.mrb[42].mxu0  ;;  %v3714_v9 = vpop.f32.mrb[34].mxu1  ;;  %v6020_v22 = vld [vmem:[#allocation20 + $0x224] ss:$16 sps:$4 sm:$0xff]   ;;  %v6021_v23 = vld [vmem:[#allocation20 + $0x22c] ss:$16 sps:$4 sm:$0xff]  }
 0xdcb   :  { %v3717_v42 = vmax.f32 %v3670_v8, 0.0  ;;  %v3674_v45 = vpop.f32.mrb[43].mxu0  ;;  %v3715_v14 = vpop.f32.mrb[35].mxu1  ;;  %v6028_v8 = vld [vmem:[#allocation20 + $0x264] ss:$16 sps:$4 sm:$0xff]  }
 0xdcc   :  { %v3718_v17 = vmax.f32 %v3672_v12, 0.0  ;;  %v3720_v47 = vmax.f32 %v3713_v13, 0.0  ;;  %v6029_v10 = vld [vmem:[#allocation20 + $0x26c] ss:$16 sps:$4 sm:$0xff]   ;;  %v6030_v11 = vld [vmem:[#allocation20 + $0x260] ss:$16 sps:$4 sm:$0xff]  }
 0xdcd   :  { %v3721_v15 = vpack.c.bf16 %v3717_v42, %v3717_v42  ;;  %v6031_v12 = vld [vmem:[#allocation20 + $0x268] ss:$16 sps:$4 sm:$0xff]   ;;  %v6032_v13 = vld [vmem:[#allocation20 + $0x284] ss:$16 sps:$4 sm:$0xff]   ;;  %v6033_v16 = vld [vmem:[#allocation20 + $0x28c] ss:$16 sps:$4 sm:$0xff]  }
 0xdce   :  { %v3722_v18 = vpack.c.bf16 %v3718_v17, %v3718_v17  ;;  %v3724_v48 = vpack.c.bf16 %v3720_v47, %v3720_v47  ;;  %v6034_v9 = vld [vmem:[#allocation20 + $0x280] ss:$16 sps:$4 sm:$0xff]   ;;  %v6035_v42 = vld [vmem:[#allocation20 + $0x288] ss:$16 sps:$4 sm:$0xff]   ;;  %v6036_v45 = vld [vmem:[#allocation20 + $0x2a4] ss:$16 sps:$4 sm:$0xff]  }
 0xdcf   :  { %v6037_v14 = vld [vmem:[#allocation20 + $0x2ac] ss:$16 sps:$4 sm:$0xff]   ;;  %v6038_v17 = vld [vmem:[#allocation20 + $0x2a0] ss:$16 sps:$4 sm:$0xff]   ;;  %v6039_v47 = vld [vmem:[#allocation20 + $0x2a8] ss:$16 sps:$4 sm:$0xff]  }
 0xdd0   :  { %3757 = vmatprep.mubr.bf16.mxu0 %v3722_v18  ;;  %3839 = vmatprep.mubr.bf16.mxu1 %v3722_v18  ;;  %v6040_v18 = vld [vmem:[#allocation20 + $0x2c4] ss:$16 sps:$4 sm:$0xff]  }
 0xdd1   :  { %3758 = vmatmul.mubr.bf16.vlgmr.msra.gmra.mrb[36].mxu0 %v3721_v15  ;;  %3840 = vmatmul.mubr.bf16.vlgmr.msra.gmra.mrb[28].mxu1 %v3721_v15  ;;  %v6041_v15 = vld [vmem:[#allocation20 + $0x2cc] ss:$16 sps:$4 sm:$0xff]  }
 0xdd2   :  { %3767 = vmatpush1.bf16.msra.mxu0 %v6018_v60  ;;  %3849 = vmatpush1.bf16.msra.mxu1 %v6019_v19  ;;  %v6043_v60 = vld [vmem:[#allocation20 + $0x2c8] ss:$16 sps:$4 sm:$0xff]   ;;  %v6044_v19 = vld [vmem:[#allocation20 + $0x2e4] ss:$16 sps:$4 sm:$0xff]  }
 0xdd3   :  { %3798 = vmatprep.mubr.bf16.mxu0 %v3724_v48  ;;  %3880 = vmatprep.mubr.bf16.mxu1 %v3724_v48  ;;  %v6042_v48 = vld [vmem:[#allocation20 + $0x2c0] ss:$16 sps:$4 sm:$0xff]  }
 0xdd4   :  { %3768 = vmatprep.subr.bf16.mxu0 %v6020_v22  ;;  %3850 = vmatprep.subr.bf16.mxu1 %v6021_v23  ;;  %v6045_v22 = vld [vmem:[#allocation20 + $0x2ec] ss:$16 sps:$4 sm:$0xff]   ;;  %v6046_v23 = vld [vmem:[#allocation20 + $0x2e0] ss:$16 sps:$4 sm:$0xff]  }
 0xdd6   :  { %3769 = vmatpush1.bf16.msra.mxu0 %v6022_v4  ;;  %3851 = vmatpush1.bf16.msra.mxu1 %v6023_v25  ;;  %v6047_v4 = vld [vmem:[#allocation20 + $0x2e8] ss:$16 sps:$4 sm:$0xff]   ;;  %v6048_v25 = vld [vmem:[#allocation20 + $0x304] ss:$16 sps:$4 sm:$0xff]  }
 0xdd7   :  { %3770 = vmatprep.subr.bf16.mxu0 %v6024_v34  ;;  %3852 = vmatprep.subr.bf16.mxu1 %v6025_v30  ;;  %v6049_v34 = vld [vmem:[#allocation20 + $0x30c] ss:$16 sps:$4 sm:$0xff]   ;;  %v6050_v30 = vld [vmem:[#allocation20 + $0x300] ss:$16 sps:$4 sm:$0xff]  }
 0xdda   :  { %3771 = vmatpush1.bf16.msra.mxu0 %v6026_v5  ;;  %3853 = vmatpush1.bf16.msra.mxu1 %v6027_v6  ;;  %v6051_v5 = vld [vmem:[#allocation20 + $0x308] ss:$16 sps:$4 sm:$0xff]  }
 0xddb   :  { %3772 = vmatprep.subr.bf16.mxu0 %v6028_v8  ;;  %3854 = vmatprep.subr.bf16.mxu1 %v6029_v10 }
 0xdde   :  { %3773 = vmatpush1.bf16.msra.mxu0 %v6030_v11  ;;  %3855 = vmatpush1.bf16.msra.mxu1 %v6031_v12 }
 0xddf   :  { %3774 = vmatprep.subr.bf16.mxu0 %v6032_v13  ;;  %3856 = vmatprep.subr.bf16.mxu1 %v6033_v16 }
 0xde2   :  { %3775 = vmatpush1.bf16.msra.mxu0 %v6034_v9  ;;  %3857 = vmatpush1.bf16.msra.mxu1 %v6035_v42 }
 0xde3   :  { %3776 = vmatprep.subr.bf16.mxu0 %v6036_v45  ;;  %3858 = vmatprep.subr.bf16.mxu1 %v6037_v14 }
 0xde6   :  { %3777 = vmatpush1.bf16.msra.mxu0 %v6038_v17  ;;  %3859 = vmatpush1.bf16.msra.mxu1 %v6039_v47 }
 0xde7   :  { %3778 = vmatprep.subr.bf16.mxu0 %v6040_v18  ;;  %3860 = vmatprep.subr.bf16.mxu1 %v6041_v15 }
 0xdea   :  { %3779 = vmatpush1.bf16.msra.mxu0 %v6042_v48  ;;  %3861 = vmatpush1.bf16.msra.mxu1 %v6043_v60 }
 0xdeb   :  { %3780 = vmatprep.subr.bf16.mxu0 %v6044_v19  ;;  %3862 = vmatprep.subr.bf16.mxu1 %v6045_v22 }
 0xdee   :  { %3781 = vmatpush1.bf16.msra.mxu0 %v6046_v23  ;;  %3863 = vmatpush1.bf16.msra.mxu1 %v6047_v4 }
 0xdef   :  { %3782 = vmatprep.subr.bf16.mxu0 %v6048_v25  ;;  %3864 = vmatprep.subr.bf16.mxu1 %v6049_v34 }
 0xdf2   :  { %3783 = vmatpush1.bf16.msra.mxu0 %v6050_v30  ;;  %3865 = vmatpush1.bf16.msra.mxu1 %v6051_v5 }
 0xdf3   :  { %3784 = vmatprep.subr.bf16.mxu0 %v6834_v28  ;;  %3866 = vmatprep.subr.bf16.mxu1 %v6836_v29  ;;  %v3711_v28 = vadd.f32 %v6992_v7, %v6895_v43  ;;  %v1313_v43 = vld [vmem:[#allocation2 + $0xd] sm:$0xf] }
 0xdf5   :  { %v3719_v29 = vmax.f32 %v3711_v28, 0.0 }
 0xdf6   :  { %3785 = vmatpush1.bf16.msra.mxu0 %v6838_v31  ;;  %3867 = vmatpush1.bf16.msra.mxu1 %v6840_v32  ;;  %v5693_v31 = vld [vmem:[#allocation22 + $0x40] sm:$0xff]  }
 0xdf7   :  { %3786 = vmatprep.subr.bf16.mxu0 %v6844_v33  ;;  %3868 = vmatprep.subr.bf16.mxu1 %v6846_v35  ;;  %v5694_v32 = vld [vmem:[#allocation22] sm:$0xff]   ;;  %v3723_v33 = vpack.c.bf16 %v3719_v29, %v3719_v29  ;;  %v5695_v35 = vld [vmem:[#allocation22 + $0x48] sm:$0xff]  }
 0xdfa   :  { %3787 = vmatpush1.bf16.msra.mxu0 %v6850_v36  ;;  %3869 = vmatpush1.bf16.msra.mxu1 %v6852_v37  ;;  %v5696_v36 = vld [vmem:[#allocation22 + $0x8] sm:$0xff]   ;;  %v5697_v37 = vld [vmem:[#allocation22 + $0x50] sm:$0xff]  }
 0xdfb   :  { %3788 = vmatprep.subr.bf16.mxu0 %v6856_v38  ;;  %3870 = vmatprep.subr.bf16.mxu1 %v6858_v39  ;;  %v5698_v38 = vld [vmem:[#allocation22 + $0x10] sm:$0xff]   ;;  %v5699_v39 = vld [vmem:[#allocation22 + $0x58] sm:$0xff]  }
 0xdfe   :  { %3789 = vmatpush1.bf16.msra.mxu0 %v6862_v40  ;;  %3871 = vmatpush1.bf16.msra.mxu1 %v6864_v41  ;;  %v5700_v40 = vld [vmem:[#allocation22 + $0x18] sm:$0xff]   ;;  %v5701_v41 = vld [vmem:[#allocation22 + $0x60] sm:$0xff]  }
 0xdff   :  { %3790 = vmatprep.subr.bf16.mxu0 %v6868_v49  ;;  %3872 = vmatprep.subr.bf16.mxu1 %v6870_v50  ;;  %v5702_v49 = vld [vmem:[#allocation22 + $0x20] sm:$0xff]   ;;  %v5703_v50 = vld [vmem:[#allocation22 + $0x68] sm:$0xff]  }
 0xe02   :  { %3791 = vmatpush1.bf16.msra.mxu0 %v6874_v51  ;;  %3873 = vmatpush1.bf16.msra.mxu1 %v6876_v52  ;;  %v5704_v51 = vld [vmem:[#allocation22 + $0x28] sm:$0xff]   ;;  %v5705_v52 = vld [vmem:[#allocation22 + $0x70] sm:$0xff]  }
 0xe03   :  { %3792 = vmatprep.subr.bf16.mxu0 %v6883_v54  ;;  %3874 = vmatprep.subr.bf16.mxu1 %v6885_v55  ;;  %v5706_v54 = vld [vmem:[#allocation22 + $0x30] sm:$0xff]   ;;  %v5707_v55 = vld [vmem:[#allocation22 + $0x78] sm:$0xff]  }
 0xe06   :  { %3793 = vmatpush1.bf16.msra.mxu0 %v6889_v56  ;;  %3875 = vmatpush1.bf16.msra.mxu1 %v6891_v57  ;;  %v5708_v56 = vld [vmem:[#allocation22 + $0x38] sm:$0xff]   ;;  %v5709_v57 = vld [vmem:[#allocation22 + $0xc0] sm:$0xff]  }
 0xe07   :  { %3794 = vmatprep.subr.bf16.mxu0 %v6899_v58  ;;  %3876 = vmatprep.subr.bf16.mxu1 %v6901_v59  ;;  %v2361_v58 = vld [vmem:[#allocation2 + $0x15] sm:$0xf]  ;;  %v1318_v59 = vrot.slane %v1313_v43, %v6783_v44 }
 0xe08   :  { %v2378_v7 = vrot.slane %v2361_v58, %v6815_v21 }
 0xe0a   :  { %3795 = vmatpush1.bf16.msra.mxu0 %v6905_v61  ;;  %3877 = vmatpush1.bf16.msra.mxu1 %v6907_v62  ;;  %v2366_v61 = vrot.slane %v2361_v58, %v6783_v44  ;;  %v1326_v62 = vrot.slane %v1313_v43, %v6879_v53 }
 0xe0b   :  { %3796 = vmatprep.subr.bf16.mxu0 %v6913_v63  ;;  %3878 = vmatprep.subr.bf16.mxu1 %v6915_v1  ;;  %v2374_v63 = vrot.slane %v2361_v58, %v6879_v53  ;;  %v1322_v1 = vrot.slane %v1313_v43, %v6786_v46 }
 0xe0c   :  { %v5094_v6 = vadd.f32 %v2366_v61, %v1318_v59  ;;  %v5725_v59 = vld [vmem:[%s7123_s14] sm:$0xff]   ;;  %v5726_v61 = vld [vmem:[%s7123_s14 + $0x8] sm:$0xff]  }
 0xe0d   :  { %v5098_v8 = vadd.f32 %v2374_v63, %v1326_v62  ;;  %v5727_v62 = vld [vmem:[%s7123_s14 + $0x10] sm:$0xff]   ;;  %v5728_v63 = vld [vmem:[%s7123_s14 + $0x18] sm:$0xff]  }
 0xe0e   :  { %3797 = vmatpush1.bf16.msra.mxu0 %v6919_v2  ;;  %3879 = vmatpush1.bf16.msra.mxu1 %v6921_v3  ;;  %v2370_v2 = vrot.slane %v2361_v58, %v6786_v46  ;;  %v1330_v3 = vrot.slane %v1313_v43, %v6815_v21  ;;  %v5095_v12 = vadd.f32 %v5094_v6, %v6952_v24  ;;  %v5724_v43 = vld [vmem:[#allocation22 + $0xb8] sm:$0xff]  }
 0xe0f   :  { %4879 = vmatprep.subr.bf16.mxu0 %v5693_v31  ;;  %5068 = vmatprep.subr.bf16.mxu1 %v6441_v0  ;;  %v5099_v44 = vadd.f32 %v5098_v8, %v6954_v26 }
 0xe10   :  { %v5096_v10 = vadd.f32 %v2370_v2, %v1322_v1  ;;  %v5100_v11 = vadd.f32 %v2378_v7, %v1330_v3  ;;  %v3191_v15 = vmax.f32 %v5095_v12, 0.0  ;;  %v5729_v1 = vld [vmem:[%s7123_s14 + $0x20] sm:$0xff]   ;;  %v5730_v2 = vld [vmem:[%s7123_s14 + $0x28] sm:$0xff]   ;;  %v5731_v3 = vld [vmem:[%s7123_s14 + $0x30] sm:$0xff]  }
 0xe11   :  { %3799 = vmatmul.mubr.bf16.vlgmr.msra.gmra.mrb[36].mxu0 %v3723_v33  ;;  %3881 = vmatmul.mubr.bf16.vlgmr.msra.gmra.mrb[28].mxu1 %v3723_v33  ;;  %v3193_v48 = vmax.f32 %v5099_v44, 0.0  ;;  %v5710_v33 = vld [vmem:[#allocation22 + $0x80] sm:$0xff]   ;;  %v4779_v44 = vld [vmem:[#allocation2 + $0x19] ss:$0 sm:$0xff] }
 0xe12   :  { %4880 = vmatpush3.bf16.msra.mxu0 %v5694_v32  ;;  %5084 = vmatprep.mubr.msk.bf16.mxu1 %vm6442_vm0, %v6441_v0  ;;  %v5097_v13 = vadd.f32 %v5096_v10, %v6956_v27  ;;  %v5101_v53 = vadd.f32 %v5100_v11, %v6958_v20  ;;  %v5732_v7 = vld [vmem:[%s7123_s14 + $0x38] sm:$0xff]   ;;  %s4387_s14 = sshll.u32 %s6444_s23, 4  ;;  %s4388_s14 = int_to_ptr.vmem [resolvable:$true] %s4387_s14 }
 0xe13   :  { %4881 = vmatprep.subr.bf16.mxu0 %v5695_v35  ;;  %5069 = vmatpush3.bf16.msra.mxu1 %v5725_v59  ;;  %s6338_s7 = scalar_lea.vmem %s4388_s14, 128  ;;  %p6343_p7 = scmp.lt.s32.totalorder %s4388_s14, %s4388_s14 }
 0xe14   :  { %v3192_v22 = vmax.f32 %v5097_v13, 0.0  ;;  %v3194_v27 = vmax.f32 %v5101_v53, 0.0  ;;  %5070 = vmatprep.subr.bf16.mxu1 %v6441_v0  ;;  %p6339_p6 = scmp.ne.s32.totalorder %s4388_s14, %s6338_s7  ;;  %p6344_p8 = scmp.lt.s32.totalorder %s6338_s7, %s6338_s7 }
 0xe16   :  { %4882 = vmatpush3.bf16.msra.mxu0 %v5696_v36  ;;  %v5711_v36 = vld [vmem:[#allocation22 + $0xc8] sm:$0xff]   ;;  %p6345_p9 = por %p6344_p8, %p6343_p7 }
 0xe17   :  { %4883 = vmatprep.subr.bf16.mxu0 %v5697_v37  ;;  %5071 = vmatpush3.bf16.msra.mxu1 %v5726_v61 }
 0xe18   :  { %5072 = vmatprep.subr.bf16.mxu1 %v6441_v0  ;;  %p6346_p10 = pnand %p6345_p9, %p6339_p6 }
 0xe1a   :  { %4884 = vmatpush3.bf16.msra.mxu0 %v5698_v38  ;;  %v5712_v38 = vld [vmem:[#allocation22 + $0x88] sm:$0xff]  }
 0xe1b   :  { %4885 = vmatprep.subr.bf16.mxu0 %v5699_v39  ;;  %v5713_v39 = vld [vmem:[#allocation22 + $0xd0] sm:$0xff]   ;;  %5073 = vmatpush3.bf16.msra.mxu1 %v5727_v62 }
 0xe1c   :  { %5074 = vmatprep.subr.bf16.mxu1 %v6441_v0 }
 0xe1e   :  { %4886 = vmatpush3.bf16.msra.mxu0 %v5700_v40  ;;  %v5714_v40 = vld [vmem:[#allocation22 + $0x90] sm:$0xff]  }
 0xe1f   :  { %4887 = vmatprep.subr.bf16.mxu0 %v5701_v41  ;;  %v5715_v41 = vld [vmem:[#allocation22 + $0xd8] sm:$0xff]   ;;  %5075 = vmatpush3.bf16.msra.mxu1 %v5728_v63 }
 0xe20   :  { %5076 = vmatprep.subr.bf16.mxu1 %v6441_v0 }
 0xe22   :  { %4888 = vmatpush3.bf16.msra.mxu0 %v5702_v49  ;;  %v5716_v49 = vld [vmem:[#allocation22 + $0x98] sm:$0xff]  }
 0xe23   :  { %4889 = vmatprep.subr.bf16.mxu0 %v5703_v50  ;;  %v5717_v50 = vld [vmem:[#allocation22 + $0xe0] sm:$0xff]   ;;  %5077 = vmatpush3.bf16.msra.mxu1 %v5729_v1 }
 0xe24   :  { %5078 = vmatprep.subr.bf16.mxu1 %v6441_v0 }
 0xe26   :  { %4890 = vmatpush3.bf16.msra.mxu0 %v5704_v51  ;;  %v5718_v51 = vld [vmem:[#allocation22 + $0xa0] sm:$0xff]  }
 0xe27   :  { %4891 = vmatprep.subr.bf16.mxu0 %v5705_v52  ;;  %v5719_v52 = vld [vmem:[#allocation22 + $0xe8] sm:$0xff]   ;;  %5079 = vmatpush3.bf16.msra.mxu1 %v5730_v2 }
 0xe28   :  { %5080 = vmatprep.subr.bf16.mxu1 %v6441_v0 }
 0xe2a   :  { %4892 = vmatpush3.bf16.msra.mxu0 %v5706_v54  ;;  %v5720_v54 = vld [vmem:[#allocation22 + $0xa8] sm:$0xff]  }
 0xe2b   :  { %4893 = vmatprep.subr.bf16.mxu0 %v5707_v55  ;;  %v5721_v55 = vld [vmem:[#allocation22 + $0xf0] sm:$0xff]   ;;  %5081 = vmatpush3.bf16.msra.mxu1 %v5731_v3 }
 0xe2c   :  { %5082 = vmatprep.subr.bf16.mxu1 %v6441_v0 }
 0xe2e   :  { %4894 = vmatpush3.bf16.msra.mxu0 %v5708_v56  ;;  %v5722_v56 = vld [vmem:[#allocation22 + $0xb0] sm:$0xff]  }
 0xe2f   :  { %4901 = vmatprep.subr.bf16.mxu0 %v5709_v57  ;;  %v5723_v57 = vld [vmem:[#allocation22 + $0xf8] sm:$0xff]   ;;  %5083 = vmatpush3.bf16.msra.mxu1 %v5732_v7 }
 0xee4   :  { %v3800_v16 = vpop.f32.mrb[36].mxu0  ;;  %v3882_v9 = vpop.f32.mrb[28].mxu1 }
 0xee5   :  { %v5109_v42 = vadd.f32 %v5094_v6, %v3800_v16  ;;  %v5113_v46 = vadd.f32 %v5098_v8, %v3882_v9  ;;  %v3802_v45 = vpop.f32.mrb[37].mxu0  ;;  %v3884_v14 = vpop.f32.mrb[29].mxu1 }
 0xee6   :  { %v5111_v17 = vadd.f32 %v5096_v10, %v3802_v45  ;;  %v5115_v21 = vadd.f32 %v5100_v11, %v3884_v14  ;;  %v3804_v47 = vpop.f32.mrb[38].mxu0  ;;  %v3886_v18 = vpop.f32.mrb[30].mxu1 }
 0xee7   :  { %v3893_v60 = vmax.f32 %v5109_v42, 0.0  ;;  %v3895_v24 = vmax.f32 %v5113_v46, 0.0  ;;  %v3805_v19 = vpop.f32.mrb[39].mxu0  ;;  %v3887_v26 = vpop.f32.mrb[31].mxu1 }
 0xee8   :  { %v3894_v23 = vmax.f32 %v5111_v17, 0.0  ;;  %v3896_v20 = vmax.f32 %v5115_v21, 0.0 }
 0xee9   :  { %v3897_v4 = vadd.f32 %v3893_v60, %v3191_v15  ;;  %v3899_v25 = vadd.f32 %v3895_v24, %v3193_v48 }
 0xeea   :  { %v3898_v34 = vadd.f32 %v3894_v23, %v3192_v22  ;;  %v3900_v30 = vadd.f32 %v3896_v20, %v3194_v27 }
 0xeeb   :  { %v3901_v5 = vmul.f32 0.5, %v3897_v4  ;;  %v3903_v28 = vmul.f32 0.5, %v3899_v25 }
 0xeec   :  { %v3902_v29 = vmul.f32 0.5, %v3898_v34  ;;  %v3904_v31 = vmul.f32 0.5, %v3900_v30 }
 0xeed   :  { %3905 = vst [vmem:[#allocation23] sm:$0xff] %v3901_v5  ;;  %3907 = vst [vmem:[#allocation23 + $0x10] sm:$0xff] %v3903_v28  ;;  %v3909_v35 = vpack.c.bf16 %v3901_v5, %v3901_v5  ;;  %v3911_v58 = vpack.c.bf16 %v3903_v28, %v3903_v28 }
 0xeee   :  { %3906 = vst [vmem:[#allocation23 + $0x8] sm:$0xff] %v3902_v29  ;;  %3908 = vst [vmem:[#allocation23 + $0x18] sm:$0xff] %v3904_v31  ;;  %v3910_v32 = vpack.c.bf16 %v3902_v29, %v3902_v29  ;;  %v3912_v37 = vpack.c.bf16 %v3904_v31, %v3904_v31 }
 0xef0   :  { %4208 = vmatprep.mubr.bf16.mxu0 %v3910_v32 }
 0xef1   :  { %4209 = vmatmul.mubr.bf16.vlgmr.msra.gmra.mrb[44].mxu0 %v3909_v35 }
 0xef2   :  { %4902 = vmatpush3.bf16.msra.mxu0 %v5710_v33  ;;  %4248 = vmatprep.mubr.bf16.mxu0 %v3912_v37 }
 0xef3   :  { %4903 = vmatprep.subr.bf16.mxu0 %v5711_v36 }
 0xef6   :  { %4904 = vmatpush3.bf16.msra.mxu0 %v5712_v38 }
 0xef7   :  { %4905 = vmatprep.subr.bf16.mxu0 %v5713_v39 }
 0xefa   :  { %4906 = vmatpush3.bf16.msra.mxu0 %v5714_v40 }
 0xefb   :  { %4907 = vmatprep.subr.bf16.mxu0 %v5715_v41 }
 0xefe   :  { %4908 = vmatpush3.bf16.msra.mxu0 %v5716_v49 }
 0xeff   :  { %4909 = vmatprep.subr.bf16.mxu0 %v5717_v50 }
 0xf02   :  { %4910 = vmatpush3.bf16.msra.mxu0 %v5718_v51 }
 0xf03   :  { %4911 = vmatprep.subr.bf16.mxu0 %v5719_v52 }
 0xf06   :  { %4912 = vmatpush3.bf16.msra.mxu0 %v5720_v54 }
 0xf07   :  { %4913 = vmatprep.subr.bf16.mxu0 %v5721_v55 }
 0xf0a   :  { %4914 = vmatpush3.bf16.msra.mxu0 %v5722_v56 }
 0xf0b   :  { %4915 = vmatprep.subr.bf16.mxu0 %v5723_v57 }
 0xf0e   :  { %4916 = vmatpush3.bf16.msra.mxu0 %v5724_v43 }
 0xf11   :  { %4249 = vmatmul.mubr.bf16.vlgmr.msra.gmra.mrb[48].mxu0 %v3911_v58 }
 0xfc4   :  { %v4895_v6 = vpop.f32.mrb[44].mxu0 }
 0xfc5   :  { %v4896_v8 = vpop.f32.mrb[45].mxu0 }
 0xfc6   :  { %v4897_v10 = vadd.f32 %v4896_v8, %v4895_v6  ;;  %v4898_v11 = vpop.f32.mrb[46].mxu0 }
 0xfc7   :  { %v4899_v12 = vpop.f32.mrb[47].mxu0 }
 0xfc8   :  { %v4211_v16 = vadd.f32 %v4897_v10, %v4779_v44 }
 0xfe4   :  { %v4917_v13 = vpop.f32.mrb[48].mxu0 }
 0xfe5   :  { %v4918_v53 = vpop.f32.mrb[49].mxu0 }
 0xfe6   :  { %v4919_v9 = vadd.f32 %v4918_v53, %v4917_v13  ;;  %v4920_v42 = vpop.f32.mrb[50].mxu0 }
 0xfe7   :  { %v4921_v46 = vpop.f32.mrb[51].mxu0 }
 0xfe8   :  { %v4251_v45 = vadd.f32 %v4919_v9, %v4211_v16 }
 0xfea   :  { %v4256_v14 = vmax.f32 %v4251_v45, 0.0 }
 0xfec   :  { %v4258_v0 = vpack.c.bf16 %v4256_v14, %v4256_v14  ;;  %4257 = vst [vmem:[#allocation24] sm:$0xff] %v4256_v14 }
 0xfee   :  { %5085 = vmatmul.mubr.bf16.vlgmr.msra.gmra.mrb[36].mxu1 %v4258_v0 }
 0xfef   :  { %6349 = shalt.err (!%p6346_p10)
}
 0xff0   :  { %s6350_s8 = scalar_lea.hbm %s7125_s16, 128 }
 0xff1   :  { %p6351_p11 = scmp.ne.s32.totalorder %s7125_s16, %s6350_s8  ;;  %p6354_p12 = scmp.lt.u32.totalorder %s6350_s8, %s7125_s16 }
 0xff3   :  { %p6356_p13 = pnand %p6354_p12, %p6351_p11 }
 0xff5   :  { %6359 = shalt.err (!%p6356_p13)
}
 0xff6   :  { %4390 = dma.vmem_to_hbm [thread:$0]  %s4388_s14, 128, %s7125_s16, [#allocation25]  }
 0xff7   :  { %s6360_s10 = scalar_lea.vmem %s4378_s26, 512  ;;  %p6365_p1 = scmp.lt.s32.totalorder %s4378_s26, %s4378_s26 }
 0xff8   :  { %p6361_p0 = scmp.ne.s32.totalorder %s4378_s26, %s6360_s10  ;;  %p6366_p2 = scmp.lt.s32.totalorder %s6360_s10, %s6360_s10 }
 0xffa   :  { %p6367_p3 = por %p6366_p2, %p6365_p1 }
 0xffc   :  { %p6368_p4 = pnand %p6367_p3, %p6361_p0 }
 0xffe   :  { %6371 = shalt.err (!%p6368_p4)
}
 0xfff   :  { %s6372_s5 = scalar_lea.hbm %s7124_s15, 512 }
0x1000   :  { %p6373_p5 = scmp.ne.s32.totalorder %s7124_s15, %s6372_s5  ;;  %p6376_p6 = scmp.lt.u32.totalorder %s6372_s5, %s7124_s15 }
0x1002   :  { %p6378_p7 = pnand %p6376_p6, %p6373_p5 }
0x1004   :  { %6381 = shalt.err (!%p6378_p7)
}
0x1005   :  { %4380 = dma.vmem_to_hbm [thread:$0]  %s4378_s26, 512, %s7124_s15, [#allocation4]   ;;  %v4812_v17 = vld [vmem:[#allocation2 + $0x1a] ss:$0 sm:$0xff] }
0x1006   :  { %s6446_s9 = smov [#allocation26]  }
0x1007   :  { %s4397_s27 = sshll.u32 %s6446_s9, 4  ;;  %s4398_s27 = int_to_ptr.vmem [resolvable:$true] %s4397_s27 }
0x1008   :  { %s6382_s0 = scalar_lea.vmem %s4398_s27, 128  ;;  %p6387_p9 = scmp.lt.s32.totalorder %s4398_s27, %s4398_s27 }
0x1009   :  { %p6383_p8 = scmp.ne.s32.totalorder %s4398_s27, %s6382_s0  ;;  %p6388_p10 = scmp.lt.s32.totalorder %s6382_s0, %s6382_s0 }
0x100b   :  { %p6389_p11 = por %p6388_p10, %p6387_p9 }
0x100d   :  { %p6390_p12 = pnand %p6389_p11, %p6383_p8 }
0x10c1   :  { %v4364_v21 = vpop.f32.mrb[36].mxu1 }
0x10c2   :  { %v4365_v47 = vadd.f32 %v4812_v17, %v4364_v21  ;;  %v5086_v18 = vpop.f32.mrb[37].mxu1 }
0x10c3   :  { %v4367_v15 = vpop.f32.mrb[38].mxu1 }
0x10c4   :  { %4370 = vst [vmem:[#allocation26] sm:$0xff] %v4365_v47  ;;  %v5087_v48 = vpop.f32.mrb[39].mxu1 }
0x10c5   :  { %6393 = shalt.err (!%p6390_p12)
}
0x10c6   :  { %s7135_s15 = sld [smem:[#allocation38_spill]] }
0x10cc   :  { %s6394_s22 = scalar_lea.hbm %s7135_s15, 128 }
0x10cd   :  { %p6395_p13 = scmp.ne.s32.totalorder %s7135_s15, %s6394_s22  ;;  %p6398_p0 = scmp.lt.u32.totalorder %s6394_s22, %s7135_s15 }
0x10cf   :  { %p6400_p1 = pnand %p6398_p0, %p6395_p13 }
0x10d1   :  { %6403 = shalt.err (!%p6400_p1)
}
0x10d2   :  { %4400 = dma.vmem_to_hbm [thread:$0]  %s4398_s27, 128, %s7135_s15, [#allocation25]  }
0x10d3   :  { %6418 = dma.done.wait [#allocation4], 512  }
0x10d4   :  { %6419 = vsyncadd [#allocation4], 4294966784 }
0x10d5   :  { %6420 = dma.done.wait [#allocation25], 256  }
0x10d6   :  { %6421 = vsyncadd [#allocation25], 4294967040 }
0x10d7   :  { %4410 = vsyncpa [#allocation3], 1 }
0x10d8   :  { %4411 = vsyncpa [#allocation6], 1 }
0x10d9   :  { %4412 = vsyncpa [#allocation9], 1 }
0x10da   :  { %4413 = vsyncpa [#allocation12], 1 }
0x10db   :  { %4414 = vsyncpa [#allocation15], 1 }
0x10dc   :  { %4415 = vsyncpa [#allocation18], 1 }
0x10dd   :  { %4416 = vsyncpa [#allocation21], 1 }
0x10de   :  { %4417 = vsyncpa [#allocation4], 1 }
0x10df   :  { %4418 = vsyncpa [#allocation25], 1 }

</bundles_post_ra>
